<compile_context>
chip_gen: v7x
topology: tpu7x:2x2x1
jax: 0.10.0
libtpu: 0.0.40
codegen_flags: <defaults>
</compile_context>

<pallas_src>
import functools

import jax
import jax.numpy as jnp
from jax.experimental import pallas as pl
from jax.experimental.pallas import tpu as pltpu


_ROW_TILE_CAP = 1024  # rows per grid step (amortizes ~0.35us/step; still tiny in VMEM)


def _row_tile(n, pack=16):
    """Row-tile size: capped, multiple of `pack`, aiming for >= 2 tiles (v7x 2-TC)."""
    if n <= pack:
        return n
    tm = min(_ROW_TILE_CAP, -(-n // 2))        # aim for at least 2 tiles
    tm = -(-tm // pack) * pack                 # round up to packing granule
    return min(tm, n)


def _batch_tile(b, l):
    """Batches per grid step for the SSA kernel (rows = bt * l <= cap, >=2 tiles)."""
    cap = max(1, _ROW_TILE_CAP // max(l, 1))
    bt = min(cap, -(-b // 2)) if b >= 2 else 1
    return max(1, min(bt, b))


def _vec2d(v):
    return v.reshape(1, -1)


# ---------------------------------------------------------------------------
# In-kernel helpers
# ---------------------------------------------------------------------------

def _ln(y, g, b, eps):
    # single-pass LayerNorm statistics (one fewer lane-axis reduction per LN)
    mu = jnp.mean(y, axis=-1, keepdims=True)
    var = jnp.maximum(jnp.mean(y * y, axis=-1, keepdims=True) - mu * mu, 0.0)
    return (y - mu) * jax.lax.rsqrt(var + eps) * g + b


def _lif_step(x, v_ref, t, tau, v_th):
    # spikingjelly LIFNode (decay_input=True, v_reset=0.0, hard reset), step mode 'm':
    #   v <- v + (x - v)/tau ; spike = (v >= v_th) ; v <- 0 where spiked
    @pl.when(t == 0)
    def _():
        v_ref[...] = jnp.zeros_like(v_ref)

    v = v_ref[...] + (x - v_ref[...]) * (1.0 / tau)
    fired = v >= v_th
    v_ref[...] = jnp.where(fired, 0.0, v)
    return fired.astype(jnp.float32)


# ---------------------------------------------------------------------------
# Kernel bodies
# ---------------------------------------------------------------------------

def _rpe_ln_lif_kernel(x_ref, g_ref, b_ref, o_ref, y_ref, m_ref, *, eps, tau, v_th):
    # Top LayerNorm is identical for every time step: compute it once (t==0) into a
    # VMEM scratch and only run the LIF update per t.  Spikes stored as bf16.
    t = pl.program_id(1)

    @pl.when(t == 0)
    def _():
        y_ref[...] = _ln(x_ref[...], g_ref[...], b_ref[...], eps)

    o_ref[...] = _lif_step(y_ref[...], m_ref, t, tau, v_th).astype(o_ref.dtype)


def _ssa_block_kernel(x_ref, wqkv_ref, g3_ref, b3_ref, mask_ref,
                      wp_ref, bp_ref, pg_ref, pb_ref, o_ref,
                      mq_ref, mk_ref, mv_ref, ma_ref, mp_ref,
                      *, eps, tau, v_th, attn_v_th, H):
    # Entire SSA block for one (batch tile, t) step, residual add included.
    t = pl.program_id(1)
    G, L, _ = x_ref.shape
    R = G * L

    xb = x_ref[...]                                        # (G, L, H) bf16 residual
    x2 = xb.reshape(R, H)

    # fused q|k|v projection: single bf16 MXU pass to a 3H-lane intermediate
    y = jnp.dot(x2, wqkv_ref[...], preferred_element_type=jnp.float32)   # (R, 3H) f32
    g3 = g3_ref[...]
    b3 = b3_ref[...]

    def qkv_spike(idx, m_ref):
        lo = idx * H
        yc = _ln(y[:, lo:lo + H], g3[:, lo:lo + H], b3[:, lo:lo + H], eps)
        return _lif_step(yc, m_ref, t, tau, v_th)          # (R, H) f32 in {0,1}

    q_s = qkv_spike(0, mq_ref).astype(jnp.bfloat16).reshape(G, L, H)
    k_f = qkv_spike(1, mk_ref).reshape(G, L, H)
    k_t = jnp.swapaxes(k_f, 1, 2).astype(jnp.bfloat16)     # (G, H, L)
    v_s = qkv_spike(2, mv_ref).astype(jnp.bfloat16).reshape(G, L, H)

    # spiking self-attention (no softmax): per head q_h @ (k_h^T @ v_h) * scale,
    # all heads at once via the pre-scaled block-diagonal head mask.
    kv = jnp.einsum('ghl,gle->ghe', k_t, v_s,
                    preferred_element_type=jnp.float32)    # (G, H, H) f32
    kv = (kv * mask_ref[...]).astype(jnp.bfloat16)         # exact: counts*2^-3
    attn = jnp.einsum('glh,ghe->gle', q_s, kv,
                      preferred_element_type=jnp.float32)  # (G, L, H) f32

    # attn_lif (v_th = 0.5) -> proj linear -> LayerNorm -> proj_lif -> residual add
    s_a = _lif_step(attn.reshape(R, H), ma_ref, t, tau, attn_v_th)
    yp = jnp.dot(s_a.astype(jnp.bfloat16), wp_ref[...],
                 preferred_element_type=jnp.float32) + bp_ref[...]
    yp = _ln(yp, pg_ref[...], pb_ref[...], eps)
    s_p = _lif_step(yp, mp_ref, t, tau, v_th)
    o_ref[...] = (x2.astype(jnp.float32) + s_p).reshape(G, L, H).astype(o_ref.dtype)


def _mlp_block_kernel(x_ref, w1_ref, b1_ref, g1_ref, be1_ref,
                      w2_ref, b2_ref, g2_ref, be2_ref, o_ref,
                      m1_ref, m2_ref, *, eps, tau, v_th, mean_inv_t):
    # fc1 -> LN -> LIF -> fc2 -> LN -> LIF -> residual, fully fused.  With
    # mean_inv_t set, the temporal mean over T is accumulated into the resident
    # output block (indexed by the row tile only) instead of writing (T, N, H).
    t = pl.program_id(1)
    xb = x_ref[...]                                        # (TM, H) bf16

    y1 = jnp.dot(xb, w1_ref[...], preferred_element_type=jnp.float32) + b1_ref[...]
    y1 = _ln(y1, g1_ref[...], be1_ref[...], eps)
    s1 = _lif_step(y1, m1_ref, t, tau, v_th).astype(jnp.bfloat16)

    y2 = jnp.dot(s1, w2_ref[...], preferred_element_type=jnp.float32) + b2_ref[...]
    y2 = _ln(y2, g2_ref[...], be2_ref[...], eps)
    s2 = _lif_step(y2, m2_ref, t, tau, v_th)

    out_t = xb.astype(jnp.float32) + s2
    if mean_inv_t is None:
        o_ref[...] = out_t.astype(o_ref.dtype)
    else:
        @pl.when(t == 0)
        def _():
            o_ref[...] = out_t * mean_inv_t

        @pl.when(t != 0)
        def _():
            o_ref[...] = o_ref[...] + out_t * mean_inv_t


def _linear_kernel(x_ref, w_ref, b_ref, o_ref):
    o_ref[...] = (jnp.dot(x_ref[...], w_ref[...], preferred_element_type=jnp.float32)
                  + b_ref[...])


# ---------------------------------------------------------------------------
# pallas_call wrappers
# ---------------------------------------------------------------------------

def rpe_ln_lif(inp, gamma, beta, *, T, eps, tau, v_th):
    # inp: (N, H) f32 -> spikes (T, N, H) bf16; grid (row_tiles, T).
    N, H = inp.shape
    TM = _row_tile(N)
    return pl.pallas_call(
        functools.partial(_rpe_ln_lif_kernel, eps=eps, tau=tau, v_th=v_th),
        out_shape=jax.ShapeDtypeStruct((T, N, H), jnp.bfloat16),
        grid=(pl.cdiv(N, TM), T),
        in_specs=[
            pl.BlockSpec((TM, H), lambda i, t: (i, 0)),
            pl.BlockSpec((1, H), lambda i, t: (0, 0)),
            pl.BlockSpec((1, H), lambda i, t: (0, 0)),
        ],
        out_specs=pl.BlockSpec((None, TM, H), lambda i, t: (t, i, 0)),
        scratch_shapes=[pltpu.VMEM((TM, H), jnp.float32),   # cached LayerNorm output
                        pltpu.VMEM((TM, H), jnp.float32)],  # LIF membrane
        compiler_params=pltpu.CompilerParams(
            dimension_semantics=("parallel", "arbitrary")),
    )(inp, _vec2d(gamma), _vec2d(beta))


def ssa_block(x, p, *, n_heads, scale):
    # x: (T, B, L, H) bf16 residual stream; returns x + SSA(x) as bf16 (exact: the
    # residual stream stays small-integer valued).
    T, B, L, H = x.shape
    BT = _batch_tile(B, L)
    R = BT * L

    w_qkv = jnp.concatenate([p['wq'], p['wk'], p['wv']], axis=1).astype(jnp.bfloat16)
    g3 = jnp.concatenate([p['q_g'], p['k_g'], p['v_g']]).reshape(1, -1)
    b3 = jnp.concatenate([p['q_b'], p['k_b'], p['v_b']]).reshape(1, -1)
    hh = H // n_heads
    head_ids = jnp.arange(H) // hh
    mask = (head_ids[:, None] == head_ids[None, :]).astype(jnp.float32) * scale

    x_spec = pl.BlockSpec((None, BT, L, H), lambda b, t: (t, b, 0, 0))
    vec_h = pl.BlockSpec((1, H), lambda b, t: (0, 0))
    vec_3h = pl.BlockSpec((1, 3 * H), lambda b, t: (0, 0))

    return pl.pallas_call(
        functools.partial(_ssa_block_kernel, eps=1e-5, tau=2.0, v_th=1.0,
                          attn_v_th=0.5, H=H),
        out_shape=jax.ShapeDtypeStruct((T, B, L, H), jnp.bfloat16),
        grid=(pl.cdiv(B, BT), T),
        in_specs=[
            x_spec,
            pl.BlockSpec((H, 3 * H), lambda b, t: (0, 0)),
            vec_3h, vec_3h,
            pl.BlockSpec((H, H), lambda b, t: (0, 0)),      # scaled head mask
            pl.BlockSpec((H, H), lambda b, t: (0, 0)),      # proj weight
            vec_h, vec_h, vec_h,
        ],
        out_specs=x_spec,
        scratch_shapes=[pltpu.VMEM((R, H), jnp.float32) for _ in range(5)],
        compiler_params=pltpu.CompilerParams(
            dimension_semantics=("parallel", "arbitrary")),
    )(x, w_qkv, g3, b3, mask,
      p['wp'].astype(jnp.bfloat16), _vec2d(p['bp']), _vec2d(p['p_g']), _vec2d(p['p_b']))


def mlp_block(x, p, *, mean_over_t=False):
    # x: (T, B, L, H) bf16.  Returns x + MLP(x) as (T, B, L, H) bf16, or the
    # temporal mean (N, H) f32 when mean_over_t (used for the last block).
    T, B, L, H = x.shape
    N = B * L
    xf = x.reshape(T, N, H)
    TM = _row_tile(N)
    Dh = p['w1'].shape[1]

    x_spec = pl.BlockSpec((None, TM, H), lambda i, t: (t, i, 0))
    vh = pl.BlockSpec((1, H), lambda i, t: (0, 0))
    vd = pl.BlockSpec((1, Dh), lambda i, t: (0, 0))

    if mean_over_t:
        out_shape = jax.ShapeDtypeStruct((N, H), jnp.float32)
        out_spec = pl.BlockSpec((TM, H), lambda i, t: (i, 0))   # resident over T
        mean_inv_t = 1.0 / T
    else:
        out_shape = jax.ShapeDtypeStruct((T, N, H), jnp.bfloat16)
        out_spec = x_spec
        mean_inv_t = None

    out = pl.pallas_call(
        functools.partial(_mlp_block_kernel, eps=1e-5, tau=2.0, v_th=1.0,
                          mean_inv_t=mean_inv_t),
        out_shape=out_shape,
        grid=(pl.cdiv(N, TM), T),
        in_specs=[
            x_spec,
            pl.BlockSpec((H, Dh), lambda i, t: (0, 0)), vd, vd, vd,
            pl.BlockSpec((Dh, H), lambda i, t: (0, 0)), vh, vh, vh,
        ],
        out_specs=out_spec,
        scratch_shapes=[pltpu.VMEM((TM, Dh), jnp.float32),
                        pltpu.VMEM((TM, H), jnp.float32)],
        compiler_params=pltpu.CompilerParams(
            dimension_semantics=("parallel", "arbitrary")),
    )(xf,
      p['w1'].astype(jnp.bfloat16), _vec2d(p['b1']), _vec2d(p['ln1_g']), _vec2d(p['ln1_b']),
      p['w2'].astype(jnp.bfloat16), _vec2d(p['b2']), _vec2d(p['ln2_g']), _vec2d(p['ln2_b']))

    if mean_over_t:
        return out
    return out.reshape(T, B, L, H)


def linear(x, w, b):
    N, Din = x.shape
    Dout = w.shape[1]
    TM = _row_tile(N, pack=8)
    return pl.pallas_call(
        _linear_kernel,
        out_shape=jax.ShapeDtypeStruct((N, Dout), jnp.float32),
        grid=(pl.cdiv(N, TM),),
        in_specs=[
            pl.BlockSpec((TM, Din), lambda i: (i, 0)),
            pl.BlockSpec((Din, Dout), lambda i: (0, 0)),
            pl.BlockSpec((1, Dout), lambda i: (0, 0)),
        ],
        out_specs=pl.BlockSpec((TM, Dout), lambda i: (i, 0)),
        compiler_params=pltpu.CompilerParams(dimension_semantics=("parallel",)),
    )(x, w, _vec2d(b))


# ---------------------------------------------------------------------------
# SFSRec forward (glue in JAX, compute in the fused Pallas kernels above)
# ---------------------------------------------------------------------------

def sfsrec_forward(params, item_seq, item_seq_len, *, T, n_heads):
    B, L = item_seq.shape
    H = params['item_emb'].shape[1]
    N = B * L

    # embeddings (XLA gather) + fused top LayerNorm(eps=1e-12) + rpe_lif over T
    item_e = jnp.take(params['item_emb'], item_seq, axis=0)           # (B, L, H)
    pos_e = params['pos_emb'][:L][None, :, :]                         # (1, L, H)
    inp = (item_e + pos_e).reshape(N, H)
    x = rpe_ln_lif(inp, params['ln_g'], params['ln_b'],
                   T=T, eps=1e-12, tau=2.0, v_th=1.0)                 # (T, N, H) bf16
    x = x.reshape(T, B, L, H)

    n_blocks = len(params['blocks'])
    xm = None
    for bi, blk in enumerate(params['blocks']):
        x = ssa_block(x, blk, n_heads=n_heads, scale=0.125)
        last = bi == n_blocks - 1
        out = mlp_block(x, blk, mean_over_t=last)
        if last:
            xm = out                                                   # (N, H) f32
        else:
            x = out
    if xm is None:                                                     # n_layers == 0
        xm = jnp.mean(x.astype(jnp.float32), axis=0).reshape(N, H)

    # head projection (kept f32 for parity), gather last valid position
    y = linear(xm, params['head_w'], params['head_b']).reshape(B, L, H)
    idx = item_seq_len - 1
    return y[jnp.arange(B), idx]                                       # (B, H)


# ---------------------------------------------------------------------------
# Deterministic parameter construction (synthetic; shapes follow SFSRec.__init__)
# ---------------------------------------------------------------------------

def build_params(key, n_items, H, max_len, n_layers, mlp_hidden):
    keys = iter(jax.random.split(key, 16 + 16 * n_layers))

    def nrm(shape, scale=0.02):
        return scale * jax.random.normal(next(keys), shape, dtype=jnp.float32)

    params = {}
    item_emb = nrm((n_items, H), 1.0)
    params['item_emb'] = item_emb.at[0].set(0.0)     # padding_idx=0
    params['pos_emb'] = nrm((max_len, H), 1.0)
    params['ln_g'] = jnp.ones((H,), jnp.float32)
    params['ln_b'] = jnp.zeros((H,), jnp.float32)
    params['head_w'] = nrm((H, H))
    params['head_b'] = jnp.zeros((H,), jnp.float32)

    blocks = []
    for _ in range(n_layers):
        blk = {
            # SSA (qkv_bias=False)
            'wq': nrm((H, H)), 'q_g': jnp.ones((H,), jnp.float32), 'q_b': jnp.zeros((H,), jnp.float32),
            'wk': nrm((H, H)), 'k_g': jnp.ones((H,), jnp.float32), 'k_b': jnp.zeros((H,), jnp.float32),
            'wv': nrm((H, H)), 'v_g': jnp.ones((H,), jnp.float32), 'v_b': jnp.zeros((H,), jnp.float32),
            'wp': nrm((H, H)), 'bp': jnp.zeros((H,), jnp.float32),
            'p_g': jnp.ones((H,), jnp.float32), 'p_b': jnp.zeros((H,), jnp.float32),
            # MLP (hidden_features fixed to 256 in the reference)
            'w1': nrm((H, mlp_hidden)), 'b1': jnp.zeros((mlp_hidden,), jnp.float32),
            'ln1_g': jnp.ones((mlp_hidden,), jnp.float32), 'ln1_b': jnp.zeros((mlp_hidden,), jnp.float32),
            'w2': nrm((mlp_hidden, H)), 'b2': jnp.zeros((H,), jnp.float32),
            'ln2_g': jnp.ones((H,), jnp.float32), 'ln2_b': jnp.zeros((H,), jnp.float32),
        }
        blocks.append(blk)
    params['blocks'] = blocks
    return params


if __name__ == "__main__":
    # small config consistent with the module
    T, B, L, H = 4, 2, 8, 32
    n_heads, n_layers, mlp_hidden = 2, 2, 256
    n_items = 51  # item_num + 1

    key = jax.random.PRNGKey(0)
    kp, ks, kl = jax.random.split(key, 3)
    params = build_params(kp, n_items, H, L, n_layers, mlp_hidden)

    item_seq = jax.random.randint(ks, (B, L), 1, n_items, dtype=jnp.int32)
    item_seq_len = jax.random.randint(kl, (B,), 1, L + 1, dtype=jnp.int32)

    # TODO(synk): dropout / surrogate-gradient (ATan) only affect training; the
    # inference forward pass implemented here does not use them.
    fwd = jax.jit(functools.partial(sfsrec_forward, T=T, n_heads=n_heads))
    out = fwd(params, item_seq, item_seq_len)
    out = jax.block_until_ready(out)
    assert out.shape == (B, H) and out.dtype == jnp.float32
    print("KERNEL_OK")
</pallas_src>

<mosaic_0001>
module attributes {stable_mosaic.version = 11 : i64} {
  func.func @_rpe_ln_lif_kernel(%arg0: i32, %arg1: i32, %arg2: memref<16x32xf32, #tpu.memory_space<vmem>>, %arg3: memref<1x32xf32, #tpu.memory_space<vmem>>, %arg4: memref<1x32xf32, #tpu.memory_space<vmem>>, %arg5: memref<1x16x32xbf16, #tpu.memory_space<vmem>>, %arg6: memref<16x32xf32, #tpu.memory_space<vmem>>, %arg7: memref<16x32xf32, #tpu.memory_space<vmem>>) attributes {dimension_semantics = [#tpu.dimension_semantics<parallel>, #tpu.dimension_semantics<arbitrary>], iteration_bounds = array<i64: 1, 4>, scalar_prefetch = 0 : i64, scratch_operands = 2 : i64, tpu.core_type = #tpu.core_type<tc>, window_params = [{transform_indices = @transform_0, window_bounds = array<i64: 16, 32>}, {pipeline_mode = #tpu.pipeline_mode<synchronous>, transform_indices = @transform_1, window_bounds = array<i64: 1, 32>}, {pipeline_mode = #tpu.pipeline_mode<synchronous>, transform_indices = @transform_2, window_bounds = array<i64: 1, 32>}, {transform_indices = @transform_3, window_bounds = array<i64: 1, 16, 32>}]} {
    %c0_i32 = arith.constant 0 : i32
    %0 = arith.cmpi eq, %arg1, %c0_i32 : i32
    %1 = arith.extui %0 : i1 to i32
    %c0_i32_0 = arith.constant 0 : i32
    %2 = arith.cmpi ne, %1, %c0_i32_0 : i32
    scf.if %2 {
      %c0_15 = arith.constant 0 : index
      %c0_16 = arith.constant 0 : index
      %24 = vector.load %arg2[%c0_15, %c0_16] : memref<16x32xf32, #tpu.memory_space<vmem>>, vector<16x32xf32>
      %c0_17 = arith.constant 0 : index
      %c0_18 = arith.constant 0 : index
      %25 = vector.load %arg3[%c0_17, %c0_18] : memref<1x32xf32, #tpu.memory_space<vmem>>, vector<1x32xf32>
      %c0_19 = arith.constant 0 : index
      %c0_20 = arith.constant 0 : index
      %26 = vector.load %arg4[%c0_19, %c0_20] : memref<1x32xf32, #tpu.memory_space<vmem>>, vector<1x32xf32>
      %cst_21 = arith.constant dense<0.000000e+00> : vector<16xf32>
      %27 = vector.multi_reduction <add>, %24, %cst_21 [1] : vector<16x32xf32> to vector<16xf32>
      %28 = vector.shape_cast %27 : vector<16xf32> to vector<16x1xf32>
      %cst_22 = arith.constant 3.200000e+01 : f32
      %29 = vector.broadcast %cst_22 : f32 to vector<16x1xf32>
      %30 = arith.divf %28, %29 : vector<16x1xf32>
      %31 = arith.mulf %24, %24 : vector<16x32xf32>
      %cst_23 = arith.constant dense<0.000000e+00> : vector<16xf32>
      %32 = vector.multi_reduction <add>, %31, %cst_23 [1] : vector<16x32xf32> to vector<16xf32>
      %33 = vector.shape_cast %32 : vector<16xf32> to vector<16x1xf32>
      %cst_24 = arith.constant 3.200000e+01 : f32
      %34 = vector.broadcast %cst_24 : f32 to vector<16x1xf32>
      %35 = arith.divf %33, %34 : vector<16x1xf32>
      %36 = arith.mulf %30, %30 : vector<16x1xf32>
      %37 = arith.subf %35, %36 : vector<16x1xf32>
      %cst_25 = arith.constant 0.000000e+00 : f32
      %38 = vector.broadcast %cst_25 : f32 to vector<16x1xf32>
      %39 = arith.maximumf %37, %38 : vector<16x1xf32>
      %40 = vector.broadcast %30 : vector<16x1xf32> to vector<16x32xf32>
      %41 = arith.subf %24, %40 : vector<16x32xf32>
      %cst_26 = arith.constant 9.99999996E-13 : f32
      %42 = vector.broadcast %cst_26 : f32 to vector<16x1xf32>
      %43 = arith.addf %39, %42 : vector<16x1xf32>
      %44 = math.rsqrt %43 : vector<16x1xf32>
      %45 = vector.broadcast %44 : vector<16x1xf32> to vector<16x32xf32>
      %46 = arith.mulf %41, %45 : vector<16x32xf32>
      %47 = vector.broadcast %25 : vector<1x32xf32> to vector<16x32xf32>
      %48 = arith.mulf %46, %47 : vector<16x32xf32>
      %49 = vector.broadcast %26 : vector<1x32xf32> to vector<16x32xf32>
      %50 = arith.addf %48, %49 : vector<16x32xf32>
      %c0_27 = arith.constant 0 : index
      %c0_28 = arith.constant 0 : index
      %51 = vector.load %arg6[%c0_27, %c0_28] : memref<16x32xf32, #tpu.memory_space<vmem>>, vector<16x32xf32>
      tpu.vector_store %arg6[%c0_27, %c0_28], %50 {strides = array<i32>} : memref<16x32xf32, #tpu.memory_space<vmem>>, vector<16x32xf32>,
    } else {
    }
    %c0 = arith.constant 0 : index
    %c0_1 = arith.constant 0 : index
    %3 = vector.load %arg6[%c0, %c0_1] : memref<16x32xf32, #tpu.memory_space<vmem>>, vector<16x32xf32>
    %c0_i32_2 = arith.constant 0 : i32
    %4 = arith.cmpi eq, %arg1, %c0_i32_2 : i32
    %5 = arith.extui %4 : i1 to i32
    %c0_i32_3 = arith.constant 0 : i32
    %6 = arith.cmpi ne, %5, %c0_i32_3 : i32
    scf.if %6 {
      %cst_15 = arith.constant 0.000000e+00 : f32
      %24 = vector.broadcast %cst_15 : f32 to vector<16x32xf32>
      %c0_16 = arith.constant 0 : index
      %c0_17 = arith.constant 0 : index
      %25 = vector.load %arg7[%c0_16, %c0_17] : memref<16x32xf32, #tpu.memory_space<vmem>>, vector<16x32xf32>
      tpu.vector_store %arg7[%c0_16, %c0_17], %24 {strides = array<i32>} : memref<16x32xf32, #tpu.memory_space<vmem>>, vector<16x32xf32>,
    } else {
    }
    %c0_4 = arith.constant 0 : index
    %c0_5 = arith.constant 0 : index
    %7 = vector.load %arg7[%c0_4, %c0_5] : memref<16x32xf32, #tpu.memory_space<vmem>>, vector<16x32xf32>
    %c0_6 = arith.constant 0 : index
    %c0_7 = arith.constant 0 : index
    %8 = vector.load %arg7[%c0_6, %c0_7] : memref<16x32xf32, #tpu.memory_space<vmem>>, vector<16x32xf32>
    %9 = arith.subf %3, %8 : vector<16x32xf32>
    %cst = arith.constant 5.000000e-01 : f32
    %10 = vector.broadcast %cst : f32 to vector<16x32xf32>
    %11 = arith.mulf %9, %10 : vector<16x32xf32>
    %12 = arith.addf %7, %11 : vector<16x32xf32>
    %cst_8 = arith.constant 1.000000e+00 : f32
    %13 = vector.broadcast %cst_8 : f32 to vector<16x32xf32>
    %14 = arith.cmpf oge, %12, %13 : vector<16x32xf32>
    %cst_9 = arith.constant 0.000000e+00 : f32
    %15 = vector.broadcast %cst_9 : f32 to vector<16x32xf32>
    %16 = arith.select %14, %15, %12 : vector<16x32xi1>, vector<16x32xf32>
    %c0_10 = arith.constant 0 : index
    %c0_11 = arith.constant 0 : index
    %17 = vector.load %arg7[%c0_10, %c0_11] : memref<16x32xf32, #tpu.memory_space<vmem>>, vector<16x32xf32>
    tpu.vector_store %arg7[%c0_10, %c0_11], %16 {strides = array<i32>} : memref<16x32xf32, #tpu.memory_space<vmem>>, vector<16x32xf32>,
    %18 = arith.extui %14 : vector<16x32xi1> to vector<16x32xi32>
    %19 = arith.sitofp %18 : vector<16x32xi32> to vector<16x32xf32>
    %20 = arith.truncf %19 : vector<16x32xf32> to vector<16x32xbf16>
    %c0_12 = arith.constant 0 : index
    %c0_13 = arith.constant 0 : index
    %c0_14 = arith.constant 0 : index
    %21 = vector.load %arg5[%c0_12, %c0_13, %c0_14] : memref<1x16x32xbf16, #tpu.memory_space<vmem>>, vector<1x16x32xbf16>
    %22 = vector.shape_cast %21 : vector<1x16x32xbf16> to vector<16x32xbf16>
    %23 = vector.shape_cast %20 : vector<16x32xbf16> to vector<1x16x32xbf16>
    tpu.vector_store %arg5[%c0_12, %c0_13, %c0_14], %23 {strides = array<i32>} : memref<1x16x32xbf16, #tpu.memory_space<vmem>>, vector<1x16x32xbf16>,
    return
  }
  func.func @transform_0(%arg0: i32, %arg1: i32) -> (i32, i32) {
    %c0_i32 = arith.constant 0 : i32
    %c0_i32_0 = arith.constant 0 : i32
    return %arg0, %c0_i32 : i32, i32
  }
  func.func @transform_1(%arg0: i32, %arg1: i32) -> (i32, i32) {
    %c0_i32 = arith.constant 0 : i32
    %c0_i32_0 = arith.constant 0 : i32
    %c0_i32_1 = arith.constant 0 : i32
    return %c0_i32, %c0_i32_0 : i32, i32
  }
  func.func @transform_2(%arg0: i32, %arg1: i32) -> (i32, i32) {
    %c0_i32 = arith.constant 0 : i32
    %c0_i32_0 = arith.constant 0 : i32
    %c0_i32_1 = arith.constant 0 : i32
    return %c0_i32, %c0_i32_0 : i32, i32
  }
  func.func @transform_3(%arg0: i32, %arg1: i32) -> (i32, i32, i32) {
    %c0_i32 = arith.constant 0 : i32
    %c0_i32_0 = arith.constant 0 : i32
    return %arg1, %arg0, %c0_i32 : i32, i32, i32
  }
}

module attributes {stable_mosaic.version = 11 : i64} {
  func.func @_ssa_block_kernel(%arg0: i32, %arg1: i32, %arg2: memref<1x1x8x32xbf16, #tpu.memory_space<vmem>>, %arg3: memref<32x96xbf16, #tpu.memory_space<vmem>>, %arg4: memref<1x96xf32, #tpu.memory_space<vmem>>, %arg5: memref<1x96xf32, #tpu.memory_space<vmem>>, %arg6: memref<32x32xf32, #tpu.memory_space<vmem>>, %arg7: memref<32x32xbf16, #tpu.memory_space<vmem>>, %arg8: memref<1x32xf32, #tpu.memory_space<vmem>>, %arg9: memref<1x32xf32, #tpu.memory_space<vmem>>, %arg10: memref<1x32xf32, #tpu.memory_space<vmem>>, %arg11: memref<1x1x8x32xbf16, #tpu.memory_space<vmem>>, %arg12: memref<8x32xf32, #tpu.memory_space<vmem>>, %arg13: memref<8x32xf32, #tpu.memory_space<vmem>>, %arg14: memref<8x32xf32, #tpu.memory_space<vmem>>, %arg15: memref<8x32xf32, #tpu.memory_space<vmem>>, %arg16: memref<8x32xf32, #tpu.memory_space<vmem>>) attributes {dimension_semantics = [#tpu.dimension_semantics<parallel>, #tpu.dimension_semantics<arbitrary>], iteration_bounds = array<i64: 2, 4>, scalar_prefetch = 0 : i64, scratch_operands = 5 : i64, tpu.core_type = #tpu.core_type<tc>, window_params = [{transform_indices = @transform_0, window_bounds = array<i64: 1, 1, 8, 32>}, {pipeline_mode = #tpu.pipeline_mode<synchronous>, transform_indices = @transform_1, window_bounds = array<i64: 32, 96>}, {pipeline_mode = #tpu.pipeline_mode<synchronous>, transform_indices = @transform_2, window_bounds = array<i64: 1, 96>}, {pipeline_mode = #tpu.pipeline_mode<synchronous>, transform_indices = @transform_3, window_bounds = array<i64: 1, 96>}, {pipeline_mode = #tpu.pipeline_mode<synchronous>, transform_indices = @transform_4, window_bounds = array<i64: 32, 32>}, {pipeline_mode = #tpu.pipeline_mode<synchronous>, transform_indices = @transform_5, window_bounds = array<i64: 32, 32>}, {pipeline_mode = #tpu.pipeline_mode<synchronous>, transform_indices = @transform_6, window_bounds = array<i64: 1, 32>}, {pipeline_mode = #tpu.pipeline_mode<synchronous>, transform_indices = @transform_7, window_bounds = array<i64: 1, 32>}, {pipeline_mode = #tpu.pipeline_mode<synchronous>, transform_indices = @transform_8, window_bounds = array<i64: 1, 32>}, {transform_indices = @transform_9, window_bounds = array<i64: 1, 1, 8, 32>}]} {
    %c0 = arith.constant 0 : index
    %c0_0 = arith.constant 0 : index
    %c0_1 = arith.constant 0 : index
    %c0_2 = arith.constant 0 : index
    %0 = vector.load %arg2[%c0, %c0_0, %c0_1, %c0_2] : memref<1x1x8x32xbf16, #tpu.memory_space<vmem>>, vector<1x1x8x32xbf16>
    %1 = vector.shape_cast %0 : vector<1x1x8x32xbf16> to vector<1x8x32xbf16>
    %2 = vector.shape_cast %1 : vector<1x8x32xbf16> to vector<8x32xbf16>
    %c0_3 = arith.constant 0 : index
    %c0_4 = arith.constant 0 : index
    %3 = vector.load %arg3[%c0_3, %c0_4] : memref<32x96xbf16, #tpu.memory_space<vmem>>, vector<32x96xbf16>
    %cst = arith.constant dense<0.000000e+00> : vector<8x96xf32>
    %4 = tpu.matmul %2, %3, %cst {dimension_numbers = #tpu.dot_dimension_numbers<[1], [0], [0], [1], [0, 0, 1, 1], [], []>} : vector<8x32xbf16>, vector<32x96xbf16>, vector<8x96xf32> -> vector<8x96xf32>
    %c0_5 = arith.constant 0 : index
    %c0_6 = arith.constant 0 : index
    %5 = vector.load %arg4[%c0_5, %c0_6] : memref<1x96xf32, #tpu.memory_space<vmem>>, vector<1x96xf32>
    %c0_7 = arith.constant 0 : index
    %c0_8 = arith.constant 0 : index
    %6 = vector.load %arg5[%c0_7, %c0_8] : memref<1x96xf32, #tpu.memory_space<vmem>>, vector<1x96xf32>
    %7 = vector.extract_strided_slice %4 {offsets = [0, 0], sizes = [8, 32], strides = [1, 1]} : vector<8x96xf32> to vector<8x32xf32>
    %8 = vector.extract_strided_slice %5 {offsets = [0, 0], sizes = [1, 32], strides = [1, 1]} : vector<1x96xf32> to vector<1x32xf32>
    %9 = vector.extract_strided_slice %6 {offsets = [0, 0], sizes = [1, 32], strides = [1, 1]} : vector<1x96xf32> to vector<1x32xf32>
    %cst_9 = arith.constant dense<0.000000e+00> : vector<8xf32>
    %10 = vector.multi_reduction <add>, %7, %cst_9 [1] : vector<8x32xf32> to vector<8xf32>
    %11 = vector.shape_cast %10 : vector<8xf32> to vector<8x1xf32>
    %cst_10 = arith.constant 3.200000e+01 : f32
    %12 = vector.broadcast %cst_10 : f32 to vector<8x1xf32>
    %13 = arith.divf %11, %12 : vector<8x1xf32>
    %14 = arith.mulf %7, %7 : vector<8x32xf32>
    %cst_11 = arith.constant dense<0.000000e+00> : vector<8xf32>
    %15 = vector.multi_reduction <add>, %14, %cst_11 [1] : vector<8x32xf32> to vector<8xf32>
    %16 = vector.shape_cast %15 : vector<8xf32> to vector<8x1xf32>
    %cst_12 = arith.constant 3.200000e+01 : f32
    %17 = vector.broadcast %cst_12 : f32 to vector<8x1xf32>
    %18 = arith.divf %16, %17 : vector<8x1xf32>
    %19 = arith.mulf %13, %13 : vector<8x1xf32>
    %20 = arith.subf %18, %19 : vector<8x1xf32>
    %cst_13 = arith.constant 0.000000e+00 : f32
    %21 = vector.broadcast %cst_13 : f32 to vector<8x1xf32>
    %22 = arith.maximumf %20, %21 : vector<8x1xf32>
    %23 = vector.broadcast %13 : vector<8x1xf32> to vector<8x32xf32>
    %24 = arith.subf %7, %23 : vector<8x32xf32>
    %cst_14 = arith.constant 9.99999974E-6 : f32
    %25 = vector.broadcast %cst_14 : f32 to vector<8x1xf32>
    %26 = arith.addf %22, %25 : vector<8x1xf32>
    %27 = math.rsqrt %26 : vector<8x1xf32>
    %28 = vector.broadcast %27 : vector<8x1xf32> to vector<8x32xf32>
    %29 = arith.mulf %24, %28 : vector<8x32xf32>
    %30 = vector.broadcast %8 : vector<1x32xf32> to vector<8x32xf32>
    %31 = arith.mulf %29, %30 : vector<8x32xf32>
    %32 = vector.broadcast %9 : vector<1x32xf32> to vector<8x32xf32>
    %33 = arith.addf %31, %32 : vector<8x32xf32>
    %c0_i32 = arith.constant 0 : i32
    %34 = arith.cmpi eq, %arg1, %c0_i32 : i32
    %35 = arith.extui %34 : i1 to i32
    %c0_i32_15 = arith.constant 0 : i32
    %36 = arith.cmpi ne, %35, %c0_i32_15 : i32
    scf.if %36 {
      %cst_104 = arith.constant 0.000000e+00 : f32
      %221 = vector.broadcast %cst_104 : f32 to vector<8x32xf32>
      %c0_105 = arith.constant 0 : index
      %c0_106 = arith.constant 0 : index
      %222 = vector.load %arg12[%c0_105, %c0_106] : memref<8x32xf32, #tpu.memory_space<vmem>>, vector<8x32xf32>
      tpu.vector_store %arg12[%c0_105, %c0_106], %221 {strides = array<i32>} : memref<8x32xf32, #tpu.memory_space<vmem>>, vector<8x32xf32>,
    } else {
    }
    %c0_16 = arith.constant 0 : index
    %c0_17 = arith.constant 0 : index
    %37 = vector.load %arg12[%c0_16, %c0_17] : memref<8x32xf32, #tpu.memory_space<vmem>>, vector<8x32xf32>
    %c0_18 = arith.constant 0 : index
    %c0_19 = arith.constant 0 : index
    %38 = vector.load %arg12[%c0_18, %c0_19] : memref<8x32xf32, #tpu.memory_space<vmem>>, vector<8x32xf32>
    %39 = arith.subf %33, %38 : vector<8x32xf32>
    %cst_20 = arith.constant 5.000000e-01 : f32
    %40 = vector.broadcast %cst_20 : f32 to vector<8x32xf32>
    %41 = arith.mulf %39, %40 : vector<8x32xf32>
    %42 = arith.addf %37, %41 : vector<8x32xf32>
    %cst_21 = arith.constant 1.000000e+00 : f32
    %43 = vector.broadcast %cst_21 : f32 to vector<8x32xf32>
    %44 = arith.cmpf oge, %42, %43 : vector<8x32xf32>
    %cst_22 = arith.constant 0.000000e+00 : f32
    %45 = vector.broadcast %cst_22 : f32 to vector<8x32xf32>
    %46 = arith.select %44, %45, %42 : vector<8x32xi1>, vector<8x32xf32>
    %c0_23 = arith.constant 0 : index
    %c0_24 = arith.constant 0 : index
    %47 = vector.load %arg12[%c0_23, %c0_24] : memref<8x32xf32, #tpu.memory_space<vmem>>, vector<8x32xf32>
    tpu.vector_store %arg12[%c0_23, %c0_24], %46 {strides = array<i32>} : memref<8x32xf32, #tpu.memory_space<vmem>>, vector<8x32xf32>,
    %48 = arith.extui %44 : vector<8x32xi1> to vector<8x32xi32>
    %49 = arith.sitofp %48 : vector<8x32xi32> to vector<8x32xf32>
    %50 = arith.truncf %49 : vector<8x32xf32> to vector<8x32xbf16>
    %51 = vector.shape_cast %50 : vector<8x32xbf16> to vector<1x8x32xbf16>
    %52 = vector.extract_strided_slice %4 {offsets = [0, 32], sizes = [8, 32], strides = [1, 1]} : vector<8x96xf32> to vector<8x32xf32>
    %53 = vector.extract_strided_slice %5 {offsets = [0, 32], sizes = [1, 32], strides = [1, 1]} : vector<1x96xf32> to vector<1x32xf32>
    %54 = vector.extract_strided_slice %6 {offsets = [0, 32], sizes = [1, 32], strides = [1, 1]} : vector<1x96xf32> to vector<1x32xf32>
    %cst_25 = arith.constant dense<0.000000e+00> : vector<8xf32>
    %55 = vector.multi_reduction <add>, %52, %cst_25 [1] : vector<8x32xf32> to vector<8xf32>
    %56 = vector.shape_cast %55 : vector<8xf32> to vector<8x1xf32>
    %cst_26 = arith.constant 3.200000e+01 : f32
    %57 = vector.broadcast %cst_26 : f32 to vector<8x1xf32>
    %58 = arith.divf %56, %57 : vector<8x1xf32>
    %59 = arith.mulf %52, %52 : vector<8x32xf32>
    %cst_27 = arith.constant dense<0.000000e+00> : vector<8xf32>
    %60 = vector.multi_reduction <add>, %59, %cst_27 [1] : vector<8x32xf32> to vector<8xf32>
    %61 = vector.shape_cast %60 : vector<8xf32> to vector<8x1xf32>
    %cst_28 = arith.constant 3.200000e+01 : f32
    %62 = vector.broadcast %cst_28 : f32 to vector<8x1xf32>
    %63 = arith.divf %61, %62 : vector<8x1xf32>
    %64 = arith.mulf %58, %58 : vector<8x1xf32>
    %65 = arith.subf %63, %64 : vector<8x1xf32>
    %cst_29 = arith.constant 0.000000e+00 : f32
    %66 = vector.broadcast %cst_29 : f32 to vector<8x1xf32>
    %67 = arith.maximumf %65, %66 : vector<8x1xf32>
    %68 = vector.broadcast %58 : vector<8x1xf32> to vector<8x32xf32>
    %69 = arith.subf %52, %68 : vector<8x32xf32>
    %cst_30 = arith.constant 9.99999974E-6 : f32
    %70 = vector.broadcast %cst_30 : f32 to vector<8x1xf32>
    %71 = arith.addf %67, %70 : vector<8x1xf32>
    %72 = math.rsqrt %71 : vector<8x1xf32>
    %73 = vector.broadcast %72 : vector<8x1xf32> to vector<8x32xf32>
    %74 = arith.mulf %69, %73 : vector<8x32xf32>
    %75 = vector.broadcast %53 : vector<1x32xf32> to vector<8x32xf32>
    %76 = arith.mulf %74, %75 : vector<8x32xf32>
    %77 = vector.broadcast %54 : vector<1x32xf32> to vector<8x32xf32>
    %78 = arith.addf %76, %77 : vector<8x32xf32>
    %c0_i32_31 = arith.constant 0 : i32
    %79 = arith.cmpi eq, %arg1, %c0_i32_31 : i32
    %80 = arith.extui %79 : i1 to i32
    %c0_i32_32 = arith.constant 0 : i32
    %81 = arith.cmpi ne, %80, %c0_i32_32 : i32
    scf.if %81 {
      %cst_104 = arith.constant 0.000000e+00 : f32
      %221 = vector.broadcast %cst_104 : f32 to vector<8x32xf32>
      %c0_105 = arith.constant 0 : index
      %c0_106 = arith.constant 0 : index
      %222 = vector.load %arg13[%c0_105, %c0_106] : memref<8x32xf32, #tpu.memory_space<vmem>>, vector<8x32xf32>
      tpu.vector_store %arg13[%c0_105, %c0_106], %221 {strides = array<i32>} : memref<8x32xf32, #tpu.memory_space<vmem>>, vector<8x32xf32>,
    } else {
    }
    %c0_33 = arith.constant 0 : index
    %c0_34 = arith.constant 0 : index
    %82 = vector.load %arg13[%c0_33, %c0_34] : memref<8x32xf32, #tpu.memory_space<vmem>>, vector<8x32xf32>
    %c0_35 = arith.constant 0 : index
    %c0_36 = arith.constant 0 : index
    %83 = vector.load %arg13[%c0_35, %c0_36] : memref<8x32xf32, #tpu.memory_space<vmem>>, vector<8x32xf32>
    %84 = arith.subf %78, %83 : vector<8x32xf32>
    %cst_37 = arith.constant 5.000000e-01 : f32
    %85 = vector.broadcast %cst_37 : f32 to vector<8x32xf32>
    %86 = arith.mulf %84, %85 : vector<8x32xf32>
    %87 = arith.addf %82, %86 : vector<8x32xf32>
    %cst_38 = arith.constant 1.000000e+00 : f32
    %88 = vector.broadcast %cst_38 : f32 to vector<8x32xf32>
    %89 = arith.cmpf oge, %87, %88 : vector<8x32xf32>
    %cst_39 = arith.constant 0.000000e+00 : f32
    %90 = vector.broadcast %cst_39 : f32 to vector<8x32xf32>
    %91 = arith.select %89, %90, %87 : vector<8x32xi1>, vector<8x32xf32>
    %c0_40 = arith.constant 0 : index
    %c0_41 = arith.constant 0 : index
    %92 = vector.load %arg13[%c0_40, %c0_41] : memref<8x32xf32, #tpu.memory_space<vmem>>, vector<8x32xf32>
    tpu.vector_store %arg13[%c0_40, %c0_41], %91 {strides = array<i32>} : memref<8x32xf32, #tpu.memory_space<vmem>>, vector<8x32xf32>,
    %93 = arith.extui %89 : vector<8x32xi1> to vector<8x32xi32>
    %94 = arith.sitofp %93 : vector<8x32xi32> to vector<8x32xf32>
    %95 = vector.shape_cast %94 : vector<8x32xf32> to vector<1x8x32xf32>
    %96 = tpu.transpose %95, [0, 2, 1] : vector<1x8x32xf32> -> vector<1x32x8xf32>
    %97 = arith.truncf %96 : vector<1x32x8xf32> to vector<1x32x8xbf16>
    %98 = vector.extract_strided_slice %4 {offsets = [0, 64], sizes = [8, 32], strides = [1, 1]} : vector<8x96xf32> to vector<8x32xf32>
    %99 = vector.extract_strided_slice %5 {offsets = [0, 64], sizes = [1, 32], strides = [1, 1]} : vector<1x96xf32> to vector<1x32xf32>
    %100 = vector.extract_strided_slice %6 {offsets = [0, 64], sizes = [1, 32], strides = [1, 1]} : vector<1x96xf32> to vector<1x32xf32>
    %cst_42 = arith.constant dense<0.000000e+00> : vector<8xf32>
    %101 = vector.multi_reduction <add>, %98, %cst_42 [1] : vector<8x32xf32> to vector<8xf32>
    %102 = vector.shape_cast %101 : vector<8xf32> to vector<8x1xf32>
    %cst_43 = arith.constant 3.200000e+01 : f32
    %103 = vector.broadcast %cst_43 : f32 to vector<8x1xf32>
    %104 = arith.divf %102, %103 : vector<8x1xf32>
    %105 = arith.mulf %98, %98 : vector<8x32xf32>
    %cst_44 = arith.constant dense<0.000000e+00> : vector<8xf32>
    %106 = vector.multi_reduction <add>, %105, %cst_44 [1] : vector<8x32xf32> to vector<8xf32>
    %107 = vector.shape_cast %106 : vector<8xf32> to vector<8x1xf32>
    %cst_45 = arith.constant 3.200000e+01 : f32
    %108 = vector.broadcast %cst_45 : f32 to vector<8x1xf32>
    %109 = arith.divf %107, %108 : vector<8x1xf32>
    %110 = arith.mulf %104, %104 : vector<8x1xf32>
    %111 = arith.subf %109, %110 : vector<8x1xf32>
    %cst_46 = arith.constant 0.000000e+00 : f32
    %112 = vector.broadcast %cst_46 : f32 to vector<8x1xf32>
    %113 = arith.maximumf %111, %112 : vector<8x1xf32>
    %114 = vector.broadcast %104 : vector<8x1xf32> to vector<8x32xf32>
    %115 = arith.subf %98, %114 : vector<8x32xf32>
    %cst_47 = arith.constant 9.99999974E-6 : f32
    %116 = vector.broadcast %cst_47 : f32 to vector<8x1xf32>
    %117 = arith.addf %113, %116 : vector<8x1xf32>
    %118 = math.rsqrt %117 : vector<8x1xf32>
    %119 = vector.broadcast %118 : vector<8x1xf32> to vector<8x32xf32>
    %120 = arith.mulf %115, %119 : vector<8x32xf32>
    %121 = vector.broadcast %99 : vector<1x32xf32> to vector<8x32xf32>
    %122 = arith.mulf %120, %121 : vector<8x32xf32>
    %123 = vector.broadcast %100 : vector<1x32xf32> to vector<8x32xf32>
    %124 = arith.addf %122, %123 : vector<8x32xf32>
    %c0_i32_48 = arith.constant 0 : i32
    %125 = arith.cmpi eq, %arg1, %c0_i32_48 : i32
    %126 = arith.extui %125 : i1 to i32
    %c0_i32_49 = arith.constant 0 : i32
    %127 = arith.cmpi ne, %126, %c0_i32_49 : i32
    scf.if %127 {
      %cst_104 = arith.constant 0.000000e+00 : f32
      %221 = vector.broadcast %cst_104 : f32 to vector<8x32xf32>
      %c0_105 = arith.constant 0 : index
      %c0_106 = arith.constant 0 : index
      %222 = vector.load %arg14[%c0_105, %c0_106] : memref<8x32xf32, #tpu.memory_space<vmem>>, vector<8x32xf32>
      tpu.vector_store %arg14[%c0_105, %c0_106], %221 {strides = array<i32>} : memref<8x32xf32, #tpu.memory_space<vmem>>, vector<8x32xf32>,
    } else {
    }
    %c0_50 = arith.constant 0 : index
    %c0_51 = arith.constant 0 : index
    %128 = vector.load %arg14[%c0_50, %c0_51] : memref<8x32xf32, #tpu.memory_space<vmem>>, vector<8x32xf32>
    %c0_52 = arith.constant 0 : index
    %c0_53 = arith.constant 0 : index
    %129 = vector.load %arg14[%c0_52, %c0_53] : memref<8x32xf32, #tpu.memory_space<vmem>>, vector<8x32xf32>
    %130 = arith.subf %124, %129 : vector<8x32xf32>
    %cst_54 = arith.constant 5.000000e-01 : f32
    %131 = vector.broadcast %cst_54 : f32 to vector<8x32xf32>
    %132 = arith.mulf %130, %131 : vector<8x32xf32>
    %133 = arith.addf %128, %132 : vector<8x32xf32>
    %cst_55 = arith.constant 1.000000e+00 : f32
    %134 = vector.broadcast %cst_55 : f32 to vector<8x32xf32>
    %135 = arith.cmpf oge, %133, %134 : vector<8x32xf32>
    %cst_56 = arith.constant 0.000000e+00 : f32
    %136 = vector.broadcast %cst_56 : f32 to vector<8x32xf32>
    %137 = arith.select %135, %136, %133 : vector<8x32xi1>, vector<8x32xf32>
    %c0_57 = arith.constant 0 : index
    %c0_58 = arith.constant 0 : index
    %138 = vector.load %arg14[%c0_57, %c0_58] : memref<8x32xf32, #tpu.memory_space<vmem>>, vector<8x32xf32>
    tpu.vector_store %arg14[%c0_57, %c0_58], %137 {strides = array<i32>} : memref<8x32xf32, #tpu.memory_space<vmem>>, vector<8x32xf32>,
    %139 = arith.extui %135 : vector<8x32xi1> to vector<8x32xi32>
    %140 = arith.sitofp %139 : vector<8x32xi32> to vector<8x32xf32>
    %141 = arith.truncf %140 : vector<8x32xf32> to vector<8x32xbf16>
    %142 = vector.shape_cast %141 : vector<8x32xbf16> to vector<1x8x32xbf16>
    "tpu.trace_start"() <{level = 10 : i32, message = "ghl,gle->ghe"}> : () -> ()
    %cst_59 = arith.constant dense<0.000000e+00> : vector<1x32x32xf32>
    %143 = tpu.matmul %97, %142, %cst_59 {dimension_numbers = #tpu.dot_dimension_numbers<[2], [1], [1], [2], [0, 0, 0, 1, 1, 2], [0], [0]>} : vector<1x32x8xbf16>, vector<1x8x32xbf16>, vector<1x32x32xf32> -> vector<1x32x32xf32>
    "tpu.trace_stop"() : () -> ()
    %c0_60 = arith.constant 0 : index
    %c0_61 = arith.constant 0 : index
    %144 = vector.load %arg6[%c0_60, %c0_61] : memref<32x32xf32, #tpu.memory_space<vmem>>, vector<32x32xf32>
    %145 = vector.shape_cast %144 : vector<32x32xf32> to vector<1x32x32xf32>
    %146 = arith.mulf %143, %145 : vector<1x32x32xf32>
    %147 = arith.truncf %146 : vector<1x32x32xf32> to vector<1x32x32xbf16>
    "tpu.trace_start"() <{level = 10 : i32, message = "glh,ghe->gle"}> : () -> ()
    %cst_62 = arith.constant dense<0.000000e+00> : vector<1x8x32xf32>
    %148 = tpu.matmul %51, %147, %cst_62 {dimension_numbers = #tpu.dot_dimension_numbers<[2], [1], [1], [2], [0, 0, 0, 1, 1, 2], [0], [0]>} : vector<1x8x32xbf16>, vector<1x32x32xbf16>, vector<1x8x32xf32> -> vector<1x8x32xf32>
    "tpu.trace_stop"() : () -> ()
    %149 = vector.shape_cast %148 : vector<1x8x32xf32> to vector<8x32xf32>
    %c0_i32_63 = arith.constant 0 : i32
    %150 = arith.cmpi eq, %arg1, %c0_i32_63 : i32
    %151 = arith.extui %150 : i1 to i32
    %c0_i32_64 = arith.constant 0 : i32
    %152 = arith.cmpi ne, %151, %c0_i32_64 : i32
    scf.if %152 {
      %cst_104 = arith.constant 0.000000e+00 : f32
      %221 = vector.broadcast %cst_104 : f32 to vector<8x32xf32>
      %c0_105 = arith.constant 0 : index
      %c0_106 = arith.constant 0 : index
      %222 = vector.load %arg15[%c0_105, %c0_106] : memref<8x32xf32, #tpu.memory_space<vmem>>, vector<8x32xf32>
      tpu.vector_store %arg15[%c0_105, %c0_106], %221 {strides = array<i32>} : memref<8x32xf32, #tpu.memory_space<vmem>>, vector<8x32xf32>,
    } else {
    }
    %c0_65 = arith.constant 0 : index
    %c0_66 = arith.constant 0 : index
    %153 = vector.load %arg15[%c0_65, %c0_66] : memref<8x32xf32, #tpu.memory_space<vmem>>, vector<8x32xf32>
    %c0_67 = arith.constant 0 : index
    %c0_68 = arith.constant 0 : index
    %154 = vector.load %arg15[%c0_67, %c0_68] : memref<8x32xf32, #tpu.memory_space<vmem>>, vector<8x32xf32>
    %155 = arith.subf %149, %154 : vector<8x32xf32>
    %cst_69 = arith.constant 5.000000e-01 : f32
    %156 = vector.broadcast %cst_69 : f32 to vector<8x32xf32>
    %157 = arith.mulf %155, %156 : vector<8x32xf32>
    %158 = arith.addf %153, %157 : vector<8x32xf32>
    %cst_70 = arith.constant 5.000000e-01 : f32
    %159 = vector.broadcast %cst_70 : f32 to vector<8x32xf32>
    %160 = arith.cmpf oge, %158, %159 : vector<8x32xf32>
    %cst_71 = arith.constant 0.000000e+00 : f32
    %161 = vector.broadcast %cst_71 : f32 to vector<8x32xf32>
    %162 = arith.select %160, %161, %158 : vector<8x32xi1>, vector<8x32xf32>
    %c0_72 = arith.constant 0 : index
    %c0_73 = arith.constant 0 : index
    %163 = vector.load %arg15[%c0_72, %c0_73] : memref<8x32xf32, #tpu.memory_space<vmem>>, vector<8x32xf32>
    tpu.vector_store %arg15[%c0_72, %c0_73], %162 {strides = array<i32>} : memref<8x32xf32, #tpu.memory_space<vmem>>, vector<8x32xf32>,
    %164 = arith.extui %160 : vector<8x32xi1> to vector<8x32xi32>
    %165 = arith.sitofp %164 : vector<8x32xi32> to vector<8x32xf32>
    %166 = arith.truncf %165 : vector<8x32xf32> to vector<8x32xbf16>
    %c0_74 = arith.constant 0 : index
    %c0_75 = arith.constant 0 : index
    %167 = vector.load %arg7[%c0_74, %c0_75] : memref<32x32xbf16, #tpu.memory_space<vmem>>, vector<32x32xbf16>
    %cst_76 = arith.constant dense<0.000000e+00> : vector<8x32xf32>
    %168 = tpu.matmul %166, %167, %cst_76 {dimension_numbers = #tpu.dot_dimension_numbers<[1], [0], [0], [1], [0, 0, 1, 1], [], []>} : vector<8x32xbf16>, vector<32x32xbf16>, vector<8x32xf32> -> vector<8x32xf32>
    %c0_77 = arith.constant 0 : index
    %c0_78 = arith.constant 0 : index
    %169 = vector.load %arg8[%c0_77, %c0_78] : memref<1x32xf32, #tpu.memory_space<vmem>>, vector<1x32xf32>
    %170 = vector.broadcast %169 : vector<1x32xf32> to vector<8x32xf32>
    %171 = arith.addf %168, %170 : vector<8x32xf32>
    %c0_79 = arith.constant 0 : index
    %c0_80 = arith.constant 0 : index
    %172 = vector.load %arg9[%c0_79, %c0_80] : memref<1x32xf32, #tpu.memory_space<vmem>>, vector<1x32xf32>
    %c0_81 = arith.constant 0 : index
    %c0_82 = arith.constant 0 : index
    %173 = vector.load %arg10[%c0_81, %c0_82] : memref<1x32xf32, #tpu.memory_space<vmem>>, vector<1x32xf32>
    %cst_83 = arith.constant dense<0.000000e+00> : vector<8xf32>
    %174 = vector.multi_reduction <add>, %171, %cst_83 [1] : vector<8x32xf32> to vector<8xf32>
    %175 = vector.shape_cast %174 : vector<8xf32> to vector<8x1xf32>
    %cst_84 = arith.constant 3.200000e+01 : f32
    %176 = vector.broadcast %cst_84 : f32 to vector<8x1xf32>
    %177 = arith.divf %175, %176 : vector<8x1xf32>
    %178 = arith.mulf %171, %171 : vector<8x32xf32>
    %cst_85 = arith.constant dense<0.000000e+00> : vector<8xf32>
    %179 = vector.multi_reduction <add>, %178, %cst_85 [1] : vector<8x32xf32> to vector<8xf32>
    %180 = vector.shape_cast %179 : vector<8xf32> to vector<8x1xf32>
    %cst_86 = arith.constant 3.200000e+01 : f32
    %181 = vector.broadcast %cst_86 : f32 to vector<8x1xf32>
    %182 = arith.divf %180, %181 : vector<8x1xf32>
    %183 = arith.mulf %177, %177 : vector<8x1xf32>
    %184 = arith.subf %182, %183 : vector<8x1xf32>
    %cst_87 = arith.constant 0.000000e+00 : f32
    %185 = vector.broadcast %cst_87 : f32 to vector<8x1xf32>
    %186 = arith.maximumf %184, %185 : vector<8x1xf32>
    %187 = vector.broadcast %177 : vector<8x1xf32> to vector<8x32xf32>
    %188 = arith.subf %171, %187 : vector<8x32xf32>
    %cst_88 = arith.constant 9.99999974E-6 : f32
    %189 = vector.broadcast %cst_88 : f32 to vector<8x1xf32>
    %190 = arith.addf %186, %189 : vector<8x1xf32>
    %191 = math.rsqrt %190 : vector<8x1xf32>
    %192 = vector.broadcast %191 : vector<8x1xf32> to vector<8x32xf32>
    %193 = arith.mulf %188, %192 : vector<8x32xf32>
    %194 = vector.broadcast %172 : vector<1x32xf32> to vector<8x32xf32>
    %195 = arith.mulf %193, %194 : vector<8x32xf32>
    %196 = vector.broadcast %173 : vector<1x32xf32> to vector<8x32xf32>
    %197 = arith.addf %195, %196 : vector<8x32xf32>
    %c0_i32_89 = arith.constant 0 : i32
    %198 = arith.cmpi eq, %arg1, %c0_i32_89 : i32
    %199 = arith.extui %198 : i1 to i32
    %c0_i32_90 = arith.constant 0 : i32
    %200 = arith.cmpi ne, %199, %c0_i32_90 : i32
    scf.if %200 {
      %cst_104 = arith.constant 0.000000e+00 : f32
      %221 = vector.broadcast %cst_104 : f32 to vector<8x32xf32>
      %c0_105 = arith.constant 0 : index
      %c0_106 = arith.constant 0 : index
      %222 = vector.load %arg16[%c0_105, %c0_106] : memref<8x32xf32, #tpu.memory_space<vmem>>, vector<8x32xf32>
      tpu.vector_store %arg16[%c0_105, %c0_106], %221 {strides = array<i32>} : memref<8x32xf32, #tpu.memory_space<vmem>>, vector<8x32xf32>,
    } else {
    }
    %c0_91 = arith.constant 0 : index
    %c0_92 = arith.constant 0 : index
    %201 = vector.load %arg16[%c0_91, %c0_92] : memref<8x32xf32, #tpu.memory_space<vmem>>, vector<8x32xf32>
    %c0_93 = arith.constant 0 : index
    %c0_94 = arith.constant 0 : index
    %202 = vector.load %arg16[%c0_93, %c0_94] : memref<8x32xf32, #tpu.memory_space<vmem>>, vector<8x32xf32>
    %203 = arith.subf %197, %202 : vector<8x32xf32>
    %cst_95 = arith.constant 5.000000e-01 : f32
    %204 = vector.broadcast %cst_95 : f32 to vector<8x32xf32>
    %205 = arith.mulf %203, %204 : vector<8x32xf32>
    %206 = arith.addf %201, %205 : vector<8x32xf32>
    %cst_96 = arith.constant 1.000000e+00 : f32
    %207 = vector.broadcast %cst_96 : f32 to vector<8x32xf32>
    %208 = arith.cmpf oge, %206, %207 : vector<8x32xf32>
    %cst_97 = arith.constant 0.000000e+00 : f32
    %209 = vector.broadcast %cst_97 : f32 to vector<8x32xf32>
    %210 = arith.select %208, %209, %206 : vector<8x32xi1>, vector<8x32xf32>
    %c0_98 = arith.constant 0 : index
    %c0_99 = arith.constant 0 : index
    %211 = vector.load %arg16[%c0_98, %c0_99] : memref<8x32xf32, #tpu.memory_space<vmem>>, vector<8x32xf32>
    tpu.vector_store %arg16[%c0_98, %c0_99], %210 {strides = array<i32>} : memref<8x32xf32, #tpu.memory_space<vmem>>, vector<8x32xf32>,
    %212 = arith.extui %208 : vector<8x32xi1> to vector<8x32xi32>
    %213 = arith.sitofp %212 : vector<8x32xi32> to vector<8x32xf32>
    %214 = arith.extf %2 : vector<8x32xbf16> to vector<8x32xf32>
    %215 = arith.addf %214, %213 : vector<8x32xf32>
    %216 = vector.shape_cast %215 : vector<8x32xf32> to vector<1x8x32xf32>
    %217 = arith.truncf %216 : vector<1x8x32xf32> to vector<1x8x32xbf16>
    %c0_100 = arith.constant 0 : index
    %c0_101 = arith.constant 0 : index
    %c0_102 = arith.constant 0 : index
    %c0_103 = arith.constant 0 : index
    %218 = vector.load %arg11[%c0_100, %c0_101, %c0_102, %c0_103] : memref<1x1x8x32xbf16, #tpu.memory_space<vmem>>, vector<1x1x8x32xbf16>
    %219 = vector.shape_cast %218 : vector<1x1x8x32xbf16> to vector<1x8x32xbf16>
    %220 = vector.shape_cast %217 : vector<1x8x32xbf16> to vector<1x1x8x32xbf16>
    tpu.vector_store %arg11[%c0_100, %c0_101, %c0_102, %c0_103], %220 {strides = array<i32>} : memref<1x1x8x32xbf16, #tpu.memory_space<vmem>>, vector<1x1x8x32xbf16>,
    return
  }
  func.func @transform_0(%arg0: i32, %arg1: i32) -> (i32, i32, i32, i32) {
    %c0_i32 = arith.constant 0 : i32
    %c0_i32_0 = arith.constant 0 : i32
    %c0_i32_1 = arith.constant 0 : i32
    return %arg1, %arg0, %c0_i32, %c0_i32_0 : i32, i32, i32, i32
  }
  func.func @transform_1(%arg0: i32, %arg1: i32) -> (i32, i32) {
    %c0_i32 = arith.constant 0 : i32
    %c0_i32_0 = arith.constant 0 : i32
    %c0_i32_1 = arith.constant 0 : i32
    return %c0_i32, %c0_i32_0 : i32, i32
  }
  func.func @transform_2(%arg0: i32, %arg1: i32) -> (i32, i32) {
    %c0_i32 = arith.constant 0 : i32
    %c0_i32_0 = arith.constant 0 : i32
    %c0_i32_1 = arith.constant 0 : i32
    return %c0_i32, %c0_i32_0 : i32, i32
  }
  func.func @transform_3(%arg0: i32, %arg1: i32) -> (i32, i32) {
    %c0_i32 = arith.constant 0 : i32
    %c0_i32_0 = arith.constant 0 : i32
    %c0_i32_1 = arith.constant 0 : i32
    return %c0_i32, %c0_i32_0 : i32, i32
  }
  func.func @transform_4(%arg0: i32, %arg1: i32) -> (i32, i32) {
    %c0_i32 = arith.constant 0 : i32
    %c0_i32_0 = arith.constant 0 : i32
    %c0_i32_1 = arith.constant 0 : i32
    return %c0_i32, %c0_i32_0 : i32, i32
  }
  func.func @transform_5(%arg0: i32, %arg1: i32) -> (i32, i32) {
    %c0_i32 = arith.constant 0 : i32
    %c0_i32_0 = arith.constant 0 : i32
    %c0_i32_1 = arith.constant 0 : i32
    return %c0_i32, %c0_i32_0 : i32, i32
  }
  func.func @transform_6(%arg0: i32, %arg1: i32) -> (i32, i32) {
    %c0_i32 = arith.constant 0 : i32
    %c0_i32_0 = arith.constant 0 : i32
    %c0_i32_1 = arith.constant 0 : i32
    return %c0_i32, %c0_i32_0 : i32, i32
  }
  func.func @transform_7(%arg0: i32, %arg1: i32) -> (i32, i32) {
    %c0_i32 = arith.constant 0 : i32
    %c0_i32_0 = arith.constant 0 : i32
    %c0_i32_1 = arith.constant 0 : i32
    return %c0_i32, %c0_i32_0 : i32, i32
  }
  func.func @transform_8(%arg0: i32, %arg1: i32) -> (i32, i32) {
    %c0_i32 = arith.constant 0 : i32
    %c0_i32_0 = arith.constant 0 : i32
    %c0_i32_1 = arith.constant 0 : i32
    return %c0_i32, %c0_i32_0 : i32, i32
  }
  func.func @transform_9(%arg0: i32, %arg1: i32) -> (i32, i32, i32, i32) {
    %c0_i32 = arith.constant 0 : i32
    %c0_i32_0 = arith.constant 0 : i32
    %c0_i32_1 = arith.constant 0 : i32
    return %arg1, %arg0, %c0_i32, %c0_i32_0 : i32, i32, i32, i32
  }
}

module attributes {stable_mosaic.version = 11 : i64} {
  func.func @_mlp_block_kernel(%arg0: i32, %arg1: i32, %arg2: memref<1x16x32xbf16, #tpu.memory_space<vmem>>, %arg3: memref<32x256xbf16, #tpu.memory_space<vmem>>, %arg4: memref<1x256xf32, #tpu.memory_space<vmem>>, %arg5: memref<1x256xf32, #tpu.memory_space<vmem>>, %arg6: memref<1x256xf32, #tpu.memory_space<vmem>>, %arg7: memref<256x32xbf16, #tpu.memory_space<vmem>>, %arg8: memref<1x32xf32, #tpu.memory_space<vmem>>, %arg9: memref<1x32xf32, #tpu.memory_space<vmem>>, %arg10: memref<1x32xf32, #tpu.memory_space<vmem>>, %arg11: memref<1x16x32xbf16, #tpu.memory_space<vmem>>, %arg12: memref<16x256xf32, #tpu.memory_space<vmem>>, %arg13: memref<16x32xf32, #tpu.memory_space<vmem>>) attributes {dimension_semantics = [#tpu.dimension_semantics<parallel>, #tpu.dimension_semantics<arbitrary>], iteration_bounds = array<i64: 1, 4>, scalar_prefetch = 0 : i64, scratch_operands = 2 : i64, tpu.core_type = #tpu.core_type<tc>, window_params = [{transform_indices = @transform_0, window_bounds = array<i64: 1, 16, 32>}, {pipeline_mode = #tpu.pipeline_mode<synchronous>, transform_indices = @transform_1, window_bounds = array<i64: 32, 256>}, {pipeline_mode = #tpu.pipeline_mode<synchronous>, transform_indices = @transform_2, window_bounds = array<i64: 1, 256>}, {pipeline_mode = #tpu.pipeline_mode<synchronous>, transform_indices = @transform_3, window_bounds = array<i64: 1, 256>}, {pipeline_mode = #tpu.pipeline_mode<synchronous>, transform_indices = @transform_4, window_bounds = array<i64: 1, 256>}, {pipeline_mode = #tpu.pipeline_mode<synchronous>, transform_indices = @transform_5, window_bounds = array<i64: 256, 32>}, {pipeline_mode = #tpu.pipeline_mode<synchronous>, transform_indices = @transform_6, window_bounds = array<i64: 1, 32>}, {pipeline_mode = #tpu.pipeline_mode<synchronous>, transform_indices = @transform_7, window_bounds = array<i64: 1, 32>}, {pipeline_mode = #tpu.pipeline_mode<synchronous>, transform_indices = @transform_8, window_bounds = array<i64: 1, 32>}, {transform_indices = @transform_9, window_bounds = array<i64: 1, 16, 32>}]} {
    %c0 = arith.constant 0 : index
    %c0_0 = arith.constant 0 : index
    %c0_1 = arith.constant 0 : index
    %0 = vector.load %arg2[%c0, %c0_0, %c0_1] : memref<1x16x32xbf16, #tpu.memory_space<vmem>>, vector<1x16x32xbf16>
    %1 = vector.shape_cast %0 : vector<1x16x32xbf16> to vector<16x32xbf16>
    %c0_2 = arith.constant 0 : index
    %c0_3 = arith.constant 0 : index
    %2 = vector.load %arg3[%c0_2, %c0_3] : memref<32x256xbf16, #tpu.memory_space<vmem>>, vector<32x256xbf16>
    %cst = arith.constant dense<0.000000e+00> : vector<16x256xf32>
    %3 = tpu.matmul %1, %2, %cst {dimension_numbers = #tpu.dot_dimension_numbers<[1], [0], [0], [1], [0, 0, 1, 1], [], []>} : vector<16x32xbf16>, vector<32x256xbf16>, vector<16x256xf32> -> vector<16x256xf32>
    %c0_4 = arith.constant 0 : index
    %c0_5 = arith.constant 0 : index
    %4 = vector.load %arg4[%c0_4, %c0_5] : memref<1x256xf32, #tpu.memory_space<vmem>>, vector<1x256xf32>
    %5 = vector.broadcast %4 : vector<1x256xf32> to vector<16x256xf32>
    %6 = arith.addf %3, %5 : vector<16x256xf32>
    %c0_6 = arith.constant 0 : index
    %c0_7 = arith.constant 0 : index
    %7 = vector.load %arg5[%c0_6, %c0_7] : memref<1x256xf32, #tpu.memory_space<vmem>>, vector<1x256xf32>
    %c0_8 = arith.constant 0 : index
    %c0_9 = arith.constant 0 : index
    %8 = vector.load %arg6[%c0_8, %c0_9] : memref<1x256xf32, #tpu.memory_space<vmem>>, vector<1x256xf32>
    %cst_10 = arith.constant dense<0.000000e+00> : vector<16xf32>
    %9 = vector.multi_reduction <add>, %6, %cst_10 [1] : vector<16x256xf32> to vector<16xf32>
    %10 = vector.shape_cast %9 : vector<16xf32> to vector<16x1xf32>
    %cst_11 = arith.constant 2.560000e+02 : f32
    %11 = vector.broadcast %cst_11 : f32 to vector<16x1xf32>
    %12 = arith.divf %10, %11 : vector<16x1xf32>
    %13 = arith.mulf %6, %6 : vector<16x256xf32>
    %cst_12 = arith.constant dense<0.000000e+00> : vector<16xf32>
    %14 = vector.multi_reduction <add>, %13, %cst_12 [1] : vector<16x256xf32> to vector<16xf32>
    %15 = vector.shape_cast %14 : vector<16xf32> to vector<16x1xf32>
    %cst_13 = arith.constant 2.560000e+02 : f32
    %16 = vector.broadcast %cst_13 : f32 to vector<16x1xf32>
    %17 = arith.divf %15, %16 : vector<16x1xf32>
    %18 = arith.mulf %12, %12 : vector<16x1xf32>
    %19 = arith.subf %17, %18 : vector<16x1xf32>
    %cst_14 = arith.constant 0.000000e+00 : f32
    %20 = vector.broadcast %cst_14 : f32 to vector<16x1xf32>
    %21 = arith.maximumf %19, %20 : vector<16x1xf32>
    %22 = vector.broadcast %12 : vector<16x1xf32> to vector<16x256xf32>
    %23 = arith.subf %6, %22 : vector<16x256xf32>
    %cst_15 = arith.constant 9.99999974E-6 : f32
    %24 = vector.broadcast %cst_15 : f32 to vector<16x1xf32>
    %25 = arith.addf %21, %24 : vector<16x1xf32>
    %26 = math.rsqrt %25 : vector<16x1xf32>
    %27 = vector.broadcast %26 : vector<16x1xf32> to vector<16x256xf32>
    %28 = arith.mulf %23, %27 : vector<16x256xf32>
    %29 = vector.broadcast %7 : vector<1x256xf32> to vector<16x256xf32>
    %30 = arith.mulf %28, %29 : vector<16x256xf32>
    %31 = vector.broadcast %8 : vector<1x256xf32> to vector<16x256xf32>
    %32 = arith.addf %30, %31 : vector<16x256xf32>
    %c0_i32 = arith.constant 0 : i32
    %33 = arith.cmpi eq, %arg1, %c0_i32 : i32
    %34 = arith.extui %33 : i1 to i32
    %c0_i32_16 = arith.constant 0 : i32
    %35 = arith.cmpi ne, %34, %c0_i32_16 : i32
    scf.if %35 {
      %cst_55 = arith.constant 0.000000e+00 : f32
      %103 = vector.broadcast %cst_55 : f32 to vector<16x256xf32>
      %c0_56 = arith.constant 0 : index
      %c0_57 = arith.constant 0 : index
      %104 = vector.load %arg12[%c0_56, %c0_57] : memref<16x256xf32, #tpu.memory_space<vmem>>, vector<16x256xf32>
      tpu.vector_store %arg12[%c0_56, %c0_57], %103 {strides = array<i32>} : memref<16x256xf32, #tpu.memory_space<vmem>>, vector<16x256xf32>,
    } else {
    }
    %c0_17 = arith.constant 0 : index
    %c0_18 = arith.constant 0 : index
    %36 = vector.load %arg12[%c0_17, %c0_18] : memref<16x256xf32, #tpu.memory_space<vmem>>, vector<16x256xf32>
    %c0_19 = arith.constant 0 : index
    %c0_20 = arith.constant 0 : index
    %37 = vector.load %arg12[%c0_19, %c0_20] : memref<16x256xf32, #tpu.memory_space<vmem>>, vector<16x256xf32>
    %38 = arith.subf %32, %37 : vector<16x256xf32>
    %cst_21 = arith.constant 5.000000e-01 : f32
    %39 = vector.broadcast %cst_21 : f32 to vector<16x256xf32>
    %40 = arith.mulf %38, %39 : vector<16x256xf32>
    %41 = arith.addf %36, %40 : vector<16x256xf32>
    %cst_22 = arith.constant 1.000000e+00 : f32
    %42 = vector.broadcast %cst_22 : f32 to vector<16x256xf32>
    %43 = arith.cmpf oge, %41, %42 : vector<16x256xf32>
    %cst_23 = arith.constant 0.000000e+00 : f32
    %44 = vector.broadcast %cst_23 : f32 to vector<16x256xf32>
    %45 = arith.select %43, %44, %41 : vector<16x256xi1>, vector<16x256xf32>
    %c0_24 = arith.constant 0 : index
    %c0_25 = arith.constant 0 : index
    %46 = vector.load %arg12[%c0_24, %c0_25] : memref<16x256xf32, #tpu.memory_space<vmem>>, vector<16x256xf32>
    tpu.vector_store %arg12[%c0_24, %c0_25], %45 {strides = array<i32>} : memref<16x256xf32, #tpu.memory_space<vmem>>, vector<16x256xf32>,
    %47 = arith.extui %43 : vector<16x256xi1> to vector<16x256xi32>
    %48 = arith.sitofp %47 : vector<16x256xi32> to vector<16x256xf32>
    %49 = arith.truncf %48 : vector<16x256xf32> to vector<16x256xbf16>
    %c0_26 = arith.constant 0 : index
    %c0_27 = arith.constant 0 : index
    %50 = vector.load %arg7[%c0_26, %c0_27] : memref<256x32xbf16, #tpu.memory_space<vmem>>, vector<256x32xbf16>
    %cst_28 = arith.constant dense<0.000000e+00> : vector<16x32xf32>
    %51 = tpu.matmul %49, %50, %cst_28 {dimension_numbers = #tpu.dot_dimension_numbers<[1], [0], [0], [1], [0, 0, 1, 1], [], []>} : vector<16x256xbf16>, vector<256x32xbf16>, vector<16x32xf32> -> vector<16x32xf32>
    %c0_29 = arith.constant 0 : index
    %c0_30 = arith.constant 0 : index
    %52 = vector.load %arg8[%c0_29, %c0_30] : memref<1x32xf32, #tpu.memory_space<vmem>>, vector<1x32xf32>
    %53 = vector.broadcast %52 : vector<1x32xf32> to vector<16x32xf32>
    %54 = arith.addf %51, %53 : vector<16x32xf32>
    %c0_31 = arith.constant 0 : index
    %c0_32 = arith.constant 0 : index
    %55 = vector.load %arg9[%c0_31, %c0_32] : memref<1x32xf32, #tpu.memory_space<vmem>>, vector<1x32xf32>
    %c0_33 = arith.constant 0 : index
    %c0_34 = arith.constant 0 : index
    %56 = vector.load %arg10[%c0_33, %c0_34] : memref<1x32xf32, #tpu.memory_space<vmem>>, vector<1x32xf32>
    %cst_35 = arith.constant dense<0.000000e+00> : vector<16xf32>
    %57 = vector.multi_reduction <add>, %54, %cst_35 [1] : vector<16x32xf32> to vector<16xf32>
    %58 = vector.shape_cast %57 : vector<16xf32> to vector<16x1xf32>
    %cst_36 = arith.constant 3.200000e+01 : f32
    %59 = vector.broadcast %cst_36 : f32 to vector<16x1xf32>
    %60 = arith.divf %58, %59 : vector<16x1xf32>
    %61 = arith.mulf %54, %54 : vector<16x32xf32>
    %cst_37 = arith.constant dense<0.000000e+00> : vector<16xf32>
    %62 = vector.multi_reduction <add>, %61, %cst_37 [1] : vector<16x32xf32> to vector<16xf32>
    %63 = vector.shape_cast %62 : vector<16xf32> to vector<16x1xf32>
    %cst_38 = arith.constant 3.200000e+01 : f32
    %64 = vector.broadcast %cst_38 : f32 to vector<16x1xf32>
    %65 = arith.divf %63, %64 : vector<16x1xf32>
    %66 = arith.mulf %60, %60 : vector<16x1xf32>
    %67 = arith.subf %65, %66 : vector<16x1xf32>
    %cst_39 = arith.constant 0.000000e+00 : f32
    %68 = vector.broadcast %cst_39 : f32 to vector<16x1xf32>
    %69 = arith.maximumf %67, %68 : vector<16x1xf32>
    %70 = vector.broadcast %60 : vector<16x1xf32> to vector<16x32xf32>
    %71 = arith.subf %54, %70 : vector<16x32xf32>
    %cst_40 = arith.constant 9.99999974E-6 : f32
    %72 = vector.broadcast %cst_40 : f32 to vector<16x1xf32>
    %73 = arith.addf %69, %72 : vector<16x1xf32>
    %74 = math.rsqrt %73 : vector<16x1xf32>
    %75 = vector.broadcast %74 : vector<16x1xf32> to vector<16x32xf32>
    %76 = arith.mulf %71, %75 : vector<16x32xf32>
    %77 = vector.broadcast %55 : vector<1x32xf32> to vector<16x32xf32>
    %78 = arith.mulf %76, %77 : vector<16x32xf32>
    %79 = vector.broadcast %56 : vector<1x32xf32> to vector<16x32xf32>
    %80 = arith.addf %78, %79 : vector<16x32xf32>
    %c0_i32_41 = arith.constant 0 : i32
    %81 = arith.cmpi eq, %arg1, %c0_i32_41 : i32
    %82 = arith.extui %81 : i1 to i32
    %c0_i32_42 = arith.constant 0 : i32
    %83 = arith.cmpi ne, %82, %c0_i32_42 : i32
    scf.if %83 {
      %cst_55 = arith.constant 0.000000e+00 : f32
      %103 = vector.broadcast %cst_55 : f32 to vector<16x32xf32>
      %c0_56 = arith.constant 0 : index
      %c0_57 = arith.constant 0 : index
      %104 = vector.load %arg13[%c0_56, %c0_57] : memref<16x32xf32, #tpu.memory_space<vmem>>, vector<16x32xf32>
      tpu.vector_store %arg13[%c0_56, %c0_57], %103 {strides = array<i32>} : memref<16x32xf32, #tpu.memory_space<vmem>>, vector<16x32xf32>,
    } else {
    }
    %c0_43 = arith.constant 0 : index
    %c0_44 = arith.constant 0 : index
    %84 = vector.load %arg13[%c0_43, %c0_44] : memref<16x32xf32, #tpu.memory_space<vmem>>, vector<16x32xf32>
    %c0_45 = arith.constant 0 : index
    %c0_46 = arith.constant 0 : index
    %85 = vector.load %arg13[%c0_45, %c0_46] : memref<16x32xf32, #tpu.memory_space<vmem>>, vector<16x32xf32>
    %86 = arith.subf %80, %85 : vector<16x32xf32>
    %cst_47 = arith.constant 5.000000e-01 : f32
    %87 = vector.broadcast %cst_47 : f32 to vector<16x32xf32>
    %88 = arith.mulf %86, %87 : vector<16x32xf32>
    %89 = arith.addf %84, %88 : vector<16x32xf32>
    %cst_48 = arith.constant 1.000000e+00 : f32
    %90 = vector.broadcast %cst_48 : f32 to vector<16x32xf32>
    %91 = arith.cmpf oge, %89, %90 : vector<16x32xf32>
    %cst_49 = arith.constant 0.000000e+00 : f32
    %92 = vector.broadcast %cst_49 : f32 to vector<16x32xf32>
    %93 = arith.select %91, %92, %89 : vector<16x32xi1>, vector<16x32xf32>
    %c0_50 = arith.constant 0 : index
    %c0_51 = arith.constant 0 : index
    %94 = vector.load %arg13[%c0_50, %c0_51] : memref<16x32xf32, #tpu.memory_space<vmem>>, vector<16x32xf32>
    tpu.vector_store %arg13[%c0_50, %c0_51], %93 {strides = array<i32>} : memref<16x32xf32, #tpu.memory_space<vmem>>, vector<16x32xf32>,
    %95 = arith.extui %91 : vector<16x32xi1> to vector<16x32xi32>
    %96 = arith.sitofp %95 : vector<16x32xi32> to vector<16x32xf32>
    %97 = arith.extf %1 : vector<16x32xbf16> to vector<16x32xf32>
    %98 = arith.addf %97, %96 : vector<16x32xf32>
    %99 = arith.truncf %98 : vector<16x32xf32> to vector<16x32xbf16>
    %c0_52 = arith.constant 0 : index
    %c0_53 = arith.constant 0 : index
    %c0_54 = arith.constant 0 : index
    %100 = vector.load %arg11[%c0_52, %c0_53, %c0_54] : memref<1x16x32xbf16, #tpu.memory_space<vmem>>, vector<1x16x32xbf16>
    %101 = vector.shape_cast %100 : vector<1x16x32xbf16> to vector<16x32xbf16>
    %102 = vector.shape_cast %99 : vector<16x32xbf16> to vector<1x16x32xbf16>
    tpu.vector_store %arg11[%c0_52, %c0_53, %c0_54], %102 {strides = array<i32>} : memref<1x16x32xbf16, #tpu.memory_space<vmem>>, vector<1x16x32xbf16>,
    return
  }
  func.func @transform_0(%arg0: i32, %arg1: i32) -> (i32, i32, i32) {
    %c0_i32 = arith.constant 0 : i32
    %c0_i32_0 = arith.constant 0 : i32
    return %arg1, %arg0, %c0_i32 : i32, i32, i32
  }
  func.func @transform_1(%arg0: i32, %arg1: i32) -> (i32, i32) {
    %c0_i32 = arith.constant 0 : i32
    %c0_i32_0 = arith.constant 0 : i32
    %c0_i32_1 = arith.constant 0 : i32
    return %c0_i32, %c0_i32_0 : i32, i32
  }
  func.func @transform_2(%arg0: i32, %arg1: i32) -> (i32, i32) {
    %c0_i32 = arith.constant 0 : i32
    %c0_i32_0 = arith.constant 0 : i32
    %c0_i32_1 = arith.constant 0 : i32
    return %c0_i32, %c0_i32_0 : i32, i32
  }
  func.func @transform_3(%arg0: i32, %arg1: i32) -> (i32, i32) {
    %c0_i32 = arith.constant 0 : i32
    %c0_i32_0 = arith.constant 0 : i32
    %c0_i32_1 = arith.constant 0 : i32
    return %c0_i32, %c0_i32_0 : i32, i32
  }
  func.func @transform_4(%arg0: i32, %arg1: i32) -> (i32, i32) {
    %c0_i32 = arith.constant 0 : i32
    %c0_i32_0 = arith.constant 0 : i32
    %c0_i32_1 = arith.constant 0 : i32
    return %c0_i32, %c0_i32_0 : i32, i32
  }
  func.func @transform_5(%arg0: i32, %arg1: i32) -> (i32, i32) {
    %c0_i32 = arith.constant 0 : i32
    %c0_i32_0 = arith.constant 0 : i32
    %c0_i32_1 = arith.constant 0 : i32
    return %c0_i32, %c0_i32_0 : i32, i32
  }
  func.func @transform_6(%arg0: i32, %arg1: i32) -> (i32, i32) {
    %c0_i32 = arith.constant 0 : i32
    %c0_i32_0 = arith.constant 0 : i32
    %c0_i32_1 = arith.constant 0 : i32
    return %c0_i32, %c0_i32_0 : i32, i32
  }
  func.func @transform_7(%arg0: i32, %arg1: i32) -> (i32, i32) {
    %c0_i32 = arith.constant 0 : i32
    %c0_i32_0 = arith.constant 0 : i32
    %c0_i32_1 = arith.constant 0 : i32
    return %c0_i32, %c0_i32_0 : i32, i32
  }
  func.func @transform_8(%arg0: i32, %arg1: i32) -> (i32, i32) {
    %c0_i32 = arith.constant 0 : i32
    %c0_i32_0 = arith.constant 0 : i32
    %c0_i32_1 = arith.constant 0 : i32
    return %c0_i32, %c0_i32_0 : i32, i32
  }
  func.func @transform_9(%arg0: i32, %arg1: i32) -> (i32, i32, i32) {
    %c0_i32 = arith.constant 0 : i32
    %c0_i32_0 = arith.constant 0 : i32
    return %arg1, %arg0, %c0_i32 : i32, i32, i32
  }
}

module attributes {stable_mosaic.version = 11 : i64} {
  func.func @_mlp_block_kernel(%arg0: i32, %arg1: i32, %arg2: memref<1x16x32xbf16, #tpu.memory_space<vmem>>, %arg3: memref<32x256xbf16, #tpu.memory_space<vmem>>, %arg4: memref<1x256xf32, #tpu.memory_space<vmem>>, %arg5: memref<1x256xf32, #tpu.memory_space<vmem>>, %arg6: memref<1x256xf32, #tpu.memory_space<vmem>>, %arg7: memref<256x32xbf16, #tpu.memory_space<vmem>>, %arg8: memref<1x32xf32, #tpu.memory_space<vmem>>, %arg9: memref<1x32xf32, #tpu.memory_space<vmem>>, %arg10: memref<1x32xf32, #tpu.memory_space<vmem>>, %arg11: memref<16x32xf32, #tpu.memory_space<vmem>>, %arg12: memref<16x256xf32, #tpu.memory_space<vmem>>, %arg13: memref<16x32xf32, #tpu.memory_space<vmem>>) attributes {dimension_semantics = [#tpu.dimension_semantics<parallel>, #tpu.dimension_semantics<arbitrary>], iteration_bounds = array<i64: 1, 4>, scalar_prefetch = 0 : i64, scratch_operands = 2 : i64, tpu.core_type = #tpu.core_type<tc>, window_params = [{transform_indices = @transform_0, window_bounds = array<i64: 1, 16, 32>}, {pipeline_mode = #tpu.pipeline_mode<synchronous>, transform_indices = @transform_1, window_bounds = array<i64: 32, 256>}, {pipeline_mode = #tpu.pipeline_mode<synchronous>, transform_indices = @transform_2, window_bounds = array<i64: 1, 256>}, {pipeline_mode = #tpu.pipeline_mode<synchronous>, transform_indices = @transform_3, window_bounds = array<i64: 1, 256>}, {pipeline_mode = #tpu.pipeline_mode<synchronous>, transform_indices = @transform_4, window_bounds = array<i64: 1, 256>}, {pipeline_mode = #tpu.pipeline_mode<synchronous>, transform_indices = @transform_5, window_bounds = array<i64: 256, 32>}, {pipeline_mode = #tpu.pipeline_mode<synchronous>, transform_indices = @transform_6, window_bounds = array<i64: 1, 32>}, {pipeline_mode = #tpu.pipeline_mode<synchronous>, transform_indices = @transform_7, window_bounds = array<i64: 1, 32>}, {pipeline_mode = #tpu.pipeline_mode<synchronous>, transform_indices = @transform_8, window_bounds = array<i64: 1, 32>}, {transform_indices = @transform_9, window_bounds = array<i64: 16, 32>}]} {
    %c0 = arith.constant 0 : index
    %c0_0 = arith.constant 0 : index
    %c0_1 = arith.constant 0 : index
    %0 = vector.load %arg2[%c0, %c0_0, %c0_1] : memref<1x16x32xbf16, #tpu.memory_space<vmem>>, vector<1x16x32xbf16>
    %1 = vector.shape_cast %0 : vector<1x16x32xbf16> to vector<16x32xbf16>
    %c0_2 = arith.constant 0 : index
    %c0_3 = arith.constant 0 : index
    %2 = vector.load %arg3[%c0_2, %c0_3] : memref<32x256xbf16, #tpu.memory_space<vmem>>, vector<32x256xbf16>
    %cst = arith.constant dense<0.000000e+00> : vector<16x256xf32>
    %3 = tpu.matmul %1, %2, %cst {dimension_numbers = #tpu.dot_dimension_numbers<[1], [0], [0], [1], [0, 0, 1, 1], [], []>} : vector<16x32xbf16>, vector<32x256xbf16>, vector<16x256xf32> -> vector<16x256xf32>
    %c0_4 = arith.constant 0 : index
    %c0_5 = arith.constant 0 : index
    %4 = vector.load %arg4[%c0_4, %c0_5] : memref<1x256xf32, #tpu.memory_space<vmem>>, vector<1x256xf32>
    %5 = vector.broadcast %4 : vector<1x256xf32> to vector<16x256xf32>
    %6 = arith.addf %3, %5 : vector<16x256xf32>
    %c0_6 = arith.constant 0 : index
    %c0_7 = arith.constant 0 : index
    %7 = vector.load %arg5[%c0_6, %c0_7] : memref<1x256xf32, #tpu.memory_space<vmem>>, vector<1x256xf32>
    %c0_8 = arith.constant 0 : index
    %c0_9 = arith.constant 0 : index
    %8 = vector.load %arg6[%c0_8, %c0_9] : memref<1x256xf32, #tpu.memory_space<vmem>>, vector<1x256xf32>
    %cst_10 = arith.constant dense<0.000000e+00> : vector<16xf32>
    %9 = vector.multi_reduction <add>, %6, %cst_10 [1] : vector<16x256xf32> to vector<16xf32>
    %10 = vector.shape_cast %9 : vector<16xf32> to vector<16x1xf32>
    %cst_11 = arith.constant 2.560000e+02 : f32
    %11 = vector.broadcast %cst_11 : f32 to vector<16x1xf32>
    %12 = arith.divf %10, %11 : vector<16x1xf32>
    %13 = arith.mulf %6, %6 : vector<16x256xf32>
    %cst_12 = arith.constant dense<0.000000e+00> : vector<16xf32>
    %14 = vector.multi_reduction <add>, %13, %cst_12 [1] : vector<16x256xf32> to vector<16xf32>
    %15 = vector.shape_cast %14 : vector<16xf32> to vector<16x1xf32>
    %cst_13 = arith.constant 2.560000e+02 : f32
    %16 = vector.broadcast %cst_13 : f32 to vector<16x1xf32>
    %17 = arith.divf %15, %16 : vector<16x1xf32>
    %18 = arith.mulf %12, %12 : vector<16x1xf32>
    %19 = arith.subf %17, %18 : vector<16x1xf32>
    %cst_14 = arith.constant 0.000000e+00 : f32
    %20 = vector.broadcast %cst_14 : f32 to vector<16x1xf32>
    %21 = arith.maximumf %19, %20 : vector<16x1xf32>
    %22 = vector.broadcast %12 : vector<16x1xf32> to vector<16x256xf32>
    %23 = arith.subf %6, %22 : vector<16x256xf32>
    %cst_15 = arith.constant 9.99999974E-6 : f32
    %24 = vector.broadcast %cst_15 : f32 to vector<16x1xf32>
    %25 = arith.addf %21, %24 : vector<16x1xf32>
    %26 = math.rsqrt %25 : vector<16x1xf32>
    %27 = vector.broadcast %26 : vector<16x1xf32> to vector<16x256xf32>
    %28 = arith.mulf %23, %27 : vector<16x256xf32>
    %29 = vector.broadcast %7 : vector<1x256xf32> to vector<16x256xf32>
    %30 = arith.mulf %28, %29 : vector<16x256xf32>
    %31 = vector.broadcast %8 : vector<1x256xf32> to vector<16x256xf32>
    %32 = arith.addf %30, %31 : vector<16x256xf32>
    %c0_i32 = arith.constant 0 : i32
    %33 = arith.cmpi eq, %arg1, %c0_i32 : i32
    %34 = arith.extui %33 : i1 to i32
    %c0_i32_16 = arith.constant 0 : i32
    %35 = arith.cmpi ne, %34, %c0_i32_16 : i32
    scf.if %35 {
      %cst_56 = arith.constant 0.000000e+00 : f32
      %105 = vector.broadcast %cst_56 : f32 to vector<16x256xf32>
      %c0_57 = arith.constant 0 : index
      %c0_58 = arith.constant 0 : index
      %106 = vector.load %arg12[%c0_57, %c0_58] : memref<16x256xf32, #tpu.memory_space<vmem>>, vector<16x256xf32>
      tpu.vector_store %arg12[%c0_57, %c0_58], %105 {strides = array<i32>} : memref<16x256xf32, #tpu.memory_space<vmem>>, vector<16x256xf32>,
    } else {
    }
    %c0_17 = arith.constant 0 : index
    %c0_18 = arith.constant 0 : index
    %36 = vector.load %arg12[%c0_17, %c0_18] : memref<16x256xf32, #tpu.memory_space<vmem>>, vector<16x256xf32>
    %c0_19 = arith.constant 0 : index
    %c0_20 = arith.constant 0 : index
    %37 = vector.load %arg12[%c0_19, %c0_20] : memref<16x256xf32, #tpu.memory_space<vmem>>, vector<16x256xf32>
    %38 = arith.subf %32, %37 : vector<16x256xf32>
    %cst_21 = arith.constant 5.000000e-01 : f32
    %39 = vector.broadcast %cst_21 : f32 to vector<16x256xf32>
    %40 = arith.mulf %38, %39 : vector<16x256xf32>
    %41 = arith.addf %36, %40 : vector<16x256xf32>
    %cst_22 = arith.constant 1.000000e+00 : f32
    %42 = vector.broadcast %cst_22 : f32 to vector<16x256xf32>
    %43 = arith.cmpf oge, %41, %42 : vector<16x256xf32>
    %cst_23 = arith.constant 0.000000e+00 : f32
    %44 = vector.broadcast %cst_23 : f32 to vector<16x256xf32>
    %45 = arith.select %43, %44, %41 : vector<16x256xi1>, vector<16x256xf32>
    %c0_24 = arith.constant 0 : index
    %c0_25 = arith.constant 0 : index
    %46 = vector.load %arg12[%c0_24, %c0_25] : memref<16x256xf32, #tpu.memory_space<vmem>>, vector<16x256xf32>
    tpu.vector_store %arg12[%c0_24, %c0_25], %45 {strides = array<i32>} : memref<16x256xf32, #tpu.memory_space<vmem>>, vector<16x256xf32>,
    %47 = arith.extui %43 : vector<16x256xi1> to vector<16x256xi32>
    %48 = arith.sitofp %47 : vector<16x256xi32> to vector<16x256xf32>
    %49 = arith.truncf %48 : vector<16x256xf32> to vector<16x256xbf16>
    %c0_26 = arith.constant 0 : index
    %c0_27 = arith.constant 0 : index
    %50 = vector.load %arg7[%c0_26, %c0_27] : memref<256x32xbf16, #tpu.memory_space<vmem>>, vector<256x32xbf16>
    %cst_28 = arith.constant dense<0.000000e+00> : vector<16x32xf32>
    %51 = tpu.matmul %49, %50, %cst_28 {dimension_numbers = #tpu.dot_dimension_numbers<[1], [0], [0], [1], [0, 0, 1, 1], [], []>} : vector<16x256xbf16>, vector<256x32xbf16>, vector<16x32xf32> -> vector<16x32xf32>
    %c0_29 = arith.constant 0 : index
    %c0_30 = arith.constant 0 : index
    %52 = vector.load %arg8[%c0_29, %c0_30] : memref<1x32xf32, #tpu.memory_space<vmem>>, vector<1x32xf32>
    %53 = vector.broadcast %52 : vector<1x32xf32> to vector<16x32xf32>
    %54 = arith.addf %51, %53 : vector<16x32xf32>
    %c0_31 = arith.constant 0 : index
    %c0_32 = arith.constant 0 : index
    %55 = vector.load %arg9[%c0_31, %c0_32] : memref<1x32xf32, #tpu.memory_space<vmem>>, vector<1x32xf32>
    %c0_33 = arith.constant 0 : index
    %c0_34 = arith.constant 0 : index
    %56 = vector.load %arg10[%c0_33, %c0_34] : memref<1x32xf32, #tpu.memory_space<vmem>>, vector<1x32xf32>
    %cst_35 = arith.constant dense<0.000000e+00> : vector<16xf32>
    %57 = vector.multi_reduction <add>, %54, %cst_35 [1] : vector<16x32xf32> to vector<16xf32>
    %58 = vector.shape_cast %57 : vector<16xf32> to vector<16x1xf32>
    %cst_36 = arith.constant 3.200000e+01 : f32
    %59 = vector.broadcast %cst_36 : f32 to vector<16x1xf32>
    %60 = arith.divf %58, %59 : vector<16x1xf32>
    %61 = arith.mulf %54, %54 : vector<16x32xf32>
    %cst_37 = arith.constant dense<0.000000e+00> : vector<16xf32>
    %62 = vector.multi_reduction <add>, %61, %cst_37 [1] : vector<16x32xf32> to vector<16xf32>
    %63 = vector.shape_cast %62 : vector<16xf32> to vector<16x1xf32>
    %cst_38 = arith.constant 3.200000e+01 : f32
    %64 = vector.broadcast %cst_38 : f32 to vector<16x1xf32>
    %65 = arith.divf %63, %64 : vector<16x1xf32>
    %66 = arith.mulf %60, %60 : vector<16x1xf32>
    %67 = arith.subf %65, %66 : vector<16x1xf32>
    %cst_39 = arith.constant 0.000000e+00 : f32
    %68 = vector.broadcast %cst_39 : f32 to vector<16x1xf32>
    %69 = arith.maximumf %67, %68 : vector<16x1xf32>
    %70 = vector.broadcast %60 : vector<16x1xf32> to vector<16x32xf32>
    %71 = arith.subf %54, %70 : vector<16x32xf32>
    %cst_40 = arith.constant 9.99999974E-6 : f32
    %72 = vector.broadcast %cst_40 : f32 to vector<16x1xf32>
    %73 = arith.addf %69, %72 : vector<16x1xf32>
    %74 = math.rsqrt %73 : vector<16x1xf32>
    %75 = vector.broadcast %74 : vector<16x1xf32> to vector<16x32xf32>
    %76 = arith.mulf %71, %75 : vector<16x32xf32>
    %77 = vector.broadcast %55 : vector<1x32xf32> to vector<16x32xf32>
    %78 = arith.mulf %76, %77 : vector<16x32xf32>
    %79 = vector.broadcast %56 : vector<1x32xf32> to vector<16x32xf32>
    %80 = arith.addf %78, %79 : vector<16x32xf32>
    %c0_i32_41 = arith.constant 0 : i32
    %81 = arith.cmpi eq, %arg1, %c0_i32_41 : i32
    %82 = arith.extui %81 : i1 to i32
    %c0_i32_42 = arith.constant 0 : i32
    %83 = arith.cmpi ne, %82, %c0_i32_42 : i32
    scf.if %83 {
      %cst_56 = arith.constant 0.000000e+00 : f32
      %105 = vector.broadcast %cst_56 : f32 to vector<16x32xf32>
      %c0_57 = arith.constant 0 : index
      %c0_58 = arith.constant 0 : index
      %106 = vector.load %arg13[%c0_57, %c0_58] : memref<16x32xf32, #tpu.memory_space<vmem>>, vector<16x32xf32>
      tpu.vector_store %arg13[%c0_57, %c0_58], %105 {strides = array<i32>} : memref<16x32xf32, #tpu.memory_space<vmem>>, vector<16x32xf32>,
    } else {
    }
    %c0_43 = arith.constant 0 : index
    %c0_44 = arith.constant 0 : index
    %84 = vector.load %arg13[%c0_43, %c0_44] : memref<16x32xf32, #tpu.memory_space<vmem>>, vector<16x32xf32>
    %c0_45 = arith.constant 0 : index
    %c0_46 = arith.constant 0 : index
    %85 = vector.load %arg13[%c0_45, %c0_46] : memref<16x32xf32, #tpu.memory_space<vmem>>, vector<16x32xf32>
    %86 = arith.subf %80, %85 : vector<16x32xf32>
    %cst_47 = arith.constant 5.000000e-01 : f32
    %87 = vector.broadcast %cst_47 : f32 to vector<16x32xf32>
    %88 = arith.mulf %86, %87 : vector<16x32xf32>
    %89 = arith.addf %84, %88 : vector<16x32xf32>
    %cst_48 = arith.constant 1.000000e+00 : f32
    %90 = vector.broadcast %cst_48 : f32 to vector<16x32xf32>
    %91 = arith.cmpf oge, %89, %90 : vector<16x32xf32>
    %cst_49 = arith.constant 0.000000e+00 : f32
    %92 = vector.broadcast %cst_49 : f32 to vector<16x32xf32>
    %93 = arith.select %91, %92, %89 : vector<16x32xi1>, vector<16x32xf32>
    %c0_50 = arith.constant 0 : index
    %c0_51 = arith.constant 0 : index
    %94 = vector.load %arg13[%c0_50, %c0_51] : memref<16x32xf32, #tpu.memory_space<vmem>>, vector<16x32xf32>
    tpu.vector_store %arg13[%c0_50, %c0_51], %93 {strides = array<i32>} : memref<16x32xf32, #tpu.memory_space<vmem>>, vector<16x32xf32>,
    %95 = arith.extui %91 : vector<16x32xi1> to vector<16x32xi32>
    %96 = arith.sitofp %95 : vector<16x32xi32> to vector<16x32xf32>
    %97 = arith.extf %1 : vector<16x32xbf16> to vector<16x32xf32>
    %98 = arith.addf %97, %96 : vector<16x32xf32>
    %c0_i32_52 = arith.constant 0 : i32
    %99 = arith.cmpi eq, %arg1, %c0_i32_52 : i32
    %100 = arith.extui %99 : i1 to i32
    %c0_i32_53 = arith.constant 0 : i32
    %101 = arith.cmpi ne, %100, %c0_i32_53 : i32
    scf.if %101 {
      %cst_56 = arith.constant 2.500000e-01 : f32
      %105 = vector.broadcast %cst_56 : f32 to vector<16x32xf32>
      %106 = arith.mulf %98, %105 : vector<16x32xf32>
      %c0_57 = arith.constant 0 : index
      %c0_58 = arith.constant 0 : index
      %107 = vector.load %arg11[%c0_57, %c0_58] : memref<16x32xf32, #tpu.memory_space<vmem>>, vector<16x32xf32>
      tpu.vector_store %arg11[%c0_57, %c0_58], %106 {strides = array<i32>} : memref<16x32xf32, #tpu.memory_space<vmem>>, vector<16x32xf32>,
    } else {
    }
    %c0_i32_54 = arith.constant 0 : i32
    %102 = arith.cmpi ne, %arg1, %c0_i32_54 : i32
    %103 = arith.extui %102 : i1 to i32
    %c0_i32_55 = arith.constant 0 : i32
    %104 = arith.cmpi ne, %103, %c0_i32_55 : i32
    scf.if %104 {
      %c0_56 = arith.constant 0 : index
      %c0_57 = arith.constant 0 : index
      %105 = vector.load %arg11[%c0_56, %c0_57] : memref<16x32xf32, #tpu.memory_space<vmem>>, vector<16x32xf32>
      %cst_58 = arith.constant 2.500000e-01 : f32
      %106 = vector.broadcast %cst_58 : f32 to vector<16x32xf32>
      %107 = arith.mulf %98, %106 : vector<16x32xf32>
      %108 = arith.addf %105, %107 : vector<16x32xf32>
      %c0_59 = arith.constant 0 : index
      %c0_60 = arith.constant 0 : index
      %109 = vector.load %arg11[%c0_59, %c0_60] : memref<16x32xf32, #tpu.memory_space<vmem>>, vector<16x32xf32>
      tpu.vector_store %arg11[%c0_59, %c0_60], %108 {strides = array<i32>} : memref<16x32xf32, #tpu.memory_space<vmem>>, vector<16x32xf32>,
    } else {
    }
    return
  }
  func.func @transform_0(%arg0: i32, %arg1: i32) -> (i32, i32, i32) {
    %c0_i32 = arith.constant 0 : i32
    %c0_i32_0 = arith.constant 0 : i32
    return %arg1, %arg0, %c0_i32 : i32, i32, i32
  }
  func.func @transform_1(%arg0: i32, %arg1: i32) -> (i32, i32) {
    %c0_i32 = arith.constant 0 : i32
    %c0_i32_0 = arith.constant 0 : i32
    %c0_i32_1 = arith.constant 0 : i32
    return %c0_i32, %c0_i32_0 : i32, i32
  }
  func.func @transform_2(%arg0: i32, %arg1: i32) -> (i32, i32) {
    %c0_i32 = arith.constant 0 : i32
    %c0_i32_0 = arith.constant 0 : i32
    %c0_i32_1 = arith.constant 0 : i32
    return %c0_i32, %c0_i32_0 : i32, i32
  }
  func.func @transform_3(%arg0: i32, %arg1: i32) -> (i32, i32) {
    %c0_i32 = arith.constant 0 : i32
    %c0_i32_0 = arith.constant 0 : i32
    %c0_i32_1 = arith.constant 0 : i32
    return %c0_i32, %c0_i32_0 : i32, i32
  }
  func.func @transform_4(%arg0: i32, %arg1: i32) -> (i32, i32) {
    %c0_i32 = arith.constant 0 : i32
    %c0_i32_0 = arith.constant 0 : i32
    %c0_i32_1 = arith.constant 0 : i32
    return %c0_i32, %c0_i32_0 : i32, i32
  }
  func.func @transform_5(%arg0: i32, %arg1: i32) -> (i32, i32) {
    %c0_i32 = arith.constant 0 : i32
    %c0_i32_0 = arith.constant 0 : i32
    %c0_i32_1 = arith.constant 0 : i32
    return %c0_i32, %c0_i32_0 : i32, i32
  }
  func.func @transform_6(%arg0: i32, %arg1: i32) -> (i32, i32) {
    %c0_i32 = arith.constant 0 : i32
    %c0_i32_0 = arith.constant 0 : i32
    %c0_i32_1 = arith.constant 0 : i32
    return %c0_i32, %c0_i32_0 : i32, i32
  }
  func.func @transform_7(%arg0: i32, %arg1: i32) -> (i32, i32) {
    %c0_i32 = arith.constant 0 : i32
    %c0_i32_0 = arith.constant 0 : i32
    %c0_i32_1 = arith.constant 0 : i32
    return %c0_i32, %c0_i32_0 : i32, i32
  }
  func.func @transform_8(%arg0: i32, %arg1: i32) -> (i32, i32) {
    %c0_i32 = arith.constant 0 : i32
    %c0_i32_0 = arith.constant 0 : i32
    %c0_i32_1 = arith.constant 0 : i32
    return %c0_i32, %c0_i32_0 : i32, i32
  }
  func.func @transform_9(%arg0: i32, %arg1: i32) -> (i32, i32) {
    %c0_i32 = arith.constant 0 : i32
    %c0_i32_0 = arith.constant 0 : i32
    return %arg0, %c0_i32 : i32, i32
  }
}

module attributes {stable_mosaic.version = 11 : i64} {
  func.func @_linear_kernel(%arg0: i32, %arg1: memref<8x32xf32, #tpu.memory_space<vmem>>, %arg2: memref<32x32xf32, #tpu.memory_space<vmem>>, %arg3: memref<1x32xf32, #tpu.memory_space<vmem>>, %arg4: memref<8x32xf32, #tpu.memory_space<vmem>>) attributes {dimension_semantics = [#tpu.dimension_semantics<parallel>], iteration_bounds = array<i64: 2>, scalar_prefetch = 0 : i64, scratch_operands = 0 : i64, tpu.core_type = #tpu.core_type<tc>, window_params = [{transform_indices = @transform_0, window_bounds = array<i64: 8, 32>}, {pipeline_mode = #tpu.pipeline_mode<synchronous>, transform_indices = @transform_1, window_bounds = array<i64: 32, 32>}, {pipeline_mode = #tpu.pipeline_mode<synchronous>, transform_indices = @transform_2, window_bounds = array<i64: 1, 32>}, {transform_indices = @transform_3, window_bounds = array<i64: 8, 32>}]} {
    %c0 = arith.constant 0 : index
    %c0_0 = arith.constant 0 : index
    %0 = vector.load %arg1[%c0, %c0_0] : memref<8x32xf32, #tpu.memory_space<vmem>>, vector<8x32xf32>
    %c0_1 = arith.constant 0 : index
    %c0_2 = arith.constant 0 : index
    %1 = vector.load %arg2[%c0_1, %c0_2] : memref<32x32xf32, #tpu.memory_space<vmem>>, vector<32x32xf32>
    %cst = arith.constant dense<0.000000e+00> : vector<8x32xf32>
    %2 = tpu.matmul %0, %1, %cst {dimension_numbers = #tpu.dot_dimension_numbers<[1], [0], [0], [1], [0, 0, 1, 1], [], []>} : vector<8x32xf32>, vector<32x32xf32>, vector<8x32xf32> -> vector<8x32xf32>
    %c0_3 = arith.constant 0 : index
    %c0_4 = arith.constant 0 : index
    %3 = vector.load %arg3[%c0_3, %c0_4] : memref<1x32xf32, #tpu.memory_space<vmem>>, vector<1x32xf32>
    %4 = vector.broadcast %3 : vector<1x32xf32> to vector<8x32xf32>
    %5 = arith.addf %2, %4 : vector<8x32xf32>
    %c0_5 = arith.constant 0 : index
    %c0_6 = arith.constant 0 : index
    %6 = vector.load %arg4[%c0_5, %c0_6] : memref<8x32xf32, #tpu.memory_space<vmem>>, vector<8x32xf32>
    tpu.vector_store %arg4[%c0_5, %c0_6], %5 {strides = array<i32>} : memref<8x32xf32, #tpu.memory_space<vmem>>, vector<8x32xf32>,
    return
  }
  func.func @transform_0(%arg0: i32) -> (i32, i32) {
    %c0_i32 = arith.constant 0 : i32
    %c0_i32_0 = arith.constant 0 : i32
    return %arg0, %c0_i32 : i32, i32
  }
  func.func @transform_1(%arg0: i32) -> (i32, i32) {
    %c0_i32 = arith.constant 0 : i32
    %c0_i32_0 = arith.constant 0 : i32
    %c0_i32_1 = arith.constant 0 : i32
    return %c0_i32, %c0_i32_0 : i32, i32
  }
  func.func @transform_2(%arg0: i32) -> (i32, i32) {
    %c0_i32 = arith.constant 0 : i32
    %c0_i32_0 = arith.constant 0 : i32
    %c0_i32_1 = arith.constant 0 : i32
    return %c0_i32, %c0_i32_0 : i32, i32
  }
  func.func @transform_3(%arg0: i32) -> (i32, i32) {
    %c0_i32 = arith.constant 0 : i32
    %c0_i32_0 = arith.constant 0 : i32
    return %arg0, %c0_i32 : i32, i32
  }
}

</mosaic_0001>

<bundles_post_ra>
// kernel: sfsrec_forward.6
= control target key start
LH: loop header
LB: loop body
LE: loop exit
PB: predicated region body
PF: predicated region fallthrough
CT: control target
= control target key end

     0   :  { %s474_s12 = smov 0   ;;  %s476_s13 = smov 0   ;;  %s535_s0 = inlined_call_operand.vmem [shape: f32[16,32], index: 0, kind: input, shape index: {}]   ;;  %s536_s1 = inlined_call_operand.vmem [shape: f32[1,32], index: 1, kind: input, shape index: {}]   ;;  %s537_s2 = inlined_call_operand.vmem [shape: f32[1,32], index: 2, kind: input, shape index: {}]   ;;  %s538_s3 = inlined_call_operand.vmem [shape: bf16[4,16,32], index: 3, kind: output, shape index: {}]  }
   0x1   :  { %s478_s14 = smov 0  }
   0x2 LB: > { %s22_s15 = sadd.s32 1, %s446_s13  ;;  %p382_p0 = scmp.ge.s32.totalorder %s450_s14, 1  ;;  %s450_s14 = sphi %s478_s14, %s13_s14   ;;  %s446_s13 = sphi %s476_s13, %s540_s13   ;;  %s442_s12 = sphi %s474_s12, %s539_s12  }
   0x3   : > { %p23_p1 = scmp.ge.s32.totalorder %s22_s15, 4  ;;  %p152_p2 = scmp.lt.s32.totalorder %s450_s14, 5 }
   0x5   : > { %s542_s15 = smov (%p23_p1, %s22_s15), 0  ;;  %p153_p3 = pnand %p382_p0, %p152_p2 }
   0x6   : > { %p187_p4 = scmp.lt.s32.totalorder (!%p153_p3), %s442_s12, 3  ;;  %p385_p5 = scmp.ne.s32.totalorder (!%p153_p3), %s442_s12, 0 }
   0x7   : > { %156 = sbr.rel (%p153_p3) target bundleno = 211 (0xd3), region = 32 }
   0xe   : > { %s188_s16 = scalar_select %p187_p4, %s442_s12, 3 }
   0xf   : > { %199 = sbr.rel (%p385_p5) target bundleno = 191 (0xbf), region = 36  ;;  %v200_v0 = vld [vmem:[%s535_s0] sm:$0xff] (!%p385_p5)  ;;  %vm204_vm0 = vcmask (!%p385_p5), 261120   ;;  %v201_v1 = vld [vmem:[%s535_s0 + $0x8] sm:$0xff] (!%p385_p5) }
  0x10   : > { %s395_s17 = sshll.u32 %s188_s16, 3  ;;  %v205_v2 = vsel (!%p385_p5), %vm204_vm0, %v200_v0, 0.0  ;;  %v214_v3 = vmul.f32 (!%p385_p5), %v200_v0, %v200_v0  ;;  %v215_v4 = vmul.f32 (!%p385_p5), %v201_v1, %v201_v1  ;;  %v208_v6 = vsel (!%p385_p5), %vm204_vm0, %v201_v1, 0.0  ;;  %v386_v26 = vld [vmem:[%s536_s1] ss:$0 sm:$0xff] (!%p385_p5) }
  0x11   : > { %s499_s20 = scalar_lea.vmem %s538_s3, %s395_s17  ;;  %206 = vadd.xlane.f32.xlu0 (!%p385_p5), %v205_v2  ;;  %v387_v28 = vld [vmem:[%s537_s2] ss:$0 sm:$0xff] (!%p385_p5) }
  0x12   : > { %v216_v5 = vsel (!%p385_p5), %vm204_vm0, %v214_v3, 0.0  ;;  %v219_v7 = vsel (!%p385_p5), %vm204_vm0, %v215_v4, 0.0 }
  0x13   : > { %217 = vadd.xlane.f32.xlu1 (!%p385_p5), %v216_v5 }
  0x15   : > { %209 = vadd.xlane.f32.xlu0 (!%p385_p5), %v208_v6 }
  0x17   : > { %220 = vadd.xlane.f32.xlu1 %v219_v7 }
  0x9e   : > { %v207_v8 = vpop.xlane.xlu0 %206 }
  0x9f   : > { %v212_v9 = vmul.f32 0.03125, %v207_v8 }
  0xa0   : > { %v218_v10 = vpop.xlane.xlu1 %217 }
  0xa1   : > { %v224_v11 = vmul.f32 %v212_v9, %v212_v9  ;;  %v222_v12 = vmul.f32 0.03125, %v218_v10  ;;  %v230_v24 = vsub.f32 %v200_v0, %v212_v9 }
  0xa2   : > { %v210_v13 = vpop.xlane.xlu0 %209 }
  0xa3   : > { %v226_v14 = vsub.f32 %v222_v12, %v224_v11  ;;  %v213_v15 = vmul.f32 0.03125, %v210_v13 }
  0xa4   : > { %v221_v16 = vpop.xlane.xlu1 %220 }
  0xa5   : > { %v228_v17 = vmax.f32 %v226_v14, 0.0  ;;  %v225_v18 = vmul.f32 %v213_v15, %v213_v15  ;;  %v223_v19 = vmul.f32 0.03125, %v221_v16  ;;  %v231_v30 = vsub.f32 %v201_v1, %v213_v15 }
  0xa7   : > { %v232_v20 = vadd.f32 1e-12, %v228_v17  ;;  %v227_v21 = vsub.f32 %v223_v19, %v225_v18 }
  0xa9   : > { %424 = vrsqrt.f32 %v232_v20  ;;  %v229_v22 = vmax.f32 %v227_v21, 0.0 }
  0xab   : > { %v233_v23 = vadd.f32 1e-12, %v229_v22 }
  0xad   : > { %426 = vrsqrt.f32 %v233_v23 }
  0xb3   : > { %v425_v25 = vpop.eup %424 }
  0xb4   : > { %v236_v27 = vmul.f32 %v425_v25, %v230_v24 }
  0xb6   : > { %v244_v29 = vmul.f32 %v386_v26, %v236_v27 }
  0xb7   : > { %v427_v31 = vpop.eup %426 }
  0xb8   : > { %v252_v32 = vadd.f32 %v387_v28, %v244_v29  ;;  %v237_v33 = vmul.f32 %v427_v31, %v231_v30 }
  0xba   : > { %254 = vst.msk [vmem:[#allocation2] sm:$0xff] %vm204_vm0, %v252_v32  ;;  %v245_v34 = vmul.f32 %v386_v26, %v237_v33 }
  0xbc   : > { %v253_v35 = vadd.f32 %v387_v28, %v245_v34 }
  0xbe   : > { %255 = vst.msk [vmem:[#allocation2 + $0x8] sm:$0xff] %vm204_vm0, %v253_v35 }
  0xbf PF: > { %260 = sbr.rel (%p385_p5) target bundleno = 198 (0xc6), region = 40  ;;  %vm261_vm1 = vcmask (!%p385_p5), 261120   ;;  %v452_v38 = vmov (!%p385_p5), 0.0  }
  0xc0   : > { %262 = vst.msk [vmem:[#allocation3] sm:$0xff] (!%p385_p5), %vm261_vm1, %v452_v38  ;;  %263 = vst.msk [vmem:[#allocation3 + $0x8] sm:$0xff] (!%p385_p5), %vm261_vm1, %v452_v38 }
  0xc1   : > { %v256_v36 = vld [vmem:[#allocation2] sm:$0xff] }
  0xc5   : > { %v257_v37 = vld [vmem:[#allocation2 + $0x8] sm:$0xff] }
  0xc6 PF: > { %vm276_vm2 = vcmask 261120   ;;  %vm291_vm5 = vcmask 257024   ;;  %v453_v49 = vmov 0.0  }
  0xc7   : > { %v264_v39 = vld [vmem:[#allocation3] sm:$0xff]  ;;  %v265_v40 = vld [vmem:[#allocation3 + $0x8] sm:$0xff] }
  0xc8   : > { %v266_v41 = vsub.f32 %v256_v36, %v264_v39  ;;  %v267_v42 = vsub.f32 %v257_v37, %v265_v40 }
  0xca   : > { %v268_v43 = vmul.f32 0.5, %v266_v41  ;;  %v269_v44 = vmul.f32 0.5, %v267_v42 }
  0xcc   : > { %v270_v45 = vadd.f32 %v268_v43, %v264_v39  ;;  %v271_v46 = vadd.f32 %v269_v44, %v265_v40 }
  0xce   : > { %vm272_vm3 = vcmp.ge.f32.partialorder %v270_v45, 1.0  ;;  %vm273_vm4 = vcmp.ge.f32.partialorder %v271_v46, 1.0 }
  0xcf   : > { %v274_v47 = vsel %vm272_vm3, 0.0, %v270_v45  ;;  %v275_v48 = vsel %vm273_vm4, 0.0, %v271_v46  ;;  %v389_v50 = vsel %vm272_vm3, 1.0, %v453_v49  ;;  %v390_v51 = vsel %vm273_vm4, 1.0, %v453_v49 }
  0xd0   : > { %277 = vst.msk [vmem:[#allocation3] sm:$0xff] %vm276_vm2, %v274_v47  ;;  %278 = vst.msk [vmem:[#allocation3 + $0x8] sm:$0xff] %vm276_vm2, %v275_v48  ;;  %v396_v52 = vpack.c.bf16 %v389_v50, %v389_v50  ;;  %v397_v53 = vpack.c.bf16 %v390_v51, %v390_v51 }
  0xd2   : > { %292 = vst.msk [vmem:[%s499_s20] sm:$0xf] %vm291_vm5, %v396_v52  ;;  %293 = vst.msk [vmem:[%s499_s20 + $0x4] sm:$0xf] %vm291_vm5, %v397_v53 }
  0xd3 PF: > { %s13_s14 = sadd.s32 1, %s450_s14   ;;  %s539_s12 = smov %s446_s13 }
  0xd4   : > { %p10_p6 = scmp.ge.s32.totalorder %s13_s14, 6   ;;  %s540_s13 = smov %s542_s15 }
  0xd6   :  { %12 = sbr.rel (!%p10_p6) target bundleno = 2 (0x2), region = 70 }

// kernel: sfsrec_forward.8
= control target key start
LH: loop header
LB: loop body
LE: loop exit
PB: predicated region body
PF: predicated region fallthrough
CT: control target
= control target key end

     0   :  { %s1148_s30 = smov 0   ;;  %s1150_s10 = smov 0   ;;  %s1288_s0 = inlined_call_operand.vmem [shape: bf16[4,16,32], index: 0, kind: input, shape index: {}]   ;;  %s1289_s1 = inlined_call_operand.vmem [shape: bf16[32,256], index: 1, kind: input, shape index: {}]   ;;  %s1290_s2 = inlined_call_operand.vmem [shape: f32[1,256], index: 2, kind: input, shape index: {}]   ;;  %s1291_s3 = inlined_call_operand.vmem [shape: f32[1,256], index: 3, kind: input, shape index: {}]   ;;  %s1292_s4 = inlined_call_operand.vmem [shape: f32[1,256], index: 4, kind: input, shape index: {}]   ;;  %s1293_s5 = inlined_call_operand.vmem [shape: bf16[256,32], index: 5, kind: input, shape index: {}]   ;;  %s1294_s6 = inlined_call_operand.vmem [shape: f32[1,32], index: 6, kind: input, shape index: {}]   ;;  %s1295_s7 = inlined_call_operand.vmem [shape: f32[1,32], index: 7, kind: input, shape index: {}]   ;;  %s1296_s8 = inlined_call_operand.vmem [shape: f32[1,32], index: 8, kind: input, shape index: {}]   ;;  %s1297_s9 = inlined_call_operand.vmem [shape: bf16[4,16,32], index: 9, kind: output, shape index: {}]  }
   0x1   :  { %s1152_s11 = smov 0  }
   0x2 LB: > { %s28_s12 = sadd.s32 1, %s1087_s10  ;;  %p936_p0 = scmp.ge.s32.totalorder %s1091_s11, 1  ;;  %s1091_s11 = sphi %s1152_s11, %s19_s11   ;;  %s1087_s10 = sphi %s1150_s10, %s1299_s10   ;;  %s1083_s30 = sphi %s1148_s30, %s1298_s30  }
   0x3   : > { %p29_p1 = scmp.ge.s32.totalorder %s28_s12, 4  ;;  %p308_p2 = scmp.lt.s32.totalorder %s1091_s11, 5 }
   0x5   : > { %s1301_s12 = smov (%p29_p1, %s28_s12), 0  ;;  %p309_p3 = pnand %p936_p0, %p308_p2 }
   0x6   : > { %v1037_v0 = vld [vmem:[%s1289_s1 + $0x4] ss:$8 sps:$4 sm:$0xff] (!%p309_p3)   ;;  %p353_p4 = scmp.lt.s32.totalorder (!%p309_p3), %s1083_s30, 3  ;;  %v1039_v1 = vld [vmem:[%s1289_s1] ss:$8 sps:$4 sm:$0xff] (!%p309_p3)   ;;  %v1093_v2 = vmov (!%p309_p3), 0   ;;  %v381_v6 = vlaneseq (!%p309_p3) }
   0x7   : > { %312 = sbr.rel (%p309_p3) target bundleno = 845 (0x34d), region = 56  ;;  %452 = vmatprep.mubr.bf16.mxu0 (!%p309_p3), %v1093_v2  ;;  %420 = vmatprep.subr.bf16.mxu0 (!%p309_p3), %v1037_v0  ;;  %v1040_v3 = vld [vmem:[%s1289_s1 + $0x14] ss:$8 sps:$4 sm:$0xff] (!%p309_p3)   ;;  %v1042_v4 = vld [vmem:[%s1289_s1 + $0x10] ss:$8 sps:$4 sm:$0xff] (!%p309_p3)   ;;  %vm416_vm0 = vcmask (!%p309_p3), 261120  }
   0x8   : > { %421 = vmatpush1.bf16.msra.mxu0 (!%p309_p3), %v1039_v1  ;;  %v382_v7 = vshrl.u32 (!%p309_p3), %v381_v6, 7  ;;  %v379_v9 = vld [vmem:[%s1290_s2] sm:$0x3] (!%p309_p3)  ;;  %p947_p5 = scmp.ne.s32.totalorder (!%p309_p3), %s1083_s30, 0 }
   0x9   : > { %422 = vmatprep.subr.bf16.mxu0 (!%p309_p3), %v1040_v3  ;;  %v463_v45 = vld [vmem:[%s1291_s3] sm:$0x3] (!%p309_p3) }
   0xa   : > { %v383_v8 = vsub.s32 (!%p309_p3), 0, %v382_v7  ;;  %v387_v10 = vsub.s32 (!%p309_p3), 1, %v382_v7  ;;  %v464_v46 = vld [vmem:[%s1292_s4] sm:$0x3] (!%p309_p3) }
   0xc   : > { %423 = vmatpush1.bf16.msra.mxu0 (!%p309_p3), %v1042_v4  ;;  %v384_v11 = vrot.slane (!%p309_p3), %v379_v9, %v383_v8  ;;  %v388_v12 = vrot.slane (!%p309_p3), %v379_v9, %v387_v10  ;;  %v508_v47 = vrot.slane (!%p309_p3), %v463_v45, %v383_v8  ;;  %v512_v48 = vrot.slane (!%p309_p3), %v463_v45, %v387_v10 }
   0xd   : > { %v523_v52 = vrot.slane (!%p309_p3), %v464_v46, %v383_v8  ;;  %v527_v53 = vrot.slane (!%p309_p3), %v464_v46, %v387_v10 }
   0xe   : > { %s354_s19 = scalar_select %p353_p4, %s1083_s30, 3 }
   0xf   : > { %v1094_v6 = vmov (!%p947_p5), 0.0  }
  0x10   : > { %s982_s22 = sshll.u32 %s354_s19, 3  ;;  %538 = vst [vmem:[#allocation2] sm:$0xff] (!%p947_p5), %v1094_v6  ;;  %539 = vst [vmem:[#allocation2 + $0x8] sm:$0xff] (!%p947_p5), %v1094_v6 }
  0x11   : > { %s360_s25 = scalar_lea.vmem %s1288_s0, %s982_s22  ;;  %s1188_s28 = scalar_lea.vmem %s1297_s9, %s982_s22  ;;  %540 = vst [vmem:[#allocation2 + $0x10] sm:$0xff] (!%p947_p5), %v1094_v6  ;;  %541 = vst [vmem:[#allocation2 + $0x18] sm:$0xff] (!%p947_p5), %v1094_v6 }
  0x12   : > { %v1190_v5 = vld [vmem:[%s360_s25] sm:$0xff]  }
  0x13   : > { %946 = vmatmul.mubr.msk.bf16.vlgmr.msra.gmra.mrb[0].mxu0 %vm416_vm0, %v1190_v5 }
  0xe6   : > { %v454_v13 = vpop.f32.mrb[0].mxu0 }
  0xe7   : > { %v455_v14 = vadd.f32 %v454_v13, %v384_v11  ;;  %v456_v15 = vpop.f32.mrb[1].mxu0 }
  0xe8   : > { %v457_v16 = vadd.f32 %v456_v15, %v388_v12  ;;  %v458_v17 = vpop.f32.mrb[2].mxu0 }
  0xe9   : > { %v459_v18 = vadd.f32 %v458_v17, %v384_v11  ;;  %v460_v19 = vpop.f32.mrb[3].mxu0  ;;  %v474_v20 = vmul.f32 %v455_v14, %v455_v14 }
  0xea   : > { %v461_v21 = vadd.f32 %v460_v19, %v388_v12  ;;  %v465_v22 = vadd.f32 %v457_v16, %v455_v14  ;;  %v475_v23 = vmul.f32 %v457_v16, %v457_v16 }
  0xeb   : > { %v476_v25 = vmul.f32 %v459_v18, %v459_v18 }
  0xec   : > { %466 = vadd.xlane.f32.xlu0 %v465_v22  ;;  %v478_v24 = vadd.f32 %v475_v23, %v474_v20  ;;  %v477_v26 = vmul.f32 %v461_v21, %v461_v21  ;;  %v468_v27 = vadd.f32 %v461_v21, %v459_v18 }
  0xee   : > { %479 = vadd.xlane.f32.xlu1 %v478_v24  ;;  %v481_v28 = vadd.f32 %v477_v26, %v476_v25 }
  0xf0   : > { %469 = vadd.xlane.f32.xlu0 %v468_v27 }
  0xf2   : > { %482 = vadd.xlane.f32.xlu1 %v481_v28 }
 0x179   : > { %v467_v29 = vpop.xlane.xlu0 %466 }
 0x17a   : > { %v472_v30 = vmul.f32 0.00390625, %v467_v29 }
 0x17b   : > { %v480_v31 = vpop.xlane.xlu1 %479 }
 0x17c   : > { %v484_v32 = vmul.f32 0.00390625, %v480_v31  ;;  %v486_v33 = vmul.f32 %v472_v30, %v472_v30  ;;  %v492_v49 = vsub.f32 %v455_v14, %v472_v30  ;;  %v493_v50 = vsub.f32 %v457_v16, %v472_v30 }
 0x17d   : > { %v470_v34 = vpop.xlane.xlu0 %469 }
 0x17e   : > { %v488_v35 = vsub.f32 %v484_v32, %v486_v33  ;;  %v473_v36 = vmul.f32 0.00390625, %v470_v34 }
 0x17f   : > { %v483_v37 = vpop.xlane.xlu1 %482 }
 0x180   : > { %v490_v38 = vmax.f32 %v488_v35, 0.0  ;;  %v485_v39 = vmul.f32 0.00390625, %v483_v37  ;;  %v487_v40 = vmul.f32 %v473_v36, %v473_v36  ;;  %v494_v58 = vsub.f32 %v459_v18, %v473_v36 }
 0x181   : > { %v495_v59 = vsub.f32 %v461_v21, %v473_v36 }
 0x182   : > { %v496_v41 = vadd.f32 1e-05, %v490_v38  ;;  %v489_v42 = vsub.f32 %v485_v39, %v487_v40 }
 0x184   : > { %1045 = vrsqrt.f32 %v496_v41  ;;  %v491_v43 = vmax.f32 %v489_v42, 0.0 }
 0x186   : > { %v497_v44 = vadd.f32 1e-05, %v491_v43 }
 0x188   : > { %1047 = vrsqrt.f32 %v497_v44 }
 0x18e   : > { %v1046_v51 = vpop.eup %1045 }
 0x18f   : > { %v500_v54 = vmul.f32 %v1046_v51, %v492_v49  ;;  %v501_v55 = vmul.f32 %v1046_v51, %v493_v50 }
 0x191   : > { %v515_v56 = vmul.f32 %v508_v47, %v500_v54  ;;  %v516_v57 = vmul.f32 %v512_v48, %v501_v55  ;;  %537 = sbr.rel (%p947_p5) target bundleno = 408 (0x198), region = 60 }
 0x192   : > { %v1048_v60 = vpop.eup %1047 }
 0x193   : > { %v530_v61 = vadd.f32 %v523_v52, %v515_v56  ;;  %v531_v62 = vadd.f32 %v527_v53, %v516_v57  ;;  %v502_v63 = vmul.f32 %v1048_v60, %v494_v58  ;;  %v503_v0 = vmul.f32 %v1048_v60, %v495_v59 }
 0x195   : > { %v517_v1 = vmul.f32 %v508_v47, %v502_v63  ;;  %v518_v2 = vmul.f32 %v512_v48, %v503_v0 }
 0x197   : > { %v532_v3 = vadd.f32 %v523_v52, %v517_v1  ;;  %v533_v4 = vadd.f32 %v527_v53, %v518_v2 }
 0x198 PF: > { %v1049_v7 = vld [vmem:[%s1293_s5 + $0x40] sm:$0xff]   ;;  %v1051_v9 = vld [vmem:[%s1293_s5 + $0x48] sm:$0xff]   ;;  %v1053_v11 = vld [vmem:[%s1293_s5 + $0x50] sm:$0xff]   ;;  %v1095_v41 = vmov 1.0|1.0  }
 0x199   : > { %v1050_v8 = vld [vmem:[%s1293_s5] sm:$0xff]   ;;  %986 = vmatprep.subr.bf16.mxu1 %v1049_v7  ;;  %v1052_v10 = vld [vmem:[%s1293_s5 + $0x8] sm:$0xff]   ;;  %v1054_v12 = vld [vmem:[%s1293_s5 + $0x10] sm:$0xff]  }
 0x19a   : > { %987 = vmatpush3.bf16.msra.mxu1 %v1050_v8  ;;  %v1055_v13 = vld [vmem:[%s1293_s5 + $0x58] sm:$0xff]   ;;  %v1057_v15 = vld [vmem:[%s1293_s5 + $0x60] sm:$0xff]   ;;  %v1059_v17 = vld [vmem:[%s1293_s5 + $0x68] sm:$0xff]  }
 0x19b   : > { %988 = vmatprep.subr.bf16.mxu1 %v1051_v9  ;;  %v1056_v14 = vld [vmem:[%s1293_s5 + $0x18] sm:$0xff]   ;;  %v1058_v16 = vld [vmem:[%s1293_s5 + $0x20] sm:$0xff]   ;;  %v543_v18 = vld [vmem:[#allocation2 + $0x8] sm:$0xff] }
 0x19c   : > { %v545_v19 = vld [vmem:[#allocation2 + $0x18] sm:$0xff]  ;;  %v542_v20 = vld [vmem:[#allocation2] sm:$0xff]  ;;  %v547_v21 = vsub.f32 %v531_v62, %v543_v18  ;;  %v544_v23 = vld [vmem:[#allocation2 + $0x10] sm:$0xff] }
 0x19d   : > { %v549_v22 = vsub.f32 %v533_v4, %v545_v19  ;;  %v546_v24 = vsub.f32 %v530_v61, %v542_v20  ;;  %v548_v25 = vsub.f32 %v532_v3, %v544_v23  ;;  %v1060_v26 = vld [vmem:[%s1293_s5 + $0x28] sm:$0xff]   ;;  %v1061_v30 = vld [vmem:[%s1293_s5 + $0x70] sm:$0xff]   ;;  %v1063_v37 = vld [vmem:[%s1293_s5 + $0x78] sm:$0xff]  }
 0x19e   : > { %989 = vmatpush3.bf16.msra.mxu1 %v1052_v10  ;;  %v551_v27 = vmul.f32 0.5, %v547_v21  ;;  %v1062_v36 = vld [vmem:[%s1293_s5 + $0x30] sm:$0xff]   ;;  %v1064_v43 = vld [vmem:[%s1293_s5 + $0x38] sm:$0xff]   ;;  %v952_v45 = vld [vmem:[%s1294_s6] ss:$0 sm:$0xff] }
 0x19f   : > { %990 = vmatprep.subr.bf16.mxu1 %v1053_v11  ;;  %v553_v28 = vmul.f32 0.5, %v549_v22  ;;  %v550_v29 = vmul.f32 0.5, %v546_v24  ;;  %v552_v31 = vmul.f32 0.5, %v548_v25  ;;  %v1096_v24 = vmov (!%p947_p5), 0.0  }
 0x1a0   : > { %v555_v32 = vadd.f32 %v551_v27, %v543_v18  ;;  %810 = vst.msk [vmem:[#allocation3] sm:$0xff] (!%p947_p5), %vm416_vm0, %v1096_v24  ;;  %811 = vst.msk [vmem:[#allocation3 + $0x8] sm:$0xff] (!%p947_p5), %vm416_vm0, %v1096_v24 }
 0x1a1   : > { %v557_v33 = vadd.f32 %v553_v28, %v545_v19  ;;  %v554_v34 = vadd.f32 %v550_v29, %v542_v20  ;;  %v556_v35 = vadd.f32 %v552_v31, %v544_v23 }
 0x1a2   : > { %991 = vmatpush3.bf16.msra.mxu1 %v1054_v12  ;;  %vm559_vm1 = vcmp.ge.f32.partialorder %v555_v32, 1.0 }
 0x1a3   : > { %992 = vmatprep.subr.bf16.mxu1 %v1055_v13  ;;  %vm561_vm2 = vcmp.ge.f32.partialorder %v557_v33, 1.0  ;;  %vm558_vm3 = vcmp.ge.f32.partialorder %v554_v34, 1.0  ;;  %v563_v38 = vsel %vm559_vm1, 0.0, %v555_v32  ;;  %vm560_vm5 = vcmp.ge.f32.partialorder %v556_v35, 1.0 }
 0x1a4   : > { %v565_v39 = vsel %vm561_vm2, 0.0, %v557_v33  ;;  %vm969_vm4 = vmpackc.low %vm561_vm2, %vm559_vm1  ;;  %v562_v40 = vsel %vm558_vm3, 0.0, %v554_v34  ;;  %567 = vst [vmem:[#allocation2 + $0x8] sm:$0xff] %v563_v38  ;;  %v564_v42 = vsel %vm560_vm5, 0.0, %v556_v35 }
 0x1a5   : > { %569 = vst [vmem:[#allocation2 + $0x18] sm:$0xff] %v565_v39  ;;  %970 = vmatprep.mubr.msk.bf16.mxu1 %vm969_vm4, %v1095_v41  ;;  %566 = vst [vmem:[#allocation2] sm:$0xff] %v562_v40 }
 0x1a6   : > { %993 = vmatpush3.bf16.msra.mxu1 %v1056_v14  ;;  %568 = vst [vmem:[#allocation2 + $0x10] sm:$0xff] %v564_v42  ;;  %vm971_vm6 = vmpackc.low %vm560_vm5, %vm558_vm3  ;;  %v973_v14 = vld [vmem:[%s1295_s7] ss:$0 sm:$0xff] }
 0x1a7   : > { %994 = vmatprep.subr.bf16.mxu1 %v1057_v15 }
 0x1aa   : > { %995 = vmatpush3.bf16.msra.mxu1 %v1058_v16  ;;  %v974_v16 = vld [vmem:[%s1296_s8] ss:$0 sm:$0xff] }
 0x1ab   : > { %996 = vmatprep.subr.bf16.mxu1 %v1059_v17 }
 0x1ae   : > { %997 = vmatpush3.bf16.msra.mxu1 %v1060_v26 }
 0x1af   : > { %998 = vmatprep.subr.bf16.mxu1 %v1061_v30 }
 0x1b2   : > { %999 = vmatpush3.bf16.msra.mxu1 %v1062_v36 }
 0x1b3   : > { %1000 = vmatprep.subr.bf16.mxu1 %v1063_v37 }
 0x1b6   : > { %1001 = vmatpush3.bf16.msra.mxu1 %v1064_v43 }
 0x1b9   : > { %972 = vmatmul.mubr.msk.bf16.vlgmr.msra.gmra.mrb[0].mxu1 %vm971_vm6, %v1095_v41 }
 0x28c   : > { %v1002_v44 = vpop.f32.mrb[0].mxu1 }
 0x28d   : > { %v1003_v46 = vpop.f32.mrb[1].mxu1 }
 0x28e   : > { %v1004_v47 = vadd.f32 %v1003_v46, %v1002_v44  ;;  %v1005_v48 = vpop.f32.mrb[2].mxu1 }
 0x28f   : > { %v1006_v49 = vpop.f32.mrb[3].mxu1 }
 0x290   : > { %v750_v50 = vadd.f32 %v1004_v47, %v952_v45  ;;  %v1007_v51 = vadd.f32 %v1006_v49, %v1005_v48 }
 0x292   : > { %v753_v52 = vadd.f32 %v1007_v51, %v952_v45  ;;  %v758_v53 = vsel %vm416_vm0, %v750_v50, 0.0  ;;  %v767_v54 = vmul.f32 %v750_v50, %v750_v50 }
 0x293   : > { %759 = vadd.xlane.f32.xlu0 %v758_v53 }
 0x294   : > { %v769_v55 = vsel %vm416_vm0, %v767_v54, 0.0  ;;  %v768_v56 = vmul.f32 %v753_v52, %v753_v52  ;;  %v761_v57 = vsel %vm416_vm0, %v753_v52, 0.0 }
 0x295   : > { %770 = vadd.xlane.f32.xlu1 %v769_v55 }
 0x296   : > { %v772_v58 = vsel %vm416_vm0, %v768_v56, 0.0 }
 0x297   : > { %762 = vadd.xlane.f32.xlu0 %v761_v57 }
 0x299   : > { %773 = vadd.xlane.f32.xlu1 %v772_v58 }
 0x320   : > { %v760_v59 = vpop.xlane.xlu0 %759 }
 0x321   : > { %v765_v60 = vmul.f32 0.03125, %v760_v59 }
 0x322   : > { %v771_v61 = vpop.xlane.xlu1 %770 }
 0x323   : > { %v777_v62 = vmul.f32 %v765_v60, %v765_v60  ;;  %v775_v63 = vmul.f32 0.03125, %v771_v61  ;;  %v783_v12 = vsub.f32 %v750_v50, %v765_v60 }
 0x324   : > { %v763_v0 = vpop.xlane.xlu0 %762 }
 0x325   : > { %v779_v1 = vsub.f32 %v775_v63, %v777_v62  ;;  %v766_v2 = vmul.f32 0.03125, %v763_v0 }
 0x326   : > { %v774_v3 = vpop.xlane.xlu1 %773 }
 0x327   : > { %v781_v4 = vmax.f32 %v779_v1, 0.0  ;;  %v778_v6 = vmul.f32 %v766_v2, %v766_v2  ;;  %v776_v7 = vmul.f32 0.03125, %v774_v3  ;;  %v784_v18 = vsub.f32 %v753_v52, %v766_v2 }
 0x329   : > { %v785_v8 = vadd.f32 1e-05, %v781_v4  ;;  %v780_v9 = vsub.f32 %v776_v7, %v778_v6 }
 0x32b   : > { %1065 = vrsqrt.f32 %v785_v8  ;;  %v782_v10 = vmax.f32 %v780_v9, 0.0 }
 0x32d   : > { %v786_v11 = vadd.f32 1e-05, %v782_v10 }
 0x32f   : > { %1067 = vrsqrt.f32 %v786_v11 }
 0x335   : > { %v1066_v13 = vpop.eup %1065 }
 0x336   : > { %v789_v15 = vmul.f32 %v1066_v13, %v783_v12 }
 0x338   : > { %v797_v17 = vmul.f32 %v973_v14, %v789_v15  ;;  %809 = sbr.rel (%p947_p5) target bundleno = 831 (0x33f), region = 64 }
 0x339   : > { %v1068_v19 = vpop.eup %1067 }
 0x33a   : > { %v805_v20 = vadd.f32 %v974_v16, %v797_v17  ;;  %v790_v21 = vmul.f32 %v1068_v19, %v784_v18 }
 0x33c   : > { %v798_v22 = vmul.f32 %v973_v14, %v790_v21 }
 0x33e   : > { %v806_v23 = vadd.f32 %v974_v16, %v798_v22 }
 0x33f PF: > { %v812_v25 = vld [vmem:[#allocation3] sm:$0xff]  ;;  %v813_v26 = vld [vmem:[#allocation3 + $0x8] sm:$0xff]  ;;  %v830_v33 = vunpack.c.l.bf16 %v1190_v5  ;;  %v831_v34 = vunpack.c.h.bf16 %v1190_v5  ;;  %v1097_v36 = vmov 0.0   ;;  %vm842_vm9 = vcmask 257024  }
 0x340   : > { %v814_v27 = vsub.f32 %v805_v20, %v812_v25  ;;  %v815_v28 = vsub.f32 %v806_v23, %v813_v26 }
 0x342   : > { %v816_v29 = vmul.f32 0.5, %v814_v27  ;;  %v817_v30 = vmul.f32 0.5, %v815_v28 }
 0x344   : > { %v818_v31 = vadd.f32 %v816_v29, %v812_v25  ;;  %v819_v32 = vadd.f32 %v817_v30, %v813_v26 }
 0x346   : > { %vm820_vm7 = vcmp.ge.f32.partialorder %v818_v31, 1.0  ;;  %vm821_vm8 = vcmp.ge.f32.partialorder %v819_v32, 1.0 }
 0x347   : > { %v822_v35 = vsel %vm820_vm7, 0.0, %v818_v31  ;;  %v976_v37 = vsel %vm820_vm7, 1.0, %v1097_v36  ;;  %v823_v38 = vsel %vm821_vm8, 0.0, %v819_v32  ;;  %v977_v39 = vsel %vm821_vm8, 1.0, %v1097_v36 }
 0x348   : > { %824 = vst.msk [vmem:[#allocation3] sm:$0xff] %vm416_vm0, %v822_v35  ;;  %825 = vst.msk [vmem:[#allocation3 + $0x8] sm:$0xff] %vm416_vm0, %v823_v38  ;;  %v832_v40 = vadd.f32 %v976_v37, %v830_v33  ;;  %v833_v41 = vadd.f32 %v977_v39, %v831_v34 }
 0x34a   : > { %v984_v42 = vpack.c.bf16 %v832_v40, %v832_v40  ;;  %v985_v43 = vpack.c.bf16 %v833_v41, %v833_v41 }
 0x34c   : > { %843 = vst.msk [vmem:[%s1188_s28] sm:$0xf] %vm842_vm9, %v984_v42  ;;  %844 = vst.msk [vmem:[%s1188_s28 + $0x4] sm:$0xf] %vm842_vm9, %v985_v43 }
 0x34d PF: > { %s19_s11 = sadd.s32 1, %s1091_s11   ;;  %s1298_s30 = smov %s1087_s10 }
 0x34e   : > { %p16_p6 = scmp.ge.s32.totalorder %s19_s11, 6   ;;  %s1299_s10 = smov %s1301_s12 }
 0x350   :  { %18 = sbr.rel (!%p16_p6) target bundleno = 2 (0x2), region = 94 }

// kernel: sfsrec_forward.7
= control target key start
LH: loop header
LB: loop body
LE: loop exit
PB: predicated region body
PF: predicated region fallthrough
CT: control target
= control target key end

     0   :  { %s1168_s30 = smov 0   ;;  %s1170_s10 = smov 0   ;;  %s1359_s0 = inlined_call_operand.vmem [shape: bf16[4,2,8,32], index: 0, kind: input, shape index: {}]   ;;  %s1360_s1 = inlined_call_operand.vmem [shape: bf16[32,96], index: 1, kind: input, shape index: {}]   ;;  %s1361_s2 = inlined_call_operand.vmem [shape: f32[1,96], index: 2, kind: input, shape index: {}]   ;;  %s1362_s3 = inlined_call_operand.vmem [shape: f32[1,96], index: 3, kind: input, shape index: {}]   ;;  %s1363_s4 = inlined_call_operand.vmem [shape: f32[32,32], index: 4, kind: input, shape index: {}]   ;;  %s1364_s5 = inlined_call_operand.vmem [shape: bf16[32,32], index: 5, kind: input, shape index: {}]   ;;  %s1365_s6 = inlined_call_operand.vmem [shape: f32[1,32], index: 6, kind: input, shape index: {}]   ;;  %s1366_s7 = inlined_call_operand.vmem [shape: f32[1,32], index: 7, kind: input, shape index: {}]   ;;  %s1367_s8 = inlined_call_operand.vmem [shape: f32[1,32], index: 8, kind: input, shape index: {}]   ;;  %s1368_s9 = inlined_call_operand.vmem [shape: bf16[4,2,8,32], index: 9, kind: output, shape index: {}]  }
   0x1   :  { %s1172_s11 = smov 0   ;;  %s1174_s12 = smov 0  }
   0x2   :  { %s1176_s13 = smov 0  }
   0x3 LB: > { %s28_s14 = sadd.s32 1, %s1098_s11  ;;  %s31_s15 = sadd.s32 1, %s1102_s12  ;;  %s1106_s13 = sphi %s1176_s13, %s19_s13   ;;  %s1102_s12 = sphi %s1174_s12, %s1372_s12   ;;  %s1098_s11 = sphi %s1172_s11, %s1371_s11   ;;  %s1094_s10 = sphi %s1170_s10, %s1370_s10   ;;  %s1090_s30 = sphi %s1168_s30, %s1369_s30  }
   0x4   : > { %p29_p0 = scmp.ge.s32.totalorder %s28_s14, 4  ;;  %p932_p1 = scmp.ge.s32.totalorder %s1106_s13, 1 }
   0x5   : > { %p306_p2 = scmp.lt.s32.totalorder %s1106_s13, 9 }
   0x6   : > { %s1374_s14 = smov (%p29_p0, %s28_s14), 0  ;;  %s1376_s15 = smov (!%p29_p0, %s31_s15), %s1102_s12 }
   0x7   : > { %p307_p3 = pnand %p932_p1, %p306_p2  ;;  %p33_p4 = scmp.ge.s32.totalorder %s1376_s15, 2 }
   0x8   : > { %v1056_v0 = vld [vmem:[%s1360_s1] sm:$0xff] (!%p307_p3)   ;;  %v1108_v1 = vmov (!%p307_p3), 0.0   ;;  %v1057_v2 = vld [vmem:[%s1360_s1 + $0x8] sm:$0xff] (!%p307_p3)   ;;  %vm1109_vm0 = vmmov (!%p307_p3), 0   ;;  %p348_p5 = scmp.lt.s32.totalorder (!%p307_p3), %s1090_s30, 3  ;;  %p350_p6 = scmp.lt.s32.totalorder (!%p307_p3), %s1094_s10, 1 }
   0x9   : > { %s1378_s15 = smov (%p33_p4, %s1376_s15), 0  ;;  %310 = sbr.rel (%p307_p3) target bundleno = 2170 (0x87a), region = 56 }
   0xa   : > { %975 = vmatprep.subr.bf16.mxu0 (!%p307_p3), %v1108_v1  ;;  %979 = vmatprep.mubr.msk.bf16.mxu0 (!%p307_p3), %vm1109_vm0, %v1108_v1  ;;  %vm382_vm1 = vcmask (!%p307_p3), 261120   ;;  %v1238_v21 = vld [vmem:[%s1361_s2] ss:$0 sm:$0xff] (!%p307_p3)  ;;  %p942_p7 = scmp.ne.s32.totalorder (!%p307_p3), %s1090_s30, 0 }
   0xb   : > { %976 = vmatpush3.bf16.msra.mxu0 (!%p307_p3), %v1056_v0  ;;  %v1243_v23 = vld [vmem:[%s1362_s3] ss:$0 sm:$0xff] (!%p307_p3) }
   0xc   : > { %977 = vmatprep.subr.bf16.mxu0 (!%p307_p3), %v1108_v1 }
   0xf   : > { %978 = vmatpush3.bf16.msra.mxu0 (!%p307_p3), %v1057_v2 }
  0x10   : > { %s349_s20 = scalar_select %p348_p5, %s1090_s30, 3 }
  0x11   : > { %s1380_s10 = smov (!%p350_p6, %s1094_s10), 1  ;;  %v1110_v26 = vmov (!%p942_p7), 0.0  }
  0x12   : > { %s933_s21 = sshll.u32 %s349_s20, 1  ;;  %463 = vst.msk [vmem:[#allocation2] sm:$0xff] (!%p942_p7), %vm382_vm1, %v1110_v26 }
  0x13   : > { %s353_s22 = sadd.s32 %s933_s21, %s1380_s10 }
  0x14   : > { %s934_s23 = sshll.u32 %s353_s22, 2 }
  0x15   : > { %s355_s26 = scalar_lea.vmem %s1359_s0, %s934_s23  ;;  %s1218_s29 = scalar_lea.vmem %s1368_s9, %s934_s23 }
  0x16   : > { %v1220_v3 = vld [vmem:[%s355_s26] sm:$0xf] }
  0x17   : > { %980 = vmatmul.mubr.msk.bf16.vlgmr.msra.gmra.mrb[0].mxu0 %vm382_vm1, %v1220_v3 }
  0xea   : > { %v1224_v4 = vpop.f32.mrb[0].mxu0 }
  0xeb   : > { %v981_v5 = vpop.f32.mrb[1].mxu0  ;;  %v428_v6 = vsel %vm382_vm1, %v1224_v4, 0.0  ;;  %v1230_v7 = vmul.f32 %v1224_v4, %v1224_v4 }
  0xec   : > { %429 = vadd.xlane.f32.xlu0 %v428_v6  ;;  %v423_v8 = vpop.f32.mrb[2].mxu0 }
  0xed   : > { %v982_v9 = vpop.f32.mrb[3].mxu0  ;;  %v434_v10 = vsel %vm382_vm1, %v1230_v7, 0.0 }
  0xf0   : > { %435 = vadd.xlane.f32.xlu0 %v434_v10 }
 0x179   : > { %v430_v11 = vpop.xlane.xlu0 %429 }
 0x17a   : > { %v432_v12 = vmul.f32 0.03125, %v430_v11 }
 0x17c   : > { %v438_v14 = vmul.f32 %v432_v12, %v432_v12  ;;  %v441_v19 = vsub.f32 %v1224_v4, %v432_v12 }
 0x17d   : > { %v436_v13 = vpop.xlane.xlu0 %435 }
 0x17e   : > { %v437_v15 = vmul.f32 0.03125, %v436_v13 }
 0x180   : > { %v439_v16 = vsub.f32 %v437_v15, %v438_v14 }
 0x182   : > { %v440_v17 = vmax.f32 %v439_v16, 0.0 }
 0x184   : > { %v442_v18 = vadd.f32 1e-05, %v440_v17 }
 0x186   : > { %1058 = vrsqrt.f32 %v442_v18 }
 0x18f   : > { %462 = sbr.rel (%p942_p7) target bundleno = 406 (0x196), region = 60 }
 0x190   : > { %v1059_v20 = vpop.eup %1058 }
 0x191   : > { %v444_v22 = vmul.f32 %v1059_v20, %v441_v19 }
 0x193   : > { %v451_v24 = vmul.f32 %v1238_v21, %v444_v22 }
 0x195   : > { %v458_v25 = vadd.f32 %v1243_v23, %v451_v24 }
 0x196 PF: > { %s1111_s19 = smov 96   ;;  %v464_v31 = vld [vmem:[#allocation2] sm:$0xff]  ;;  %v1112_v51 = vmov (!%p942_p7), 0.0  }
 0x197   : > { %475 = vrot.lane.b32.xlu0 %v1224_v4, %s1111_s19  ;;  %v465_v32 = vsub.f32 %v458_v25, %v464_v31  ;;  %502 = vst.msk [vmem:[#allocation3] sm:$0xff] (!%p942_p7), %vm382_vm1, %v1112_v51 }
 0x199   : > { %v466_v33 = vmul.f32 0.5, %v465_v32 }
 0x19b   : > { %483 = vrot.lane.b32.xlu0 %v1230_v7, %s1111_s19  ;;  %v467_v34 = vadd.f32 %v466_v33, %v464_v31 }
 0x19d   : > { %vm468_vm2 = vcmp.ge.f32.partialorder %v467_v34, 1.0 }
 0x19e   : > { %v469_v35 = vsel %vm468_vm2, 0.0, %v467_v34  ;;  %v1258_v36 = vsel %vm468_vm2, 1.0, %v1108_v1 }
 0x19f   : > { %470 = vst.msk [vmem:[#allocation2] sm:$0xff] %vm382_vm1, %v469_v35  ;;  %v473_v37 = vpack.c.bf16 %v1258_v36, %v1258_v36 }
 0x209   : > { %v476_v27 = vpop.permute.xlu0 %475 }
 0x20a   : > { %v478_v28 = vsel %vm382_vm1, %v476_v27, 0.0 }
 0x20b   : > { %479 = vadd.xlane.f32.xlu1 %v478_v28 }
 0x20d   : > { %v484_v29 = vpop.permute.xlu0 %483 }
 0x20e   : > { %v486_v30 = vsel %vm382_vm1, %v484_v29, 0.0 }
 0x20f   : > { %487 = vadd.xlane.f32.xlu1 %v486_v30 }
 0x298   : > { %v480_v38 = vpop.xlane.xlu1 %479 }
 0x299   : > { %v481_v39 = vmul.f32 0.03125, %v480_v38 }
 0x29b   : > { %v490_v41 = vmul.f32 %v481_v39, %v481_v39  ;;  %v493_v46 = vsub.f32 %v1224_v4, %v481_v39 }
 0x29c   : > { %v488_v40 = vpop.xlane.xlu1 %487 }
 0x29d   : > { %v489_v42 = vmul.f32 0.03125, %v488_v40 }
 0x29f   : > { %v491_v43 = vsub.f32 %v489_v42, %v490_v41 }
 0x2a1   : > { %v492_v44 = vmax.f32 %v491_v43, 0.0 }
 0x2a3   : > { %v494_v45 = vadd.f32 1e-05, %v492_v44 }
 0x2a5   : > { %1060 = vrsqrt.f32 %v494_v45 }
 0x2ae   : > { %501 = sbr.rel (%p942_p7) target bundleno = 693 (0x2b5), region = 64 }
 0x2af   : > { %v1061_v47 = vpop.eup %1060 }
 0x2b0   : > { %v496_v48 = vmul.f32 %v1061_v47, %v493_v46 }
 0x2b2   : > { %v497_v49 = vmul.f32 %v1238_v21, %v496_v48 }
 0x2b4   : > { %v498_v50 = vadd.f32 %v1243_v23, %v497_v49 }
 0x2b5 PF: > { %v503_v52 = vld [vmem:[#allocation3] sm:$0xff]  ;;  %s1113_s20 = smov 32   ;;  %s1114_s21 = smov 64   ;;  %v1115_v24 = vmov (!%p942_p7), 0.0  }
 0x2b6   : > { %505 = vrot.lane.b32.xlu0 %v503_v52, %s1113_s20  ;;  %561 = vrot.lane.b32.xlu1 %v1230_v7, %s1114_s21  ;;  %580 = vst.msk [vmem:[#allocation4] sm:$0xff] (!%p942_p7), %vm382_vm1, %v1115_v24 }
 0x2ba   : > { %554 = vrot.lane.b32.xlu0 %v1224_v4, %s1114_s21 }
 0x328   : > { %v506_v53 = vpop.permute.xlu0 %505  ;;  %v562_v58 = vpop.permute.xlu1 %561 }
 0x329   : > { %v508_v54 = vsub.f32 %v498_v50, %v506_v53  ;;  %v564_v59 = vsel %vm382_vm1, %v562_v58, 0.0 }
 0x32b   : > { %v509_v55 = vmul.f32 0.5, %v508_v54 }
 0x32c   : > { %v555_v56 = vpop.permute.xlu0 %554 }
 0x32d   : > { %511 = vrot.lane.b32.xlu1 %v509_v55, %s1111_s19  ;;  %v557_v57 = vsel %vm382_vm1, %v555_v56, 0.0 }
 0x32e   : > { %558 = vadd.xlane.f32.xlu0 %v557_v57 }
 0x351   : > { %565 = vadd.xlane.f32.xlu1 %v564_v59 }
 0x39f   : > { %v512_v60 = vpop.permute.xlu1 %511 }
 0x3a0   : > { %v514_v61 = vadd.f32 %v512_v60, %v503_v52 }
 0x3a2   : > { %vm515_vm3 = vcmp.ge.f32.partialorder %v514_v61, 1.0 }
 0x3a3   : > { %v516_v62 = vsel %vm515_vm3, 0.0, %v514_v61  ;;  %v945_v63 = vsel %vm515_vm3, 1.0, %v1108_v1 }
 0x3a4   : > { %517 = vst.msk [vmem:[#allocation3] sm:$0xff] %vm382_vm1, %v516_v62  ;;  %520 = vxpose.xlu0.b32.start.end [1/1] (short) (narrow) %v945_v63, 32 }
 0x3bb   : > { %v559_v0 = vpop.xlane.xlu0 %558 }
 0x3bc   : > { %v560_v2 = vmul.f32 0.03125, %v559_v0 }
 0x3be   : > { %v568_v5 = vmul.f32 %v560_v2, %v560_v2  ;;  %v571_v11 = vsub.f32 %v1224_v4, %v560_v2 }
 0x3de   : > { %v566_v6 = vpop.xlane.xlu1 %565 }
 0x3df   : > { %v567_v7 = vmul.f32 0.03125, %v566_v6 }
 0x3e1   : > { %v569_v8 = vsub.f32 %v567_v7, %v568_v5 }
 0x3e3   : > { %v570_v9 = vmax.f32 %v569_v8, 0.0 }
 0x3e5   : > { %v572_v10 = vadd.f32 1e-05, %v570_v9 }
 0x3e7   : > { %1062 = vrsqrt.f32 %v572_v10 }
 0x3f1   : > { %v1063_v12 = vpop.eup %1062 }
 0x3f2   : > { %v574_v13 = vmul.f32 %v1063_v12, %v571_v11 }
 0x3f4   : > { %v575_v14 = vmul.f32 %v1238_v21, %v574_v13 }
 0x3f6   : > { %v576_v15 = vadd.f32 %v1243_v23, %v575_v14 }
 0x424   : > { %v536_v16 = vpop.trf.xlu0 }
 0x428   : > { %v537_v17 = vpop.trf.xlu0 }
 0x429   : > { %v552_v18 = vpack.c.bf16 %v537_v17, %v536_v16 }
 0x42b   : > { %579 = sbr.rel (%p942_p7) target bundleno = 1074 (0x432), region = 68 }
 0x42c   : > { %v538_v19 = vpop.trf.xlu0 }
 0x430   : > { %v539_v20 = vpop.trf.xlu0 }
 0x431   : > { %v553_v22 = vpack.c.bf16 %v539_v20, %v538_v19 }
 0x432 PF: > { %v581_v4 = vld [vmem:[#allocation4] sm:$0xff]  ;;  %vm599_vm4 = vcmask 64512   ;;  %vm606_vm6 = vcmask 1043456   ;;  %v662_v34 = vld [vmem:[%s1363_s4 + $0x18] sm:$0xff]  ;;  %v659_v38 = vld [vmem:[%s1363_s4] sm:$0xff]  ;;  %v1116_v52 = vmov (!%p942_p7), 0.0  }
 0x433   : > { %583 = vrot.lane.b32.xlu0 %v581_v4, %s1114_s21  ;;  %985 = vmatprep.mubr.msk.bf16.mxu1 %vm599_vm4, %v552_v18  ;;  %v661_v33 = vld [vmem:[%s1363_s4 + $0x10] sm:$0xff]  ;;  %v660_v39 = vld [vmem:[%s1363_s4 + $0x8] sm:$0xff]  ;;  %715 = vst.msk [vmem:[#allocation5] sm:$0xff] (!%p942_p7), %vm382_vm1, %v1116_v52 }
 0x4a5   : > { %v584_v21 = vpop.permute.xlu0 %583 }
 0x4a6   : > { %v586_v23 = vsub.f32 %v576_v15, %v584_v21 }
 0x4a8   : > { %v587_v25 = vmul.f32 0.5, %v586_v23 }
 0x4aa   : > { %589 = vrot.lane.b32.xlu0 %v587_v25, %s1114_s21 }
 0x51c   : > { %v590_v26 = vpop.permute.xlu0 %589 }
 0x51d   : > { %v592_v27 = vadd.f32 %v590_v26, %v581_v4 }
 0x51f   : > { %vm593_vm5 = vcmp.ge.f32.partialorder %v592_v27, 1.0 }
 0x520   : > { %v594_v28 = vsel %vm593_vm5, 0.0, %v592_v27  ;;  %v947_v29 = vsel %vm593_vm5, 1.0, %v1108_v1 }
 0x521   : > { %595 = vst.msk [vmem:[#allocation4] sm:$0xff] %vm382_vm1, %v594_v28  ;;  %v598_v30 = vpack.c.bf16 %v947_v29, %v947_v29 }
 0x523   : > { %1005 = vmatprep.subr.msk.bf16.mxu1 %vm606_vm6, %v598_v30  ;;  %v608_v31 = vsel %vm606_vm6, %v598_v30, 0 }
 0x524   : > { %984 = vmatpush3.bf16.msra.mxu1 %v608_v31 }
 0x525   : > { %989 = vmatprep.subr.bf16.mxu1 %v1108_v1 }
 0x527   : > { %986 = vmatmul.mubr.msk.bf16.vlgmr.msra.gmra.mrb[0].mxu1 %vm599_vm4, %v553_v22 }
 0x528   : > { %993 = vmatprep.mubr.msk.bf16.mxu1 %vm1109_vm0, %v1108_v1 }
 0x5fa   : > { %v987_v32 = vpop.f32.mrb[0].mxu1 }
 0x5fb   : > { %v644_v35 = vpop.f32.mrb[1].mxu1  ;;  %v665_v41 = vmul.f32 %v987_v32, %v661_v33 }
 0x5fc   : > { %v988_v40 = vpop.f32.mrb[2].mxu1  ;;  %v663_v44 = vmul.f32 %v659_v38, %v644_v35 }
 0x5fd   : > { %v666_v42 = vmul.f32 %v988_v40, %v662_v34  ;;  %v647_v43 = vpop.f32.mrb[3].mxu1 }
 0x5fe   : > { %v664_v45 = vmul.f32 %v660_v39, %v647_v43 }
 0x5ff   : > { %v668_v46 = vpack.c.bf16 %v666_v42, %v665_v41 }
 0x600   : > { %v667_v47 = vpack.c.bf16 %v664_v45, %v663_v44 }
 0x602   : > { %990 = vmatpush3.bf16.msra.mxu1 %v667_v47 }
 0x603   : > { %991 = vmatprep.subr.bf16.mxu1 %v1108_v1 }
 0x606   : > { %992 = vmatpush3.bf16.msra.mxu1 %v668_v46 }
 0x609   : > { %994 = vmatmul.mubr.msk.bf16.vlgmr.msra.gmra.mrb[4].mxu1 %vm382_vm1, %v473_v37 }
 0x6d9   : > { %714 = sbr.rel (%p942_p7) target bundleno = 1760 (0x6e0), region = 72 }
 0x6dc   : > { %v706_v48 = vpop.f32.mrb[4].mxu1 }
 0x6dd   : > { %v995_v49 = vpop.f32.mrb[5].mxu1 }
 0x6de   : > { %v709_v50 = vpop.f32.mrb[6].mxu1 }
 0x6df   : > { %v996_v51 = vpop.f32.mrb[7].mxu1 }
 0x6e0 PF: > { %997 = vmatprep.subr.bf16.mxu0 %v1108_v1  ;;  %v1064_v53 = vld [vmem:[%s1364_s5] sm:$0xff]   ;;  %1001 = vmatprep.mubr.msk.bf16.mxu0 %vm1109_vm0, %v1108_v1  ;;  %v1065_v36 = vld [vmem:[%s1364_s5 + $0x8] sm:$0xff]   ;;  %v716_v37 = vld [vmem:[#allocation5] sm:$0xff]  ;;  %v1117_v4 = vmov (!%p942_p7), 0.0  }
 0x6e1   : > { %998 = vmatpush3.bf16.msra.mxu0 %v1064_v53  ;;  %v717_v54 = vsub.f32 %v706_v48, %v716_v37  ;;  %v953_v60 = vld [vmem:[%s1365_s6] ss:$0 sm:$0xff]  ;;  %827 = vst.msk [vmem:[#allocation6] sm:$0xff] (!%p942_p7), %vm382_vm1, %v1117_v4 }
 0x6e2   : > { %999 = vmatprep.subr.bf16.mxu0 %v1108_v1  ;;  %v957_v18 = vld [vmem:[%s1366_s7] ss:$0 sm:$0xff] }
 0x6e3   : > { %v718_v55 = vmul.f32 0.5, %v717_v54  ;;  %v958_v20 = vld [vmem:[%s1367_s8] ss:$0 sm:$0xff] }
 0x6e5   : > { %1000 = vmatpush3.bf16.msra.mxu0 %v1065_v36  ;;  %v719_v56 = vadd.f32 %v718_v55, %v716_v37 }
 0x6e7   : > { %vm720_vm7 = vcmp.ge.f32.partialorder %v719_v56, 0.5 }
 0x6e8   : > { %v721_v57 = vsel %vm720_vm7, 0.0, %v719_v56  ;;  %v952_v58 = vsel %vm720_vm7, 1.0, %v1108_v1 }
 0x6e9   : > { %722 = vst.msk [vmem:[#allocation5] sm:$0xff] %vm382_vm1, %v721_v57  ;;  %v725_v59 = vpack.c.bf16 %v952_v58, %v952_v58 }
 0x6eb   : > { %1002 = vmatmul.mubr.msk.bf16.vlgmr.msra.gmra.mrb[4].mxu0 %vm382_vm1, %v725_v59 }
 0x7be   : > { %v786_v61 = vpop.f32.mrb[4].mxu0 }
 0x7bf   : > { %v787_v62 = vadd.f32 %v953_v60, %v786_v61  ;;  %v1003_v63 = vpop.f32.mrb[5].mxu0 }
 0x7c0   : > { %v789_v0 = vpop.f32.mrb[6].mxu0 }
 0x7c1   : > { %v1004_v2 = vpop.f32.mrb[7].mxu0  ;;  %v794_v5 = vsel %vm382_vm1, %v787_v62, 0.0  ;;  %v798_v6 = vmul.f32 %v787_v62, %v787_v62 }
 0x7c2   : > { %795 = vadd.xlane.f32.xlu0 %v794_v5 }
 0x7c3   : > { %v799_v7 = vsel %vm382_vm1, %v798_v6, 0.0 }
 0x7c6   : > { %800 = vadd.xlane.f32.xlu0 %v799_v7 }
 0x84f   : > { %v796_v8 = vpop.xlane.xlu0 %795 }
 0x850   : > { %v797_v9 = vmul.f32 0.03125, %v796_v8 }
 0x852   : > { %v803_v11 = vmul.f32 %v797_v9, %v797_v9  ;;  %v806_v16 = vsub.f32 %v787_v62, %v797_v9 }
 0x853   : > { %v801_v10 = vpop.xlane.xlu0 %800 }
 0x854   : > { %v802_v12 = vmul.f32 0.03125, %v801_v10 }
 0x856   : > { %v804_v13 = vsub.f32 %v802_v12, %v803_v11 }
 0x858   : > { %v805_v14 = vmax.f32 %v804_v13, 0.0 }
 0x85a   : > { %v807_v15 = vadd.f32 1e-05, %v805_v14 }
 0x85c   : > { %1066 = vrsqrt.f32 %v807_v15 }
 0x865   : > { %826 = sbr.rel (%p942_p7) target bundleno = 2156 (0x86c), region = 76 }
 0x866   : > { %v1067_v17 = vpop.eup %1066 }
 0x867   : > { %v809_v19 = vmul.f32 %v1067_v17, %v806_v16 }
 0x869   : > { %v816_v22 = vmul.f32 %v957_v18, %v809_v19 }
 0x86b   : > { %v823_v24 = vadd.f32 %v958_v20, %v816_v22 }
 0x86c PF: > { %v828_v21 = vld [vmem:[#allocation6] sm:$0xff]  ;;  %v837_v27 = vunpack.c.l.bf16 %v1220_v3  ;;  %vm840_vm9 = vcmask 257024  }
 0x86d   : > { %v829_v23 = vsub.f32 %v823_v24, %v828_v21 }
 0x86f   : > { %v830_v25 = vmul.f32 0.5, %v829_v23 }
 0x871   : > { %v831_v26 = vadd.f32 %v830_v25, %v828_v21 }
 0x873   : > { %vm832_vm8 = vcmp.ge.f32.partialorder %v831_v26, 1.0 }
 0x874   : > { %v833_v28 = vsel %vm832_vm8, 0.0, %v831_v26  ;;  %v960_v29 = vsel %vm832_vm8, 1.0, %v1108_v1 }
 0x875   : > { %834 = vst.msk [vmem:[#allocation6] sm:$0xff] %vm382_vm1, %v833_v28  ;;  %v838_v30 = vadd.f32 %v960_v29, %v837_v27 }
 0x877   : > { %v839_v31 = vpack.c.bf16 %v838_v30, %v838_v30 }
 0x879   : > { %841 = vst.msk [vmem:[%s1218_s29] sm:$0xf] %vm840_vm9, %v839_v31 }
 0x87a PF: > { %s19_s13 = sadd.s32 1, %s1106_s13   ;;  %s1369_s30 = smov %s1098_s11 }
 0x87b   : > { %p16_p8 = scmp.ge.s32.totalorder %s19_s13, 10   ;;  %s1370_s10 = smov %s1102_s12 }
 0x87c   : > { %s1371_s11 = smov %s1374_s14  ;;  %s1372_s12 = smov %s1378_s15 }
 0x87d   :  { %18 = sbr.rel (!%p16_p8) target bundleno = 3 (0x3), region = 106 }

// kernel: sfsrec_forward.10
= control target key start
LH: loop header
LB: loop body
LE: loop exit
PB: predicated region body
PF: predicated region fallthrough
CT: control target
= control target key end

     0   :  { %s1123_s30 = smov 0   ;;  %s1125_s10 = smov 0   ;;  %s1281_s0 = inlined_call_operand.vmem [shape: bf16[4,16,32], index: 0, kind: input, shape index: {}]   ;;  %s1282_s1 = inlined_call_operand.vmem [shape: bf16[32,256], index: 1, kind: input, shape index: {}]   ;;  %s1283_s2 = inlined_call_operand.vmem [shape: f32[1,256], index: 2, kind: input, shape index: {}]   ;;  %s1284_s3 = inlined_call_operand.vmem [shape: f32[1,256], index: 3, kind: input, shape index: {}]   ;;  %s1285_s4 = inlined_call_operand.vmem [shape: f32[1,256], index: 4, kind: input, shape index: {}]   ;;  %s1286_s5 = inlined_call_operand.vmem [shape: bf16[256,32], index: 5, kind: input, shape index: {}]   ;;  %s1287_s6 = inlined_call_operand.vmem [shape: f32[1,32], index: 6, kind: input, shape index: {}]   ;;  %s1288_s7 = inlined_call_operand.vmem [shape: f32[1,32], index: 7, kind: input, shape index: {}]   ;;  %s1289_s8 = inlined_call_operand.vmem [shape: f32[1,32], index: 8, kind: input, shape index: {}]   ;;  %s1290_s9 = inlined_call_operand.vmem [shape: f32[16,32], index: 9, kind: output, shape index: {}]  }
   0x1   :  { %s1127_s11 = smov 0  }
   0x2 LB: > { %s28_s12 = sadd.s32 1, %s1062_s10  ;;  %p914_p0 = scmp.ge.s32.totalorder %s1066_s11, 1  ;;  %s1066_s11 = sphi %s1127_s11, %s19_s11   ;;  %s1062_s10 = sphi %s1125_s10, %s1292_s10   ;;  %s1058_s30 = sphi %s1123_s30, %s1291_s30  }
   0x3   : > { %p29_p1 = scmp.ge.s32.totalorder %s28_s12, 4  ;;  %p306_p2 = scmp.lt.s32.totalorder %s1066_s11, 5 }
   0x5   : > { %s1294_s12 = smov (%p29_p1, %s28_s12), 0  ;;  %p307_p3 = pnand %p914_p0, %p306_p2 }
   0x6   : > { %v1012_v0 = vld [vmem:[%s1282_s1 + $0x4] ss:$8 sps:$4 sm:$0xff] (!%p307_p3)   ;;  %p347_p4 = scmp.lt.s32.totalorder (!%p307_p3), %s1058_s30, 3  ;;  %v1014_v1 = vld [vmem:[%s1282_s1] ss:$8 sps:$4 sm:$0xff] (!%p307_p3)   ;;  %v1068_v2 = vmov (!%p307_p3), 0   ;;  %v371_v6 = vlaneseq (!%p307_p3) }
   0x7   : > { %310 = sbr.rel (%p307_p3) target bundleno = 855 (0x357), region = 56  ;;  %442 = vmatprep.mubr.bf16.mxu0 (!%p307_p3), %v1068_v2  ;;  %410 = vmatprep.subr.bf16.mxu0 (!%p307_p3), %v1012_v0  ;;  %v1015_v3 = vld [vmem:[%s1282_s1 + $0x14] ss:$8 sps:$4 sm:$0xff] (!%p307_p3)   ;;  %v1017_v4 = vld [vmem:[%s1282_s1 + $0x10] ss:$8 sps:$4 sm:$0xff] (!%p307_p3)   ;;  %vm406_vm0 = vcmask (!%p307_p3), 261120  }
   0x8   : > { %411 = vmatpush1.bf16.msra.mxu0 (!%p307_p3), %v1014_v1  ;;  %v372_v7 = vshrl.u32 (!%p307_p3), %v371_v6, 7  ;;  %v369_v9 = vld [vmem:[%s1283_s2] sm:$0x3] (!%p307_p3)  ;;  %p923_p5 = scmp.ne.s32.totalorder (!%p307_p3), %s1058_s30, 0 }
   0x9   : > { %412 = vmatprep.subr.bf16.mxu0 (!%p307_p3), %v1015_v3  ;;  %v453_v45 = vld [vmem:[%s1284_s3] sm:$0x3] (!%p307_p3) }
   0xa   : > { %v373_v8 = vsub.s32 (!%p307_p3), 0, %v372_v7  ;;  %v377_v10 = vsub.s32 (!%p307_p3), 1, %v372_v7  ;;  %v454_v46 = vld [vmem:[%s1285_s4] sm:$0x3] (!%p307_p3) }
   0xc   : > { %413 = vmatpush1.bf16.msra.mxu0 (!%p307_p3), %v1017_v4  ;;  %v374_v11 = vrot.slane (!%p307_p3), %v369_v9, %v373_v8  ;;  %v378_v12 = vrot.slane (!%p307_p3), %v369_v9, %v377_v10  ;;  %v498_v47 = vrot.slane (!%p307_p3), %v453_v45, %v373_v8  ;;  %v502_v48 = vrot.slane (!%p307_p3), %v453_v45, %v377_v10 }
   0xd   : > { %v513_v52 = vrot.slane (!%p307_p3), %v454_v46, %v373_v8  ;;  %v517_v53 = vrot.slane (!%p307_p3), %v454_v46, %v377_v10 }
   0xe   : > { %s348_s19 = scalar_select %p347_p4, %s1058_s30, 3 }
   0xf   : > { %v1069_v6 = vmov (!%p923_p5), 0.0  }
  0x10   : > { %s960_s22 = sshll.u32 %s348_s19, 3  ;;  %528 = vst [vmem:[#allocation2] sm:$0xff] (!%p923_p5), %v1069_v6  ;;  %529 = vst [vmem:[#allocation2 + $0x8] sm:$0xff] (!%p923_p5), %v1069_v6 }
  0x11   : > { %s354_s25 = scalar_lea.vmem %s1281_s0, %s960_s22  ;;  %530 = vst [vmem:[#allocation2 + $0x10] sm:$0xff] (!%p923_p5), %v1069_v6  ;;  %531 = vst [vmem:[#allocation2 + $0x18] sm:$0xff] (!%p923_p5), %v1069_v6 }
  0x12   : > { %v1160_v5 = vld [vmem:[%s354_s25] sm:$0xff]  }
  0x13   : > { %922 = vmatmul.mubr.msk.bf16.vlgmr.msra.gmra.mrb[0].mxu0 %vm406_vm0, %v1160_v5 }
  0xe6   : > { %v444_v13 = vpop.f32.mrb[0].mxu0 }
  0xe7   : > { %v445_v14 = vadd.f32 %v444_v13, %v374_v11  ;;  %v446_v15 = vpop.f32.mrb[1].mxu0 }
  0xe8   : > { %v447_v16 = vadd.f32 %v446_v15, %v378_v12  ;;  %v448_v17 = vpop.f32.mrb[2].mxu0 }
  0xe9   : > { %v449_v18 = vadd.f32 %v448_v17, %v374_v11  ;;  %v450_v19 = vpop.f32.mrb[3].mxu0  ;;  %v464_v20 = vmul.f32 %v445_v14, %v445_v14 }
  0xea   : > { %v451_v21 = vadd.f32 %v450_v19, %v378_v12  ;;  %v455_v22 = vadd.f32 %v447_v16, %v445_v14  ;;  %v465_v23 = vmul.f32 %v447_v16, %v447_v16 }
  0xeb   : > { %v466_v25 = vmul.f32 %v449_v18, %v449_v18 }
  0xec   : > { %456 = vadd.xlane.f32.xlu0 %v455_v22  ;;  %v468_v24 = vadd.f32 %v465_v23, %v464_v20  ;;  %v467_v26 = vmul.f32 %v451_v21, %v451_v21  ;;  %v458_v27 = vadd.f32 %v451_v21, %v449_v18 }
  0xee   : > { %469 = vadd.xlane.f32.xlu1 %v468_v24  ;;  %v471_v28 = vadd.f32 %v467_v26, %v466_v25 }
  0xf0   : > { %459 = vadd.xlane.f32.xlu0 %v458_v27 }
  0xf2   : > { %472 = vadd.xlane.f32.xlu1 %v471_v28 }
 0x179   : > { %v457_v29 = vpop.xlane.xlu0 %456 }
 0x17a   : > { %v462_v30 = vmul.f32 0.00390625, %v457_v29 }
 0x17b   : > { %v470_v31 = vpop.xlane.xlu1 %469 }
 0x17c   : > { %v474_v32 = vmul.f32 0.00390625, %v470_v31  ;;  %v476_v33 = vmul.f32 %v462_v30, %v462_v30  ;;  %v482_v49 = vsub.f32 %v445_v14, %v462_v30  ;;  %v483_v50 = vsub.f32 %v447_v16, %v462_v30 }
 0x17d   : > { %v460_v34 = vpop.xlane.xlu0 %459 }
 0x17e   : > { %v478_v35 = vsub.f32 %v474_v32, %v476_v33  ;;  %v463_v36 = vmul.f32 0.00390625, %v460_v34 }
 0x17f   : > { %v473_v37 = vpop.xlane.xlu1 %472 }
 0x180   : > { %v480_v38 = vmax.f32 %v478_v35, 0.0  ;;  %v475_v39 = vmul.f32 0.00390625, %v473_v37  ;;  %v477_v40 = vmul.f32 %v463_v36, %v463_v36  ;;  %v484_v58 = vsub.f32 %v449_v18, %v463_v36 }
 0x181   : > { %v485_v59 = vsub.f32 %v451_v21, %v463_v36 }
 0x182   : > { %v486_v41 = vadd.f32 1e-05, %v480_v38  ;;  %v479_v42 = vsub.f32 %v475_v39, %v477_v40 }
 0x184   : > { %1020 = vrsqrt.f32 %v486_v41  ;;  %v481_v43 = vmax.f32 %v479_v42, 0.0 }
 0x186   : > { %v487_v44 = vadd.f32 1e-05, %v481_v43 }
 0x188   : > { %1022 = vrsqrt.f32 %v487_v44 }
 0x18e   : > { %v1021_v51 = vpop.eup %1020 }
 0x18f   : > { %v490_v54 = vmul.f32 %v1021_v51, %v482_v49  ;;  %v491_v55 = vmul.f32 %v1021_v51, %v483_v50 }
 0x191   : > { %v505_v56 = vmul.f32 %v498_v47, %v490_v54  ;;  %v506_v57 = vmul.f32 %v502_v48, %v491_v55  ;;  %527 = sbr.rel (%p923_p5) target bundleno = 408 (0x198), region = 60 }
 0x192   : > { %v1023_v60 = vpop.eup %1022 }
 0x193   : > { %v520_v61 = vadd.f32 %v513_v52, %v505_v56  ;;  %v521_v62 = vadd.f32 %v517_v53, %v506_v57  ;;  %v492_v63 = vmul.f32 %v1023_v60, %v484_v58  ;;  %v493_v0 = vmul.f32 %v1023_v60, %v485_v59 }
 0x195   : > { %v507_v1 = vmul.f32 %v498_v47, %v492_v63  ;;  %v508_v2 = vmul.f32 %v502_v48, %v493_v0 }
 0x197   : > { %v522_v3 = vadd.f32 %v513_v52, %v507_v1  ;;  %v523_v4 = vadd.f32 %v517_v53, %v508_v2 }
 0x198 PF: > { %v1024_v7 = vld [vmem:[%s1286_s5 + $0x40] sm:$0xff]   ;;  %v1026_v9 = vld [vmem:[%s1286_s5 + $0x48] sm:$0xff]   ;;  %v1028_v11 = vld [vmem:[%s1286_s5 + $0x50] sm:$0xff]   ;;  %v1070_v41 = vmov 1.0|1.0  }
 0x199   : > { %v1025_v8 = vld [vmem:[%s1286_s5] sm:$0xff]   ;;  %961 = vmatprep.subr.bf16.mxu1 %v1024_v7  ;;  %v1027_v10 = vld [vmem:[%s1286_s5 + $0x8] sm:$0xff]   ;;  %v1029_v12 = vld [vmem:[%s1286_s5 + $0x10] sm:$0xff]  }
 0x19a   : > { %962 = vmatpush3.bf16.msra.mxu1 %v1025_v8  ;;  %v1030_v13 = vld [vmem:[%s1286_s5 + $0x58] sm:$0xff]   ;;  %v1032_v15 = vld [vmem:[%s1286_s5 + $0x60] sm:$0xff]   ;;  %v1034_v17 = vld [vmem:[%s1286_s5 + $0x68] sm:$0xff]  }
 0x19b   : > { %963 = vmatprep.subr.bf16.mxu1 %v1026_v9  ;;  %v1031_v14 = vld [vmem:[%s1286_s5 + $0x18] sm:$0xff]   ;;  %v1033_v16 = vld [vmem:[%s1286_s5 + $0x20] sm:$0xff]   ;;  %v533_v18 = vld [vmem:[#allocation2 + $0x8] sm:$0xff] }
 0x19c   : > { %v535_v19 = vld [vmem:[#allocation2 + $0x18] sm:$0xff]  ;;  %v532_v20 = vld [vmem:[#allocation2] sm:$0xff]  ;;  %v537_v21 = vsub.f32 %v521_v62, %v533_v18  ;;  %v534_v23 = vld [vmem:[#allocation2 + $0x10] sm:$0xff] }
 0x19d   : > { %v539_v22 = vsub.f32 %v523_v4, %v535_v19  ;;  %v536_v24 = vsub.f32 %v520_v61, %v532_v20  ;;  %v538_v25 = vsub.f32 %v522_v3, %v534_v23  ;;  %v1035_v26 = vld [vmem:[%s1286_s5 + $0x28] sm:$0xff]   ;;  %v1036_v30 = vld [vmem:[%s1286_s5 + $0x70] sm:$0xff]   ;;  %v1038_v37 = vld [vmem:[%s1286_s5 + $0x78] sm:$0xff]  }
 0x19e   : > { %964 = vmatpush3.bf16.msra.mxu1 %v1027_v10  ;;  %v541_v27 = vmul.f32 0.5, %v537_v21  ;;  %v1037_v36 = vld [vmem:[%s1286_s5 + $0x30] sm:$0xff]   ;;  %v1039_v43 = vld [vmem:[%s1286_s5 + $0x38] sm:$0xff]   ;;  %v928_v45 = vld [vmem:[%s1287_s6] ss:$0 sm:$0xff] }
 0x19f   : > { %965 = vmatprep.subr.bf16.mxu1 %v1028_v11  ;;  %v543_v28 = vmul.f32 0.5, %v539_v22  ;;  %v540_v29 = vmul.f32 0.5, %v536_v24  ;;  %v542_v31 = vmul.f32 0.5, %v538_v25  ;;  %v1071_v24 = vmov (!%p923_p5), 0.0  }
 0x1a0   : > { %v545_v32 = vadd.f32 %v541_v27, %v533_v18  ;;  %800 = vst.msk [vmem:[#allocation3] sm:$0xff] (!%p923_p5), %vm406_vm0, %v1071_v24  ;;  %801 = vst.msk [vmem:[#allocation3 + $0x8] sm:$0xff] (!%p923_p5), %vm406_vm0, %v1071_v24 }
 0x1a1   : > { %v547_v33 = vadd.f32 %v543_v28, %v535_v19  ;;  %v544_v34 = vadd.f32 %v540_v29, %v532_v20  ;;  %v546_v35 = vadd.f32 %v542_v31, %v534_v23 }
 0x1a2   : > { %966 = vmatpush3.bf16.msra.mxu1 %v1029_v12  ;;  %vm549_vm1 = vcmp.ge.f32.partialorder %v545_v32, 1.0 }
 0x1a3   : > { %967 = vmatprep.subr.bf16.mxu1 %v1030_v13  ;;  %vm551_vm2 = vcmp.ge.f32.partialorder %v547_v33, 1.0  ;;  %vm548_vm3 = vcmp.ge.f32.partialorder %v544_v34, 1.0  ;;  %v553_v38 = vsel %vm549_vm1, 0.0, %v545_v32  ;;  %vm550_vm5 = vcmp.ge.f32.partialorder %v546_v35, 1.0 }
 0x1a4   : > { %v555_v39 = vsel %vm551_vm2, 0.0, %v547_v33  ;;  %vm945_vm4 = vmpackc.low %vm551_vm2, %vm549_vm1  ;;  %v552_v40 = vsel %vm548_vm3, 0.0, %v544_v34  ;;  %557 = vst [vmem:[#allocation2 + $0x8] sm:$0xff] %v553_v38  ;;  %v554_v42 = vsel %vm550_vm5, 0.0, %v546_v35 }
 0x1a5   : > { %559 = vst [vmem:[#allocation2 + $0x18] sm:$0xff] %v555_v39  ;;  %946 = vmatprep.mubr.msk.bf16.mxu1 %vm945_vm4, %v1070_v41  ;;  %556 = vst [vmem:[#allocation2] sm:$0xff] %v552_v40 }
 0x1a6   : > { %968 = vmatpush3.bf16.msra.mxu1 %v1031_v14  ;;  %558 = vst [vmem:[#allocation2 + $0x10] sm:$0xff] %v554_v42  ;;  %vm947_vm6 = vmpackc.low %vm550_vm5, %vm548_vm3  ;;  %v949_v14 = vld [vmem:[%s1288_s7] ss:$0 sm:$0xff] }
 0x1a7   : > { %969 = vmatprep.subr.bf16.mxu1 %v1032_v15 }
 0x1aa   : > { %970 = vmatpush3.bf16.msra.mxu1 %v1033_v16  ;;  %v950_v16 = vld [vmem:[%s1289_s8] ss:$0 sm:$0xff] }
 0x1ab   : > { %971 = vmatprep.subr.bf16.mxu1 %v1034_v17 }
 0x1ae   : > { %972 = vmatpush3.bf16.msra.mxu1 %v1035_v26 }
 0x1af   : > { %973 = vmatprep.subr.bf16.mxu1 %v1036_v30 }
 0x1b2   : > { %974 = vmatpush3.bf16.msra.mxu1 %v1037_v36 }
 0x1b3   : > { %975 = vmatprep.subr.bf16.mxu1 %v1038_v37 }
 0x1b6   : > { %976 = vmatpush3.bf16.msra.mxu1 %v1039_v43 }
 0x1b9   : > { %948 = vmatmul.mubr.msk.bf16.vlgmr.msra.gmra.mrb[0].mxu1 %vm947_vm6, %v1070_v41 }
 0x28c   : > { %v977_v44 = vpop.f32.mrb[0].mxu1 }
 0x28d   : > { %v978_v46 = vpop.f32.mrb[1].mxu1 }
 0x28e   : > { %v979_v47 = vadd.f32 %v978_v46, %v977_v44  ;;  %v980_v48 = vpop.f32.mrb[2].mxu1 }
 0x28f   : > { %v981_v49 = vpop.f32.mrb[3].mxu1 }
 0x290   : > { %v740_v50 = vadd.f32 %v979_v47, %v928_v45  ;;  %v982_v51 = vadd.f32 %v981_v49, %v980_v48 }
 0x292   : > { %v743_v52 = vadd.f32 %v982_v51, %v928_v45  ;;  %v748_v53 = vsel %vm406_vm0, %v740_v50, 0.0  ;;  %v757_v54 = vmul.f32 %v740_v50, %v740_v50 }
 0x293   : > { %749 = vadd.xlane.f32.xlu0 %v748_v53 }
 0x294   : > { %v759_v55 = vsel %vm406_vm0, %v757_v54, 0.0  ;;  %v758_v56 = vmul.f32 %v743_v52, %v743_v52  ;;  %v751_v57 = vsel %vm406_vm0, %v743_v52, 0.0 }
 0x295   : > { %760 = vadd.xlane.f32.xlu1 %v759_v55 }
 0x296   : > { %v762_v58 = vsel %vm406_vm0, %v758_v56, 0.0 }
 0x297   : > { %752 = vadd.xlane.f32.xlu0 %v751_v57 }
 0x299   : > { %763 = vadd.xlane.f32.xlu1 %v762_v58 }
 0x320   : > { %v750_v59 = vpop.xlane.xlu0 %749 }
 0x321   : > { %v755_v60 = vmul.f32 0.03125, %v750_v59 }
 0x322   : > { %v761_v61 = vpop.xlane.xlu1 %760 }
 0x323   : > { %v767_v62 = vmul.f32 %v755_v60, %v755_v60  ;;  %v765_v63 = vmul.f32 0.03125, %v761_v61  ;;  %v773_v12 = vsub.f32 %v740_v50, %v755_v60 }
 0x324   : > { %v753_v0 = vpop.xlane.xlu0 %752 }
 0x325   : > { %v769_v1 = vsub.f32 %v765_v63, %v767_v62  ;;  %v756_v2 = vmul.f32 0.03125, %v753_v0 }
 0x326   : > { %v764_v3 = vpop.xlane.xlu1 %763 }
 0x327   : > { %v771_v4 = vmax.f32 %v769_v1, 0.0  ;;  %v768_v6 = vmul.f32 %v756_v2, %v756_v2  ;;  %v766_v7 = vmul.f32 0.03125, %v764_v3  ;;  %v774_v18 = vsub.f32 %v743_v52, %v756_v2 }
 0x329   : > { %v775_v8 = vadd.f32 1e-05, %v771_v4  ;;  %v770_v9 = vsub.f32 %v766_v7, %v768_v6 }
 0x32b   : > { %1040 = vrsqrt.f32 %v775_v8  ;;  %v772_v10 = vmax.f32 %v770_v9, 0.0 }
 0x32d   : > { %v776_v11 = vadd.f32 1e-05, %v772_v10 }
 0x32f   : > { %1042 = vrsqrt.f32 %v776_v11 }
 0x335   : > { %v1041_v13 = vpop.eup %1040 }
 0x336   : > { %v779_v15 = vmul.f32 %v1041_v13, %v773_v12 }
 0x338   : > { %v787_v17 = vmul.f32 %v949_v14, %v779_v15  ;;  %799 = sbr.rel (%p923_p5) target bundleno = 831 (0x33f), region = 64 }
 0x339   : > { %v1043_v19 = vpop.eup %1042 }
 0x33a   : > { %v795_v20 = vadd.f32 %v950_v16, %v787_v17  ;;  %v780_v21 = vmul.f32 %v1043_v19, %v774_v18 }
 0x33c   : > { %v788_v22 = vmul.f32 %v949_v14, %v780_v21 }
 0x33e   : > { %v796_v23 = vadd.f32 %v950_v16, %v788_v22 }
 0x33f PF: > { %v802_v25 = vld [vmem:[#allocation3] sm:$0xff]  ;;  %v803_v26 = vld [vmem:[#allocation3 + $0x8] sm:$0xff]  ;;  %v820_v32 = vunpack.c.l.bf16 %v1160_v5  ;;  %v821_v34 = vunpack.c.h.bf16 %v1160_v5  ;;  %v1072_v36 = vmov 0.0  }
 0x340   : > { %v804_v27 = vsub.f32 %v795_v20, %v802_v25  ;;  %v805_v28 = vsub.f32 %v796_v23, %v803_v26 }
 0x342   : > { %v806_v29 = vmul.f32 0.5, %v804_v27  ;;  %v807_v30 = vmul.f32 0.5, %v805_v28  ;;  %826 = sbr.rel (%p923_p5) target bundleno = 845 (0x34d), region = 68 }
 0x344   : > { %v808_v31 = vadd.f32 %v806_v29, %v802_v25  ;;  %v809_v33 = vadd.f32 %v807_v30, %v803_v26 }
 0x346   : > { %vm810_vm7 = vcmp.ge.f32.partialorder %v808_v31, 1.0  ;;  %vm811_vm8 = vcmp.ge.f32.partialorder %v809_v33, 1.0 }
 0x347   : > { %v812_v35 = vsel %vm810_vm7, 0.0, %v808_v31  ;;  %v952_v37 = vsel %vm810_vm7, 1.0, %v1072_v36  ;;  %v813_v38 = vsel %vm811_vm8, 0.0, %v809_v33  ;;  %v953_v39 = vsel %vm811_vm8, 1.0, %v1072_v36 }
 0x348   : > { %814 = vst.msk [vmem:[#allocation3] sm:$0xff] %vm406_vm0, %v812_v35  ;;  %v822_v40 = vadd.f32 %v952_v37, %v820_v32  ;;  %815 = vst.msk [vmem:[#allocation3 + $0x8] sm:$0xff] %vm406_vm0, %v813_v38  ;;  %v823_v41 = vadd.f32 %v953_v39, %v821_v34 }
 0x34a   : > { %v827_v42 = vmul.f32 0.25, %v822_v40  ;;  %v828_v43 = vmul.f32 0.25, %v823_v41 }
 0x34c   : > { %829 = vst.msk [vmem:[%s1290_s9] sm:$0xff] %vm406_vm0, %v827_v42  ;;  %830 = vst.msk [vmem:[%s1290_s9 + $0x8] sm:$0xff] %vm406_vm0, %v828_v43 }
 0x34d PF: > { %p955_p6 = scmp.eq.s32.totalorder %s1058_s30, 0 }
 0x34e   : > { %v837_v44 = vmul.f32 (!%p955_p6), 0.25, %v822_v40  ;;  %v838_v46 = vmul.f32 (!%p955_p6), 0.25, %v823_v41 }
 0x34f   : > { %834 = sbr.rel (%p955_p6) target bundleno = 855 (0x357), region = 72 }
 0x353   : > { %v835_v5 = vld [vmem:[%s1290_s9] sm:$0xff] (!%p955_p6)  ;;  %v836_v45 = vld [vmem:[%s1290_s9 + $0x8] sm:$0xff] (!%p955_p6) }
 0x354   : > { %v839_v47 = vadd.f32 (!%p955_p6), %v837_v44, %v835_v5  ;;  %v840_v48 = vadd.f32 (!%p955_p6), %v838_v46, %v836_v45 }
 0x356   : > { %841 = vst.msk [vmem:[%s1290_s9] sm:$0xff] %vm406_vm0, %v839_v47  ;;  %842 = vst.msk [vmem:[%s1290_s9 + $0x8] sm:$0xff] %vm406_vm0, %v840_v48 }
 0x357 PF: > { %s19_s11 = sadd.s32 1, %s1066_s11   ;;  %s1291_s30 = smov %s1062_s10 }
 0x358   : > { %p16_p7 = scmp.ge.s32.totalorder %s19_s11, 6   ;;  %s1292_s10 = smov %s1294_s12 }
 0x35a   :  { %18 = sbr.rel (!%p16_p7) target bundleno = 2 (0x2), region = 102 }

// kernel: sfsrec_forward.11
= control target key start
LH: loop header
LB: loop body
LE: loop exit
PB: predicated region body
PF: predicated region fallthrough
CT: control target
= control target key end

     0   :  { %s381_s12 = smov 0   ;;  %s413_s0 = inlined_call_operand.vmem [shape: f32[16,32], index: 0, kind: input, shape index: {}]   ;;  %s414_s1 = inlined_call_operand.vmem [shape: f32[32,32], index: 1, kind: input, shape index: {}]   ;;  %s415_s2 = inlined_call_operand.vmem [shape: f32[1,32], index: 2, kind: input, shape index: {}]   ;;  %s416_s3 = inlined_call_operand.vmem [shape: f32[16,32], index: 3, kind: output, shape index: {}]  }
   0x1 LB: > { %s306_s13 = sadd.s32 4294967295, %s356_s12   ;;  %p310_p0 = scmp.ge.s32.totalorder %s356_s12, 1  ;;  %s356_s12 = sphi %s381_s12, %s13_s12  }
   0x2   : > { %p136_p1 = scmp.lt.s32.totalorder %s356_s12, 3 }
   0x4   : > { %p137_p2 = pnand %p310_p0, %p136_p1 }
   0x5   : > { %v167_v0 = vld [vmem:[%s414_s1] sm:$0xff] (!%p137_p2)  ;;  %v168_v1 = vld [vmem:[%s414_s1 + $0x8] sm:$0xff] (!%p137_p2)  ;;  %v169_v2 = vld [vmem:[%s414_s1 + $0x10] sm:$0xff] (!%p137_p2)  ;;  %v358_v3 = vmov (!%p137_p2), 0.0|0.0   ;;  %vm359_vm0 = vmmov (!%p137_p2), 0   ;;  %v360_v6 = vmov (!%p137_p2), 0.0  }
   0x6   : > { %140 = sbr.rel (%p137_p2) target bundleno = 232 (0xe8), region = 32  ;;  %333 = vmatprep.subr.bf16.mxu0 (!%p137_p2), %v358_v3  ;;  %v334_v4 = vpack.c.bf16 (!%p137_p2), %v168_v1, %v167_v0  ;;  %v170_v5 = vld [vmem:[%s414_s1 + $0x18] sm:$0xff] (!%p137_p2)  ;;  %330 = vmatprep.mubr.msk.f32.mxu0 (!%p137_p2), %vm359_vm0, %v360_v6  ;;  %p158_p3 = scmp.lt.s32.totalorder (!%p137_p2), %s306_s13, 1  ;;  %vm178_vm1 = vcmask (!%p137_p2), 261120   ;;  %v313_v9 = vld [vmem:[%s415_s2] ss:$0 sm:$0xff] (!%p137_p2) }
   0x7   : > { %v337_v7 = vpack.c.bf16 (!%p137_p2), %v170_v5, %v169_v2 }
   0x8   : > { %335 = vmatpush3.bf16.msra.mxu0 (!%p137_p2), %v334_v4 }
   0x9   : > { %336 = vmatprep.subr.bf16.mxu0 (!%p137_p2), %v358_v3 }
   0xc   : > { %338 = vmatpush3.bf16.msra.mxu0 (!%p137_p2), %v337_v7 }
   0xd   : > { %s418_s13 = smov (!%p158_p3, %s306_s13), 1 }
   0xe   : > { %s311_s22 = sshll.u32 %s418_s13, 3 }
   0xf   : > { %s161_s25 = scalar_lea.vmem %s413_s0, %s311_s22  ;;  %s165_s30 = scalar_lea.vmem %s416_s3, %s311_s22 }
  0x10   : > { %v166_v8 = vld [vmem:[%s161_s25] sm:$0xff] }
  0x11   : > { %331 = vmatmul.mubr.msk.f32.vlgmr.msra.gmra.mrb[0].mxu0 %vm178_vm1, %v166_v8 }
  0xe4   : > { %v248_v10 = vpop.f32.mrb[0].mxu0 }
  0xe5   : > { %v249_v11 = vadd.f32 %v313_v9, %v248_v10  ;;  %v332_v12 = vpop.f32.mrb[1].mxu0 }
  0xe7   : > { %252 = vst.msk [vmem:[%s165_s30] sm:$0xff] %vm178_vm1, %v249_v11 }
  0xe8 PF: > { %s13_s12 = sadd.s32 1, %s356_s12  }
  0xe9   : > { %p10_p4 = scmp.ge.s32.totalorder %s13_s12, 4  }
  0xeb   :  { %12 = sbr.rel (!%p10_p4) target bundleno = 1 (0x1), region = 62 }

</bundles_post_ra>
